<compile_context>
chip_gen: v7x
topology: tpu7x:2x2x1
jax: 0.10.0
libtpu: 0.0.40
codegen_flags: <defaults>
</compile_context>

<pallas_src>
import math

import jax
import jax.numpy as jnp
from jax import lax
from jax.experimental import pallas as pl
from jax.experimental.pallas import tpu as pltpu


# -----------------------------------------------------------------------------
# Shared forward math (used both inside the Pallas kernel and as the pure-JAX
# reference).  x_flat is (T*B, input) f32, time-major (row index = t*B + b);
# weights are bf16 (fan_in, fan_out); biases f32 (1, fan_out).
# -----------------------------------------------------------------------------
def _forward_math(x_flat, lstm_params, attn_params, head_params, *,
                  seq_len, batch, hidden_size, num_heads):
    f32, bf16 = jnp.float32, jnp.bfloat16
    T, B, H = seq_len, batch, hidden_size
    nh = num_heads
    dh = H // nh
    scale = 1.0 / math.sqrt(dh)

    def dense(a, w, b):
        # bf16 x bf16 matmul with f32 accumulation (MXU fast path), f32 bias.
        return jnp.dot(a.astype(bf16), w, preferred_element_type=f32) + b

    def matmul(a, b):
        return jnp.dot(a.astype(bf16), b.astype(bf16), preferred_element_type=f32)

    def dot_abT(a, b):
        # (m, d) x (n, d)^T -> (m, n), contraction on the last dim of both.
        return lax.dot_general(a.astype(bf16), b.astype(bf16),
                               (((1,), (1,)), ((), ())),
                               preferred_element_type=f32)

    # ---- stacked LSTM, PyTorch gate order (i, f, g, o), zero (h0, c0) ----
    flat_in = x_flat.astype(f32)                       # (T*B, in_dim)
    outs = None
    for w_ih, w_hh, b in lstm_params:
        # Input->gates contribution for ALL time steps in one matmul (hoisted
        # out of the sequential recurrence).
        ih_all = dense(flat_in, w_ih, b)               # (T*B, 4H) f32
        h = jnp.zeros((B, H), f32)
        c = jnp.zeros((B, H), f32)
        outs = []
        for t in range(T):
            z = ih_all[t * B:(t + 1) * B, :] + matmul(h, w_hh)     # (B, 4H)
            i_g = jax.nn.sigmoid(z[:, 0 * H:1 * H])
            f_g = jax.nn.sigmoid(z[:, 1 * H:2 * H])
            g_g = jnp.tanh(z[:, 2 * H:3 * H])
            o_g = jax.nn.sigmoid(z[:, 3 * H:4 * H])
            c = f_g * c + i_g * g_g
            h = o_g * jnp.tanh(c)
            outs.append(h)                             # (B, H)
        flat_in = jnp.concatenate(outs, axis=0)        # (T*B, H), time-major

    seq = outs                                         # final layer, (B, H) per step
    h_last = seq[T - 1]                                # (B, H)

    # ---- multi-head self-attention over time, last query position only ----
    wq, bq, wk, bk, wv, bv, wo, bo = attn_params
    q_last = dense(h_last, wq, bq) * scale             # (B, H); scale folded into Q
    ctx_rows = []
    for bi in range(B):
        ob = jnp.concatenate([h_t[bi:bi + 1, :] for h_t in seq], axis=0)  # (T, H)
        k = dense(ob, wk, bk)                          # (T, H)
        v = dense(ob, wv, bv)                          # (T, H)
        qb = q_last[bi:bi + 1, :]                      # (1, H)
        heads = []
        for hd in range(nh):
            lo, hi = hd * dh, (hd + 1) * dh
            s = dot_abT(qb[:, lo:hi], k[:, lo:hi])     # (1, T)
            s = s - jnp.max(s, axis=-1, keepdims=True)
            p = jnp.exp(s)
            p = p / jnp.sum(p, axis=-1, keepdims=True)
            heads.append(matmul(p, v[:, lo:hi]))       # (1, dh)
        ctx_rows.append(jnp.concatenate(heads, axis=1))            # (1, H)
    ctx = jnp.concatenate(ctx_rows, axis=0)            # (B, H)
    attn_last = dense(ctx, wo, bo)                     # (B, H)

    # ---- head MLP: relu(linear1) -> sigmoid(linear2) -> linear3 ----
    w1, b1, w2, b2, w3, b3 = head_params
    h1 = jax.nn.relu(dense(attn_last, w1, b1))
    h2 = jax.nn.sigmoid(dense(h1, w2, b2))
    return dense(h2, w3, b3)                           # (B, 128)


# -----------------------------------------------------------------------------
# Pallas kernel (single invocation, everything resident in VMEM)
# -----------------------------------------------------------------------------
def _make_kernel(seq_len, batch, num_layers, hidden_size, num_heads):
    n_lstm = 3 * num_layers

    def kernel(*refs):
        x_ref = refs[0]                                   # (T*B, I), time-major flat
        lstm_refs = refs[1:1 + n_lstm]
        attn_refs = refs[1 + n_lstm:1 + n_lstm + 8]
        head_refs = refs[1 + n_lstm + 8:1 + n_lstm + 14]
        o_ref = refs[1 + n_lstm + 14]

        lstm_params = [tuple(r[...] for r in lstm_refs[3 * l:3 * l + 3])
                       for l in range(num_layers)]
        attn_params = tuple(r[...] for r in attn_refs)
        head_params = tuple(r[...] for r in head_refs)

        y = _forward_math(x_ref[...], lstm_params, attn_params, head_params,
                          seq_len=seq_len, batch=batch,
                          hidden_size=hidden_size, num_heads=num_heads)
        o_ref[...] = y.astype(o_ref.dtype)

    return kernel


def lstm_mha_forward(x, params, *, hidden_size, num_layers, num_heads):
    lstm_params, attn_params, head_params = params
    B, T, I = x.shape
    out_dim = head_params[-2].shape[1]                    # linear3 out features (=128)

    flat = []
    for p in lstm_params:
        flat.extend(p)
    flat.extend(attn_params)
    flat.extend(head_params)

    # Time-major flatten on the host so the kernel only does 2-D slicing
    # (row index = t*B + b).
    x_flat = jnp.transpose(x, (1, 0, 2)).reshape(T * B, I)

    kernel = _make_kernel(T, B, num_layers, hidden_size, num_heads)
    return pl.pallas_call(
        kernel,
        out_shape=jax.ShapeDtypeStruct((B, out_dim), jnp.float32),
        # Grid-less call: whole (tiny) operands live in VMEM; no pipeline
        # double-buffering or grid-loop overhead.
        in_specs=[pl.BlockSpec(memory_space=pltpu.VMEM)] * (1 + len(flat)),
        out_specs=pl.BlockSpec(memory_space=pltpu.VMEM),
    )(x_flat, *flat)


# -----------------------------------------------------------------------------
# Parameter init (PyTorch-style uniform bounds); weights pre-transposed to
# (fan_in, fan_out) and stored as bf16, biases kept in f32 as (1, fan_out).
# -----------------------------------------------------------------------------
def init_params(key, input_size, hidden_size, num_layers, output_size, num_heads):
    assert output_size == 128, "linear3 is nn.Linear(128, 128): output_size must be 128"
    assert hidden_size % num_heads == 0
    bf16, f32 = jnp.bfloat16, jnp.float32

    def uni(k, shape, bound):
        return jax.random.uniform(k, shape, f32, -bound, bound)

    H = hidden_size
    kH = 1.0 / math.sqrt(H)

    lstm_params = []
    in_dim = input_size
    for _ in range(num_layers):
        key, k1, k2, k3, k4 = jax.random.split(key, 5)
        w_ih = uni(k1, (in_dim, 4 * H), kH).astype(bf16)
        w_hh = uni(k2, (H, 4 * H), kH).astype(bf16)
        b = uni(k3, (1, 4 * H), kH) + uni(k4, (1, 4 * H), kH)   # b_ih + b_hh, f32
        lstm_params.append((w_ih, w_hh, b))
        in_dim = H

    key, kq, kk, kv, ko = jax.random.split(key, 5)
    wq = uni(kq, (H, H), kH).astype(bf16); bq = jnp.zeros((1, H), f32)
    wk = uni(kk, (H, H), kH).astype(bf16); bk = jnp.zeros((1, H), f32)
    wv = uni(kv, (H, H), kH).astype(bf16); bv = jnp.zeros((1, H), f32)
    wo = uni(ko, (H, H), kH).astype(bf16); bo = jnp.zeros((1, H), f32)
    attn_params = (wq, bq, wk, bk, wv, bv, wo, bo)

    half = H // 2
    key, k1, k2, k3, k4, k5, k6 = jax.random.split(key, 7)
    w1 = uni(k1, (H, half), 1.0 / math.sqrt(H)).astype(bf16)
    b1 = uni(k2, (1, half), 1.0 / math.sqrt(H))
    w2 = uni(k3, (half, output_size), 1.0 / math.sqrt(half)).astype(bf16)
    b2 = uni(k4, (1, output_size), 1.0 / math.sqrt(half))
    w3 = uni(k5, (128, 128), 1.0 / math.sqrt(128)).astype(bf16)
    b3 = uni(k6, (1, 128), 1.0 / math.sqrt(128))
    head_params = (w1, b1, w2, b2, w3, b3)

    return lstm_params, attn_params, head_params


def reference_forward(x, params, *, hidden_size, num_heads):
    lstm_params, attn_params, head_params = params
    B, T, I = x.shape
    x_flat = jnp.transpose(x, (1, 0, 2)).reshape(T * B, I)
    return _forward_math(x_flat, lstm_params, attn_params, head_params,
                         seq_len=T, batch=B,
                         hidden_size=hidden_size, num_heads=num_heads)


if __name__ == "__main__":
    INPUT_SIZE = 16
    HIDDEN_SIZE = 32
    NUM_LAYERS = 2
    OUTPUT_SIZE = 128   # required by linear3 = nn.Linear(128, 128)
    NUM_HEADS = 4
    B, T = 2, 8

    key = jax.random.PRNGKey(0)
    key, kx = jax.random.split(key)
    x = jax.random.normal(kx, (B, T, INPUT_SIZE), jnp.float32)
    params = init_params(key, INPUT_SIZE, HIDDEN_SIZE, NUM_LAYERS,
                         OUTPUT_SIZE, NUM_HEADS)

    out = lstm_mha_forward(x, params, hidden_size=HIDDEN_SIZE,
                           num_layers=NUM_LAYERS, num_heads=NUM_HEADS)
    out = jax.block_until_ready(out)

    ref = reference_forward(x, params, hidden_size=HIDDEN_SIZE,
                            num_heads=NUM_HEADS)
    assert out.shape == (B, OUTPUT_SIZE)
    max_err = float(jnp.max(jnp.abs(out - ref)))
    assert jnp.allclose(out, ref, atol=2e-2, rtol=2e-2), max_err

    print("KERNEL_OK")
</pallas_src>

<mosaic_0001>
module attributes {stable_mosaic.version = 11 : i64} {
  func.func @kernel(%arg0: memref<16x16xf32, #tpu.memory_space<vmem>>, %arg1: memref<16x128xbf16, #tpu.memory_space<vmem>>, %arg2: memref<32x128xbf16, #tpu.memory_space<vmem>>, %arg3: memref<1x128xf32, #tpu.memory_space<vmem>>, %arg4: memref<32x128xbf16, #tpu.memory_space<vmem>>, %arg5: memref<32x128xbf16, #tpu.memory_space<vmem>>, %arg6: memref<1x128xf32, #tpu.memory_space<vmem>>, %arg7: memref<32x32xbf16, #tpu.memory_space<vmem>>, %arg8: memref<1x32xf32, #tpu.memory_space<vmem>>, %arg9: memref<32x32xbf16, #tpu.memory_space<vmem>>, %arg10: memref<1x32xf32, #tpu.memory_space<vmem>>, %arg11: memref<32x32xbf16, #tpu.memory_space<vmem>>, %arg12: memref<1x32xf32, #tpu.memory_space<vmem>>, %arg13: memref<32x32xbf16, #tpu.memory_space<vmem>>, %arg14: memref<1x32xf32, #tpu.memory_space<vmem>>, %arg15: memref<32x16xbf16, #tpu.memory_space<vmem>>, %arg16: memref<1x16xf32, #tpu.memory_space<vmem>>, %arg17: memref<16x128xbf16, #tpu.memory_space<vmem>>, %arg18: memref<1x128xf32, #tpu.memory_space<vmem>>, %arg19: memref<128x128xbf16, #tpu.memory_space<vmem>>, %arg20: memref<1x128xf32, #tpu.memory_space<vmem>>, %arg21: memref<2x128xf32, #tpu.memory_space<vmem>>) attributes {dimension_semantics = [], scalar_prefetch = 0 : i64, scratch_operands = 0 : i64, tpu.core_type = #tpu.core_type<tc>} {
    %c0 = arith.constant 0 : index
    %c0_0 = arith.constant 0 : index
    %0 = vector.load %arg1[%c0, %c0_0] : memref<16x128xbf16, #tpu.memory_space<vmem>>, vector<16x128xbf16>
    %c0_1 = arith.constant 0 : index
    %c0_2 = arith.constant 0 : index
    %1 = vector.load %arg2[%c0_1, %c0_2] : memref<32x128xbf16, #tpu.memory_space<vmem>>, vector<32x128xbf16>
    %c0_3 = arith.constant 0 : index
    %c0_4 = arith.constant 0 : index
    %2 = vector.load %arg3[%c0_3, %c0_4] : memref<1x128xf32, #tpu.memory_space<vmem>>, vector<1x128xf32>
    %c0_5 = arith.constant 0 : index
    %c0_6 = arith.constant 0 : index
    %3 = vector.load %arg4[%c0_5, %c0_6] : memref<32x128xbf16, #tpu.memory_space<vmem>>, vector<32x128xbf16>
    %c0_7 = arith.constant 0 : index
    %c0_8 = arith.constant 0 : index
    %4 = vector.load %arg5[%c0_7, %c0_8] : memref<32x128xbf16, #tpu.memory_space<vmem>>, vector<32x128xbf16>
    %c0_9 = arith.constant 0 : index
    %c0_10 = arith.constant 0 : index
    %5 = vector.load %arg6[%c0_9, %c0_10] : memref<1x128xf32, #tpu.memory_space<vmem>>, vector<1x128xf32>
    %c0_11 = arith.constant 0 : index
    %c0_12 = arith.constant 0 : index
    %6 = vector.load %arg7[%c0_11, %c0_12] : memref<32x32xbf16, #tpu.memory_space<vmem>>, vector<32x32xbf16>
    %c0_13 = arith.constant 0 : index
    %c0_14 = arith.constant 0 : index
    %7 = vector.load %arg8[%c0_13, %c0_14] : memref<1x32xf32, #tpu.memory_space<vmem>>, vector<1x32xf32>
    %c0_15 = arith.constant 0 : index
    %c0_16 = arith.constant 0 : index
    %8 = vector.load %arg9[%c0_15, %c0_16] : memref<32x32xbf16, #tpu.memory_space<vmem>>, vector<32x32xbf16>
    %c0_17 = arith.constant 0 : index
    %c0_18 = arith.constant 0 : index
    %9 = vector.load %arg10[%c0_17, %c0_18] : memref<1x32xf32, #tpu.memory_space<vmem>>, vector<1x32xf32>
    %c0_19 = arith.constant 0 : index
    %c0_20 = arith.constant 0 : index
    %10 = vector.load %arg11[%c0_19, %c0_20] : memref<32x32xbf16, #tpu.memory_space<vmem>>, vector<32x32xbf16>
    %c0_21 = arith.constant 0 : index
    %c0_22 = arith.constant 0 : index
    %11 = vector.load %arg12[%c0_21, %c0_22] : memref<1x32xf32, #tpu.memory_space<vmem>>, vector<1x32xf32>
    %c0_23 = arith.constant 0 : index
    %c0_24 = arith.constant 0 : index
    %12 = vector.load %arg13[%c0_23, %c0_24] : memref<32x32xbf16, #tpu.memory_space<vmem>>, vector<32x32xbf16>
    %c0_25 = arith.constant 0 : index
    %c0_26 = arith.constant 0 : index
    %13 = vector.load %arg14[%c0_25, %c0_26] : memref<1x32xf32, #tpu.memory_space<vmem>>, vector<1x32xf32>
    %c0_27 = arith.constant 0 : index
    %c0_28 = arith.constant 0 : index
    %14 = vector.load %arg15[%c0_27, %c0_28] : memref<32x16xbf16, #tpu.memory_space<vmem>>, vector<32x16xbf16>
    %c0_29 = arith.constant 0 : index
    %c0_30 = arith.constant 0 : index
    %15 = vector.load %arg16[%c0_29, %c0_30] : memref<1x16xf32, #tpu.memory_space<vmem>>, vector<1x16xf32>
    %c0_31 = arith.constant 0 : index
    %c0_32 = arith.constant 0 : index
    %16 = vector.load %arg17[%c0_31, %c0_32] : memref<16x128xbf16, #tpu.memory_space<vmem>>, vector<16x128xbf16>
    %c0_33 = arith.constant 0 : index
    %c0_34 = arith.constant 0 : index
    %17 = vector.load %arg18[%c0_33, %c0_34] : memref<1x128xf32, #tpu.memory_space<vmem>>, vector<1x128xf32>
    %c0_35 = arith.constant 0 : index
    %c0_36 = arith.constant 0 : index
    %18 = vector.load %arg19[%c0_35, %c0_36] : memref<128x128xbf16, #tpu.memory_space<vmem>>, vector<128x128xbf16>
    %c0_37 = arith.constant 0 : index
    %c0_38 = arith.constant 0 : index
    %19 = vector.load %arg20[%c0_37, %c0_38] : memref<1x128xf32, #tpu.memory_space<vmem>>, vector<1x128xf32>
    %c0_39 = arith.constant 0 : index
    %c0_40 = arith.constant 0 : index
    %20 = vector.load %arg0[%c0_39, %c0_40] : memref<16x16xf32, #tpu.memory_space<vmem>>, vector<16x16xf32>
    %21 = arith.truncf %20 : vector<16x16xf32> to vector<16x16xbf16>
    %cst = arith.constant dense<0.000000e+00> : vector<16x128xf32>
    %22 = tpu.matmul %21, %0, %cst {dimension_numbers = #tpu.dot_dimension_numbers<[1], [0], [0], [1], [0, 0, 1, 1], [], []>} : vector<16x16xbf16>, vector<16x128xbf16>, vector<16x128xf32> -> vector<16x128xf32>
    %23 = vector.broadcast %2 : vector<1x128xf32> to vector<16x128xf32>
    %24 = arith.addf %22, %23 : vector<16x128xf32>
    %cst_41 = arith.constant 0.000000e+00 : f32
    %25 = vector.broadcast %cst_41 : f32 to vector<2x32xf32>
    %cst_42 = arith.constant 0.000000e+00 : f32
    %26 = vector.broadcast %cst_42 : f32 to vector<2x32xf32>
    %27 = vector.extract_strided_slice %24 {offsets = [0, 0], sizes = [2, 128], strides = [1, 1]} : vector<16x128xf32> to vector<2x128xf32>
    %28 = arith.truncf %25 : vector<2x32xf32> to vector<2x32xbf16>
    %cst_43 = arith.constant dense<0.000000e+00> : vector<2x128xf32>
    %29 = tpu.matmul %28, %1, %cst_43 {dimension_numbers = #tpu.dot_dimension_numbers<[1], [0], [0], [1], [0, 0, 1, 1], [], []>} : vector<2x32xbf16>, vector<32x128xbf16>, vector<2x128xf32> -> vector<2x128xf32>
    %30 = arith.addf %27, %29 : vector<2x128xf32>
    %31 = vector.extract_strided_slice %30 {offsets = [0, 0], sizes = [2, 32], strides = [1, 1]} : vector<2x128xf32> to vector<2x32xf32>
    %32 = arith.negf %31 : vector<2x32xf32>
    %33 = math.exp %32 : vector<2x32xf32>
    %cst_44 = arith.constant 1.000000e+00 : f32
    %34 = vector.broadcast %cst_44 : f32 to vector<2x32xf32>
    %35 = arith.addf %34, %33 : vector<2x32xf32>
    %36 = arith.divf %34, %35 : vector<2x32xf32>
    %37 = vector.extract_strided_slice %30 {offsets = [0, 32], sizes = [2, 32], strides = [1, 1]} : vector<2x128xf32> to vector<2x32xf32>
    %38 = arith.negf %37 : vector<2x32xf32>
    %39 = math.exp %38 : vector<2x32xf32>
    %cst_45 = arith.constant 1.000000e+00 : f32
    %40 = vector.broadcast %cst_45 : f32 to vector<2x32xf32>
    %41 = arith.addf %40, %39 : vector<2x32xf32>
    %42 = arith.divf %40, %41 : vector<2x32xf32>
    %43 = vector.extract_strided_slice %30 {offsets = [0, 64], sizes = [2, 32], strides = [1, 1]} : vector<2x128xf32> to vector<2x32xf32>
    %44 = math.tanh %43 : vector<2x32xf32>
    %45 = vector.extract_strided_slice %30 {offsets = [0, 96], sizes = [2, 32], strides = [1, 1]} : vector<2x128xf32> to vector<2x32xf32>
    %46 = arith.negf %45 : vector<2x32xf32>
    %47 = math.exp %46 : vector<2x32xf32>
    %cst_46 = arith.constant 1.000000e+00 : f32
    %48 = vector.broadcast %cst_46 : f32 to vector<2x32xf32>
    %49 = arith.addf %48, %47 : vector<2x32xf32>
    %50 = arith.divf %48, %49 : vector<2x32xf32>
    %51 = arith.mulf %42, %26 : vector<2x32xf32>
    %52 = arith.mulf %36, %44 : vector<2x32xf32>
    %53 = arith.addf %51, %52 : vector<2x32xf32>
    %54 = math.tanh %53 : vector<2x32xf32>
    %55 = arith.mulf %50, %54 : vector<2x32xf32>
    %56 = vector.extract_strided_slice %24 {offsets = [2, 0], sizes = [2, 128], strides = [1, 1]} : vector<16x128xf32> to vector<2x128xf32>
    %57 = arith.truncf %55 : vector<2x32xf32> to vector<2x32xbf16>
    %cst_47 = arith.constant dense<0.000000e+00> : vector<2x128xf32>
    %58 = tpu.matmul %57, %1, %cst_47 {dimension_numbers = #tpu.dot_dimension_numbers<[1], [0], [0], [1], [0, 0, 1, 1], [], []>} : vector<2x32xbf16>, vector<32x128xbf16>, vector<2x128xf32> -> vector<2x128xf32>
    %59 = arith.addf %56, %58 : vector<2x128xf32>
    %60 = vector.extract_strided_slice %59 {offsets = [0, 0], sizes = [2, 32], strides = [1, 1]} : vector<2x128xf32> to vector<2x32xf32>
    %61 = arith.negf %60 : vector<2x32xf32>
    %62 = math.exp %61 : vector<2x32xf32>
    %cst_48 = arith.constant 1.000000e+00 : f32
    %63 = vector.broadcast %cst_48 : f32 to vector<2x32xf32>
    %64 = arith.addf %63, %62 : vector<2x32xf32>
    %65 = arith.divf %63, %64 : vector<2x32xf32>
    %66 = vector.extract_strided_slice %59 {offsets = [0, 32], sizes = [2, 32], strides = [1, 1]} : vector<2x128xf32> to vector<2x32xf32>
    %67 = arith.negf %66 : vector<2x32xf32>
    %68 = math.exp %67 : vector<2x32xf32>
    %cst_49 = arith.constant 1.000000e+00 : f32
    %69 = vector.broadcast %cst_49 : f32 to vector<2x32xf32>
    %70 = arith.addf %69, %68 : vector<2x32xf32>
    %71 = arith.divf %69, %70 : vector<2x32xf32>
    %72 = vector.extract_strided_slice %59 {offsets = [0, 64], sizes = [2, 32], strides = [1, 1]} : vector<2x128xf32> to vector<2x32xf32>
    %73 = math.tanh %72 : vector<2x32xf32>
    %74 = vector.extract_strided_slice %59 {offsets = [0, 96], sizes = [2, 32], strides = [1, 1]} : vector<2x128xf32> to vector<2x32xf32>
    %75 = arith.negf %74 : vector<2x32xf32>
    %76 = math.exp %75 : vector<2x32xf32>
    %cst_50 = arith.constant 1.000000e+00 : f32
    %77 = vector.broadcast %cst_50 : f32 to vector<2x32xf32>
    %78 = arith.addf %77, %76 : vector<2x32xf32>
    %79 = arith.divf %77, %78 : vector<2x32xf32>
    %80 = arith.mulf %71, %53 : vector<2x32xf32>
    %81 = arith.mulf %65, %73 : vector<2x32xf32>
    %82 = arith.addf %80, %81 : vector<2x32xf32>
    %83 = math.tanh %82 : vector<2x32xf32>
    %84 = arith.mulf %79, %83 : vector<2x32xf32>
    %85 = vector.extract_strided_slice %24 {offsets = [4, 0], sizes = [2, 128], strides = [1, 1]} : vector<16x128xf32> to vector<2x128xf32>
    %86 = arith.truncf %84 : vector<2x32xf32> to vector<2x32xbf16>
    %cst_51 = arith.constant dense<0.000000e+00> : vector<2x128xf32>
    %87 = tpu.matmul %86, %1, %cst_51 {dimension_numbers = #tpu.dot_dimension_numbers<[1], [0], [0], [1], [0, 0, 1, 1], [], []>} : vector<2x32xbf16>, vector<32x128xbf16>, vector<2x128xf32> -> vector<2x128xf32>
    %88 = arith.addf %85, %87 : vector<2x128xf32>
    %89 = vector.extract_strided_slice %88 {offsets = [0, 0], sizes = [2, 32], strides = [1, 1]} : vector<2x128xf32> to vector<2x32xf32>
    %90 = arith.negf %89 : vector<2x32xf32>
    %91 = math.exp %90 : vector<2x32xf32>
    %cst_52 = arith.constant 1.000000e+00 : f32
    %92 = vector.broadcast %cst_52 : f32 to vector<2x32xf32>
    %93 = arith.addf %92, %91 : vector<2x32xf32>
    %94 = arith.divf %92, %93 : vector<2x32xf32>
    %95 = vector.extract_strided_slice %88 {offsets = [0, 32], sizes = [2, 32], strides = [1, 1]} : vector<2x128xf32> to vector<2x32xf32>
    %96 = arith.negf %95 : vector<2x32xf32>
    %97 = math.exp %96 : vector<2x32xf32>
    %cst_53 = arith.constant 1.000000e+00 : f32
    %98 = vector.broadcast %cst_53 : f32 to vector<2x32xf32>
    %99 = arith.addf %98, %97 : vector<2x32xf32>
    %100 = arith.divf %98, %99 : vector<2x32xf32>
    %101 = vector.extract_strided_slice %88 {offsets = [0, 64], sizes = [2, 32], strides = [1, 1]} : vector<2x128xf32> to vector<2x32xf32>
    %102 = math.tanh %101 : vector<2x32xf32>
    %103 = vector.extract_strided_slice %88 {offsets = [0, 96], sizes = [2, 32], strides = [1, 1]} : vector<2x128xf32> to vector<2x32xf32>
    %104 = arith.negf %103 : vector<2x32xf32>
    %105 = math.exp %104 : vector<2x32xf32>
    %cst_54 = arith.constant 1.000000e+00 : f32
    %106 = vector.broadcast %cst_54 : f32 to vector<2x32xf32>
    %107 = arith.addf %106, %105 : vector<2x32xf32>
    %108 = arith.divf %106, %107 : vector<2x32xf32>
    %109 = arith.mulf %100, %82 : vector<2x32xf32>
    %110 = arith.mulf %94, %102 : vector<2x32xf32>
    %111 = arith.addf %109, %110 : vector<2x32xf32>
    %112 = math.tanh %111 : vector<2x32xf32>
    %113 = arith.mulf %108, %112 : vector<2x32xf32>
    %114 = vector.extract_strided_slice %24 {offsets = [6, 0], sizes = [2, 128], strides = [1, 1]} : vector<16x128xf32> to vector<2x128xf32>
    %115 = arith.truncf %113 : vector<2x32xf32> to vector<2x32xbf16>
    %cst_55 = arith.constant dense<0.000000e+00> : vector<2x128xf32>
    %116 = tpu.matmul %115, %1, %cst_55 {dimension_numbers = #tpu.dot_dimension_numbers<[1], [0], [0], [1], [0, 0, 1, 1], [], []>} : vector<2x32xbf16>, vector<32x128xbf16>, vector<2x128xf32> -> vector<2x128xf32>
    %117 = arith.addf %114, %116 : vector<2x128xf32>
    %118 = vector.extract_strided_slice %117 {offsets = [0, 0], sizes = [2, 32], strides = [1, 1]} : vector<2x128xf32> to vector<2x32xf32>
    %119 = arith.negf %118 : vector<2x32xf32>
    %120 = math.exp %119 : vector<2x32xf32>
    %cst_56 = arith.constant 1.000000e+00 : f32
    %121 = vector.broadcast %cst_56 : f32 to vector<2x32xf32>
    %122 = arith.addf %121, %120 : vector<2x32xf32>
    %123 = arith.divf %121, %122 : vector<2x32xf32>
    %124 = vector.extract_strided_slice %117 {offsets = [0, 32], sizes = [2, 32], strides = [1, 1]} : vector<2x128xf32> to vector<2x32xf32>
    %125 = arith.negf %124 : vector<2x32xf32>
    %126 = math.exp %125 : vector<2x32xf32>
    %cst_57 = arith.constant 1.000000e+00 : f32
    %127 = vector.broadcast %cst_57 : f32 to vector<2x32xf32>
    %128 = arith.addf %127, %126 : vector<2x32xf32>
    %129 = arith.divf %127, %128 : vector<2x32xf32>
    %130 = vector.extract_strided_slice %117 {offsets = [0, 64], sizes = [2, 32], strides = [1, 1]} : vector<2x128xf32> to vector<2x32xf32>
    %131 = math.tanh %130 : vector<2x32xf32>
    %132 = vector.extract_strided_slice %117 {offsets = [0, 96], sizes = [2, 32], strides = [1, 1]} : vector<2x128xf32> to vector<2x32xf32>
    %133 = arith.negf %132 : vector<2x32xf32>
    %134 = math.exp %133 : vector<2x32xf32>
    %cst_58 = arith.constant 1.000000e+00 : f32
    %135 = vector.broadcast %cst_58 : f32 to vector<2x32xf32>
    %136 = arith.addf %135, %134 : vector<2x32xf32>
    %137 = arith.divf %135, %136 : vector<2x32xf32>
    %138 = arith.mulf %129, %111 : vector<2x32xf32>
    %139 = arith.mulf %123, %131 : vector<2x32xf32>
    %140 = arith.addf %138, %139 : vector<2x32xf32>
    %141 = math.tanh %140 : vector<2x32xf32>
    %142 = arith.mulf %137, %141 : vector<2x32xf32>
    %143 = vector.extract_strided_slice %24 {offsets = [8, 0], sizes = [2, 128], strides = [1, 1]} : vector<16x128xf32> to vector<2x128xf32>
    %144 = arith.truncf %142 : vector<2x32xf32> to vector<2x32xbf16>
    %cst_59 = arith.constant dense<0.000000e+00> : vector<2x128xf32>
    %145 = tpu.matmul %144, %1, %cst_59 {dimension_numbers = #tpu.dot_dimension_numbers<[1], [0], [0], [1], [0, 0, 1, 1], [], []>} : vector<2x32xbf16>, vector<32x128xbf16>, vector<2x128xf32> -> vector<2x128xf32>
    %146 = arith.addf %143, %145 : vector<2x128xf32>
    %147 = vector.extract_strided_slice %146 {offsets = [0, 0], sizes = [2, 32], strides = [1, 1]} : vector<2x128xf32> to vector<2x32xf32>
    %148 = arith.negf %147 : vector<2x32xf32>
    %149 = math.exp %148 : vector<2x32xf32>
    %cst_60 = arith.constant 1.000000e+00 : f32
    %150 = vector.broadcast %cst_60 : f32 to vector<2x32xf32>
    %151 = arith.addf %150, %149 : vector<2x32xf32>
    %152 = arith.divf %150, %151 : vector<2x32xf32>
    %153 = vector.extract_strided_slice %146 {offsets = [0, 32], sizes = [2, 32], strides = [1, 1]} : vector<2x128xf32> to vector<2x32xf32>
    %154 = arith.negf %153 : vector<2x32xf32>
    %155 = math.exp %154 : vector<2x32xf32>
    %cst_61 = arith.constant 1.000000e+00 : f32
    %156 = vector.broadcast %cst_61 : f32 to vector<2x32xf32>
    %157 = arith.addf %156, %155 : vector<2x32xf32>
    %158 = arith.divf %156, %157 : vector<2x32xf32>
    %159 = vector.extract_strided_slice %146 {offsets = [0, 64], sizes = [2, 32], strides = [1, 1]} : vector<2x128xf32> to vector<2x32xf32>
    %160 = math.tanh %159 : vector<2x32xf32>
    %161 = vector.extract_strided_slice %146 {offsets = [0, 96], sizes = [2, 32], strides = [1, 1]} : vector<2x128xf32> to vector<2x32xf32>
    %162 = arith.negf %161 : vector<2x32xf32>
    %163 = math.exp %162 : vector<2x32xf32>
    %cst_62 = arith.constant 1.000000e+00 : f32
    %164 = vector.broadcast %cst_62 : f32 to vector<2x32xf32>
    %165 = arith.addf %164, %163 : vector<2x32xf32>
    %166 = arith.divf %164, %165 : vector<2x32xf32>
    %167 = arith.mulf %158, %140 : vector<2x32xf32>
    %168 = arith.mulf %152, %160 : vector<2x32xf32>
    %169 = arith.addf %167, %168 : vector<2x32xf32>
    %170 = math.tanh %169 : vector<2x32xf32>
    %171 = arith.mulf %166, %170 : vector<2x32xf32>
    %172 = vector.extract_strided_slice %24 {offsets = [10, 0], sizes = [2, 128], strides = [1, 1]} : vector<16x128xf32> to vector<2x128xf32>
    %173 = arith.truncf %171 : vector<2x32xf32> to vector<2x32xbf16>
    %cst_63 = arith.constant dense<0.000000e+00> : vector<2x128xf32>
    %174 = tpu.matmul %173, %1, %cst_63 {dimension_numbers = #tpu.dot_dimension_numbers<[1], [0], [0], [1], [0, 0, 1, 1], [], []>} : vector<2x32xbf16>, vector<32x128xbf16>, vector<2x128xf32> -> vector<2x128xf32>
    %175 = arith.addf %172, %174 : vector<2x128xf32>
    %176 = vector.extract_strided_slice %175 {offsets = [0, 0], sizes = [2, 32], strides = [1, 1]} : vector<2x128xf32> to vector<2x32xf32>
    %177 = arith.negf %176 : vector<2x32xf32>
    %178 = math.exp %177 : vector<2x32xf32>
    %cst_64 = arith.constant 1.000000e+00 : f32
    %179 = vector.broadcast %cst_64 : f32 to vector<2x32xf32>
    %180 = arith.addf %179, %178 : vector<2x32xf32>
    %181 = arith.divf %179, %180 : vector<2x32xf32>
    %182 = vector.extract_strided_slice %175 {offsets = [0, 32], sizes = [2, 32], strides = [1, 1]} : vector<2x128xf32> to vector<2x32xf32>
    %183 = arith.negf %182 : vector<2x32xf32>
    %184 = math.exp %183 : vector<2x32xf32>
    %cst_65 = arith.constant 1.000000e+00 : f32
    %185 = vector.broadcast %cst_65 : f32 to vector<2x32xf32>
    %186 = arith.addf %185, %184 : vector<2x32xf32>
    %187 = arith.divf %185, %186 : vector<2x32xf32>
    %188 = vector.extract_strided_slice %175 {offsets = [0, 64], sizes = [2, 32], strides = [1, 1]} : vector<2x128xf32> to vector<2x32xf32>
    %189 = math.tanh %188 : vector<2x32xf32>
    %190 = vector.extract_strided_slice %175 {offsets = [0, 96], sizes = [2, 32], strides = [1, 1]} : vector<2x128xf32> to vector<2x32xf32>
    %191 = arith.negf %190 : vector<2x32xf32>
    %192 = math.exp %191 : vector<2x32xf32>
    %cst_66 = arith.constant 1.000000e+00 : f32
    %193 = vector.broadcast %cst_66 : f32 to vector<2x32xf32>
    %194 = arith.addf %193, %192 : vector<2x32xf32>
    %195 = arith.divf %193, %194 : vector<2x32xf32>
    %196 = arith.mulf %187, %169 : vector<2x32xf32>
    %197 = arith.mulf %181, %189 : vector<2x32xf32>
    %198 = arith.addf %196, %197 : vector<2x32xf32>
    %199 = math.tanh %198 : vector<2x32xf32>
    %200 = arith.mulf %195, %199 : vector<2x32xf32>
    %201 = vector.extract_strided_slice %24 {offsets = [12, 0], sizes = [2, 128], strides = [1, 1]} : vector<16x128xf32> to vector<2x128xf32>
    %202 = arith.truncf %200 : vector<2x32xf32> to vector<2x32xbf16>
    %cst_67 = arith.constant dense<0.000000e+00> : vector<2x128xf32>
    %203 = tpu.matmul %202, %1, %cst_67 {dimension_numbers = #tpu.dot_dimension_numbers<[1], [0], [0], [1], [0, 0, 1, 1], [], []>} : vector<2x32xbf16>, vector<32x128xbf16>, vector<2x128xf32> -> vector<2x128xf32>
    %204 = arith.addf %201, %203 : vector<2x128xf32>
    %205 = vector.extract_strided_slice %204 {offsets = [0, 0], sizes = [2, 32], strides = [1, 1]} : vector<2x128xf32> to vector<2x32xf32>
    %206 = arith.negf %205 : vector<2x32xf32>
    %207 = math.exp %206 : vector<2x32xf32>
    %cst_68 = arith.constant 1.000000e+00 : f32
    %208 = vector.broadcast %cst_68 : f32 to vector<2x32xf32>
    %209 = arith.addf %208, %207 : vector<2x32xf32>
    %210 = arith.divf %208, %209 : vector<2x32xf32>
    %211 = vector.extract_strided_slice %204 {offsets = [0, 32], sizes = [2, 32], strides = [1, 1]} : vector<2x128xf32> to vector<2x32xf32>
    %212 = arith.negf %211 : vector<2x32xf32>
    %213 = math.exp %212 : vector<2x32xf32>
    %cst_69 = arith.constant 1.000000e+00 : f32
    %214 = vector.broadcast %cst_69 : f32 to vector<2x32xf32>
    %215 = arith.addf %214, %213 : vector<2x32xf32>
    %216 = arith.divf %214, %215 : vector<2x32xf32>
    %217 = vector.extract_strided_slice %204 {offsets = [0, 64], sizes = [2, 32], strides = [1, 1]} : vector<2x128xf32> to vector<2x32xf32>
    %218 = math.tanh %217 : vector<2x32xf32>
    %219 = vector.extract_strided_slice %204 {offsets = [0, 96], sizes = [2, 32], strides = [1, 1]} : vector<2x128xf32> to vector<2x32xf32>
    %220 = arith.negf %219 : vector<2x32xf32>
    %221 = math.exp %220 : vector<2x32xf32>
    %cst_70 = arith.constant 1.000000e+00 : f32
    %222 = vector.broadcast %cst_70 : f32 to vector<2x32xf32>
    %223 = arith.addf %222, %221 : vector<2x32xf32>
    %224 = arith.divf %222, %223 : vector<2x32xf32>
    %225 = arith.mulf %216, %198 : vector<2x32xf32>
    %226 = arith.mulf %210, %218 : vector<2x32xf32>
    %227 = arith.addf %225, %226 : vector<2x32xf32>
    %228 = math.tanh %227 : vector<2x32xf32>
    %229 = arith.mulf %224, %228 : vector<2x32xf32>
    %230 = vector.extract_strided_slice %24 {offsets = [14, 0], sizes = [2, 128], strides = [1, 1]} : vector<16x128xf32> to vector<2x128xf32>
    %231 = arith.truncf %229 : vector<2x32xf32> to vector<2x32xbf16>
    %cst_71 = arith.constant dense<0.000000e+00> : vector<2x128xf32>
    %232 = tpu.matmul %231, %1, %cst_71 {dimension_numbers = #tpu.dot_dimension_numbers<[1], [0], [0], [1], [0, 0, 1, 1], [], []>} : vector<2x32xbf16>, vector<32x128xbf16>, vector<2x128xf32> -> vector<2x128xf32>
    %233 = arith.addf %230, %232 : vector<2x128xf32>
    %234 = vector.extract_strided_slice %233 {offsets = [0, 0], sizes = [2, 32], strides = [1, 1]} : vector<2x128xf32> to vector<2x32xf32>
    %235 = arith.negf %234 : vector<2x32xf32>
    %236 = math.exp %235 : vector<2x32xf32>
    %cst_72 = arith.constant 1.000000e+00 : f32
    %237 = vector.broadcast %cst_72 : f32 to vector<2x32xf32>
    %238 = arith.addf %237, %236 : vector<2x32xf32>
    %239 = arith.divf %237, %238 : vector<2x32xf32>
    %240 = vector.extract_strided_slice %233 {offsets = [0, 32], sizes = [2, 32], strides = [1, 1]} : vector<2x128xf32> to vector<2x32xf32>
    %241 = arith.negf %240 : vector<2x32xf32>
    %242 = math.exp %241 : vector<2x32xf32>
    %cst_73 = arith.constant 1.000000e+00 : f32
    %243 = vector.broadcast %cst_73 : f32 to vector<2x32xf32>
    %244 = arith.addf %243, %242 : vector<2x32xf32>
    %245 = arith.divf %243, %244 : vector<2x32xf32>
    %246 = vector.extract_strided_slice %233 {offsets = [0, 64], sizes = [2, 32], strides = [1, 1]} : vector<2x128xf32> to vector<2x32xf32>
    %247 = math.tanh %246 : vector<2x32xf32>
    %248 = vector.extract_strided_slice %233 {offsets = [0, 96], sizes = [2, 32], strides = [1, 1]} : vector<2x128xf32> to vector<2x32xf32>
    %249 = arith.negf %248 : vector<2x32xf32>
    %250 = math.exp %249 : vector<2x32xf32>
    %cst_74 = arith.constant 1.000000e+00 : f32
    %251 = vector.broadcast %cst_74 : f32 to vector<2x32xf32>
    %252 = arith.addf %251, %250 : vector<2x32xf32>
    %253 = arith.divf %251, %252 : vector<2x32xf32>
    %254 = arith.mulf %245, %227 : vector<2x32xf32>
    %255 = arith.mulf %239, %247 : vector<2x32xf32>
    %256 = arith.addf %254, %255 : vector<2x32xf32>
    %257 = math.tanh %256 : vector<2x32xf32>
    %258 = arith.mulf %253, %257 : vector<2x32xf32>
    %259 = tpu.concatenate %55, %84, %113, %142, %171, %200, %229, %258 in 0 : vector<2x32xf32>, vector<2x32xf32>, vector<2x32xf32>, vector<2x32xf32>, vector<2x32xf32>, vector<2x32xf32>, vector<2x32xf32>, vector<2x32xf32> -> vector<16x32xf32>
    %260 = arith.truncf %259 : vector<16x32xf32> to vector<16x32xbf16>
    %cst_75 = arith.constant dense<0.000000e+00> : vector<16x128xf32>
    %261 = tpu.matmul %260, %3, %cst_75 {dimension_numbers = #tpu.dot_dimension_numbers<[1], [0], [0], [1], [0, 0, 1, 1], [], []>} : vector<16x32xbf16>, vector<32x128xbf16>, vector<16x128xf32> -> vector<16x128xf32>
    %262 = vector.broadcast %5 : vector<1x128xf32> to vector<16x128xf32>
    %263 = arith.addf %261, %262 : vector<16x128xf32>
    %cst_76 = arith.constant 0.000000e+00 : f32
    %264 = vector.broadcast %cst_76 : f32 to vector<2x32xf32>
    %cst_77 = arith.constant 0.000000e+00 : f32
    %265 = vector.broadcast %cst_77 : f32 to vector<2x32xf32>
    %266 = vector.extract_strided_slice %263 {offsets = [0, 0], sizes = [2, 128], strides = [1, 1]} : vector<16x128xf32> to vector<2x128xf32>
    %267 = arith.truncf %264 : vector<2x32xf32> to vector<2x32xbf16>
    %cst_78 = arith.constant dense<0.000000e+00> : vector<2x128xf32>
    %268 = tpu.matmul %267, %4, %cst_78 {dimension_numbers = #tpu.dot_dimension_numbers<[1], [0], [0], [1], [0, 0, 1, 1], [], []>} : vector<2x32xbf16>, vector<32x128xbf16>, vector<2x128xf32> -> vector<2x128xf32>
    %269 = arith.addf %266, %268 : vector<2x128xf32>
    %270 = vector.extract_strided_slice %269 {offsets = [0, 0], sizes = [2, 32], strides = [1, 1]} : vector<2x128xf32> to vector<2x32xf32>
    %271 = arith.negf %270 : vector<2x32xf32>
    %272 = math.exp %271 : vector<2x32xf32>
    %cst_79 = arith.constant 1.000000e+00 : f32
    %273 = vector.broadcast %cst_79 : f32 to vector<2x32xf32>
    %274 = arith.addf %273, %272 : vector<2x32xf32>
    %275 = arith.divf %273, %274 : vector<2x32xf32>
    %276 = vector.extract_strided_slice %269 {offsets = [0, 32], sizes = [2, 32], strides = [1, 1]} : vector<2x128xf32> to vector<2x32xf32>
    %277 = arith.negf %276 : vector<2x32xf32>
    %278 = math.exp %277 : vector<2x32xf32>
    %cst_80 = arith.constant 1.000000e+00 : f32
    %279 = vector.broadcast %cst_80 : f32 to vector<2x32xf32>
    %280 = arith.addf %279, %278 : vector<2x32xf32>
    %281 = arith.divf %279, %280 : vector<2x32xf32>
    %282 = vector.extract_strided_slice %269 {offsets = [0, 64], sizes = [2, 32], strides = [1, 1]} : vector<2x128xf32> to vector<2x32xf32>
    %283 = math.tanh %282 : vector<2x32xf32>
    %284 = vector.extract_strided_slice %269 {offsets = [0, 96], sizes = [2, 32], strides = [1, 1]} : vector<2x128xf32> to vector<2x32xf32>
    %285 = arith.negf %284 : vector<2x32xf32>
    %286 = math.exp %285 : vector<2x32xf32>
    %cst_81 = arith.constant 1.000000e+00 : f32
    %287 = vector.broadcast %cst_81 : f32 to vector<2x32xf32>
    %288 = arith.addf %287, %286 : vector<2x32xf32>
    %289 = arith.divf %287, %288 : vector<2x32xf32>
    %290 = arith.mulf %281, %265 : vector<2x32xf32>
    %291 = arith.mulf %275, %283 : vector<2x32xf32>
    %292 = arith.addf %290, %291 : vector<2x32xf32>
    %293 = math.tanh %292 : vector<2x32xf32>
    %294 = arith.mulf %289, %293 : vector<2x32xf32>
    %295 = vector.extract_strided_slice %263 {offsets = [2, 0], sizes = [2, 128], strides = [1, 1]} : vector<16x128xf32> to vector<2x128xf32>
    %296 = arith.truncf %294 : vector<2x32xf32> to vector<2x32xbf16>
    %cst_82 = arith.constant dense<0.000000e+00> : vector<2x128xf32>
    %297 = tpu.matmul %296, %4, %cst_82 {dimension_numbers = #tpu.dot_dimension_numbers<[1], [0], [0], [1], [0, 0, 1, 1], [], []>} : vector<2x32xbf16>, vector<32x128xbf16>, vector<2x128xf32> -> vector<2x128xf32>
    %298 = arith.addf %295, %297 : vector<2x128xf32>
    %299 = vector.extract_strided_slice %298 {offsets = [0, 0], sizes = [2, 32], strides = [1, 1]} : vector<2x128xf32> to vector<2x32xf32>
    %300 = arith.negf %299 : vector<2x32xf32>
    %301 = math.exp %300 : vector<2x32xf32>
    %cst_83 = arith.constant 1.000000e+00 : f32
    %302 = vector.broadcast %cst_83 : f32 to vector<2x32xf32>
    %303 = arith.addf %302, %301 : vector<2x32xf32>
    %304 = arith.divf %302, %303 : vector<2x32xf32>
    %305 = vector.extract_strided_slice %298 {offsets = [0, 32], sizes = [2, 32], strides = [1, 1]} : vector<2x128xf32> to vector<2x32xf32>
    %306 = arith.negf %305 : vector<2x32xf32>
    %307 = math.exp %306 : vector<2x32xf32>
    %cst_84 = arith.constant 1.000000e+00 : f32
    %308 = vector.broadcast %cst_84 : f32 to vector<2x32xf32>
    %309 = arith.addf %308, %307 : vector<2x32xf32>
    %310 = arith.divf %308, %309 : vector<2x32xf32>
    %311 = vector.extract_strided_slice %298 {offsets = [0, 64], sizes = [2, 32], strides = [1, 1]} : vector<2x128xf32> to vector<2x32xf32>
    %312 = math.tanh %311 : vector<2x32xf32>
    %313 = vector.extract_strided_slice %298 {offsets = [0, 96], sizes = [2, 32], strides = [1, 1]} : vector<2x128xf32> to vector<2x32xf32>
    %314 = arith.negf %313 : vector<2x32xf32>
    %315 = math.exp %314 : vector<2x32xf32>
    %cst_85 = arith.constant 1.000000e+00 : f32
    %316 = vector.broadcast %cst_85 : f32 to vector<2x32xf32>
    %317 = arith.addf %316, %315 : vector<2x32xf32>
    %318 = arith.divf %316, %317 : vector<2x32xf32>
    %319 = arith.mulf %310, %292 : vector<2x32xf32>
    %320 = arith.mulf %304, %312 : vector<2x32xf32>
    %321 = arith.addf %319, %320 : vector<2x32xf32>
    %322 = math.tanh %321 : vector<2x32xf32>
    %323 = arith.mulf %318, %322 : vector<2x32xf32>
    %324 = vector.extract_strided_slice %263 {offsets = [4, 0], sizes = [2, 128], strides = [1, 1]} : vector<16x128xf32> to vector<2x128xf32>
    %325 = arith.truncf %323 : vector<2x32xf32> to vector<2x32xbf16>
    %cst_86 = arith.constant dense<0.000000e+00> : vector<2x128xf32>
    %326 = tpu.matmul %325, %4, %cst_86 {dimension_numbers = #tpu.dot_dimension_numbers<[1], [0], [0], [1], [0, 0, 1, 1], [], []>} : vector<2x32xbf16>, vector<32x128xbf16>, vector<2x128xf32> -> vector<2x128xf32>
    %327 = arith.addf %324, %326 : vector<2x128xf32>
    %328 = vector.extract_strided_slice %327 {offsets = [0, 0], sizes = [2, 32], strides = [1, 1]} : vector<2x128xf32> to vector<2x32xf32>
    %329 = arith.negf %328 : vector<2x32xf32>
    %330 = math.exp %329 : vector<2x32xf32>
    %cst_87 = arith.constant 1.000000e+00 : f32
    %331 = vector.broadcast %cst_87 : f32 to vector<2x32xf32>
    %332 = arith.addf %331, %330 : vector<2x32xf32>
    %333 = arith.divf %331, %332 : vector<2x32xf32>
    %334 = vector.extract_strided_slice %327 {offsets = [0, 32], sizes = [2, 32], strides = [1, 1]} : vector<2x128xf32> to vector<2x32xf32>
    %335 = arith.negf %334 : vector<2x32xf32>
    %336 = math.exp %335 : vector<2x32xf32>
    %cst_88 = arith.constant 1.000000e+00 : f32
    %337 = vector.broadcast %cst_88 : f32 to vector<2x32xf32>
    %338 = arith.addf %337, %336 : vector<2x32xf32>
    %339 = arith.divf %337, %338 : vector<2x32xf32>
    %340 = vector.extract_strided_slice %327 {offsets = [0, 64], sizes = [2, 32], strides = [1, 1]} : vector<2x128xf32> to vector<2x32xf32>
    %341 = math.tanh %340 : vector<2x32xf32>
    %342 = vector.extract_strided_slice %327 {offsets = [0, 96], sizes = [2, 32], strides = [1, 1]} : vector<2x128xf32> to vector<2x32xf32>
    %343 = arith.negf %342 : vector<2x32xf32>
    %344 = math.exp %343 : vector<2x32xf32>
    %cst_89 = arith.constant 1.000000e+00 : f32
    %345 = vector.broadcast %cst_89 : f32 to vector<2x32xf32>
    %346 = arith.addf %345, %344 : vector<2x32xf32>
    %347 = arith.divf %345, %346 : vector<2x32xf32>
    %348 = arith.mulf %339, %321 : vector<2x32xf32>
    %349 = arith.mulf %333, %341 : vector<2x32xf32>
    %350 = arith.addf %348, %349 : vector<2x32xf32>
    %351 = math.tanh %350 : vector<2x32xf32>
    %352 = arith.mulf %347, %351 : vector<2x32xf32>
    %353 = vector.extract_strided_slice %263 {offsets = [6, 0], sizes = [2, 128], strides = [1, 1]} : vector<16x128xf32> to vector<2x128xf32>
    %354 = arith.truncf %352 : vector<2x32xf32> to vector<2x32xbf16>
    %cst_90 = arith.constant dense<0.000000e+00> : vector<2x128xf32>
    %355 = tpu.matmul %354, %4, %cst_90 {dimension_numbers = #tpu.dot_dimension_numbers<[1], [0], [0], [1], [0, 0, 1, 1], [], []>} : vector<2x32xbf16>, vector<32x128xbf16>, vector<2x128xf32> -> vector<2x128xf32>
    %356 = arith.addf %353, %355 : vector<2x128xf32>
    %357 = vector.extract_strided_slice %356 {offsets = [0, 0], sizes = [2, 32], strides = [1, 1]} : vector<2x128xf32> to vector<2x32xf32>
    %358 = arith.negf %357 : vector<2x32xf32>
    %359 = math.exp %358 : vector<2x32xf32>
    %cst_91 = arith.constant 1.000000e+00 : f32
    %360 = vector.broadcast %cst_91 : f32 to vector<2x32xf32>
    %361 = arith.addf %360, %359 : vector<2x32xf32>
    %362 = arith.divf %360, %361 : vector<2x32xf32>
    %363 = vector.extract_strided_slice %356 {offsets = [0, 32], sizes = [2, 32], strides = [1, 1]} : vector<2x128xf32> to vector<2x32xf32>
    %364 = arith.negf %363 : vector<2x32xf32>
    %365 = math.exp %364 : vector<2x32xf32>
    %cst_92 = arith.constant 1.000000e+00 : f32
    %366 = vector.broadcast %cst_92 : f32 to vector<2x32xf32>
    %367 = arith.addf %366, %365 : vector<2x32xf32>
    %368 = arith.divf %366, %367 : vector<2x32xf32>
    %369 = vector.extract_strided_slice %356 {offsets = [0, 64], sizes = [2, 32], strides = [1, 1]} : vector<2x128xf32> to vector<2x32xf32>
    %370 = math.tanh %369 : vector<2x32xf32>
    %371 = vector.extract_strided_slice %356 {offsets = [0, 96], sizes = [2, 32], strides = [1, 1]} : vector<2x128xf32> to vector<2x32xf32>
    %372 = arith.negf %371 : vector<2x32xf32>
    %373 = math.exp %372 : vector<2x32xf32>
    %cst_93 = arith.constant 1.000000e+00 : f32
    %374 = vector.broadcast %cst_93 : f32 to vector<2x32xf32>
    %375 = arith.addf %374, %373 : vector<2x32xf32>
    %376 = arith.divf %374, %375 : vector<2x32xf32>
    %377 = arith.mulf %368, %350 : vector<2x32xf32>
    %378 = arith.mulf %362, %370 : vector<2x32xf32>
    %379 = arith.addf %377, %378 : vector<2x32xf32>
    %380 = math.tanh %379 : vector<2x32xf32>
    %381 = arith.mulf %376, %380 : vector<2x32xf32>
    %382 = vector.extract_strided_slice %263 {offsets = [8, 0], sizes = [2, 128], strides = [1, 1]} : vector<16x128xf32> to vector<2x128xf32>
    %383 = arith.truncf %381 : vector<2x32xf32> to vector<2x32xbf16>
    %cst_94 = arith.constant dense<0.000000e+00> : vector<2x128xf32>
    %384 = tpu.matmul %383, %4, %cst_94 {dimension_numbers = #tpu.dot_dimension_numbers<[1], [0], [0], [1], [0, 0, 1, 1], [], []>} : vector<2x32xbf16>, vector<32x128xbf16>, vector<2x128xf32> -> vector<2x128xf32>
    %385 = arith.addf %382, %384 : vector<2x128xf32>
    %386 = vector.extract_strided_slice %385 {offsets = [0, 0], sizes = [2, 32], strides = [1, 1]} : vector<2x128xf32> to vector<2x32xf32>
    %387 = arith.negf %386 : vector<2x32xf32>
    %388 = math.exp %387 : vector<2x32xf32>
    %cst_95 = arith.constant 1.000000e+00 : f32
    %389 = vector.broadcast %cst_95 : f32 to vector<2x32xf32>
    %390 = arith.addf %389, %388 : vector<2x32xf32>
    %391 = arith.divf %389, %390 : vector<2x32xf32>
    %392 = vector.extract_strided_slice %385 {offsets = [0, 32], sizes = [2, 32], strides = [1, 1]} : vector<2x128xf32> to vector<2x32xf32>
    %393 = arith.negf %392 : vector<2x32xf32>
    %394 = math.exp %393 : vector<2x32xf32>
    %cst_96 = arith.constant 1.000000e+00 : f32
    %395 = vector.broadcast %cst_96 : f32 to vector<2x32xf32>
    %396 = arith.addf %395, %394 : vector<2x32xf32>
    %397 = arith.divf %395, %396 : vector<2x32xf32>
    %398 = vector.extract_strided_slice %385 {offsets = [0, 64], sizes = [2, 32], strides = [1, 1]} : vector<2x128xf32> to vector<2x32xf32>
    %399 = math.tanh %398 : vector<2x32xf32>
    %400 = vector.extract_strided_slice %385 {offsets = [0, 96], sizes = [2, 32], strides = [1, 1]} : vector<2x128xf32> to vector<2x32xf32>
    %401 = arith.negf %400 : vector<2x32xf32>
    %402 = math.exp %401 : vector<2x32xf32>
    %cst_97 = arith.constant 1.000000e+00 : f32
    %403 = vector.broadcast %cst_97 : f32 to vector<2x32xf32>
    %404 = arith.addf %403, %402 : vector<2x32xf32>
    %405 = arith.divf %403, %404 : vector<2x32xf32>
    %406 = arith.mulf %397, %379 : vector<2x32xf32>
    %407 = arith.mulf %391, %399 : vector<2x32xf32>
    %408 = arith.addf %406, %407 : vector<2x32xf32>
    %409 = math.tanh %408 : vector<2x32xf32>
    %410 = arith.mulf %405, %409 : vector<2x32xf32>
    %411 = vector.extract_strided_slice %263 {offsets = [10, 0], sizes = [2, 128], strides = [1, 1]} : vector<16x128xf32> to vector<2x128xf32>
    %412 = arith.truncf %410 : vector<2x32xf32> to vector<2x32xbf16>
    %cst_98 = arith.constant dense<0.000000e+00> : vector<2x128xf32>
    %413 = tpu.matmul %412, %4, %cst_98 {dimension_numbers = #tpu.dot_dimension_numbers<[1], [0], [0], [1], [0, 0, 1, 1], [], []>} : vector<2x32xbf16>, vector<32x128xbf16>, vector<2x128xf32> -> vector<2x128xf32>
    %414 = arith.addf %411, %413 : vector<2x128xf32>
    %415 = vector.extract_strided_slice %414 {offsets = [0, 0], sizes = [2, 32], strides = [1, 1]} : vector<2x128xf32> to vector<2x32xf32>
    %416 = arith.negf %415 : vector<2x32xf32>
    %417 = math.exp %416 : vector<2x32xf32>
    %cst_99 = arith.constant 1.000000e+00 : f32
    %418 = vector.broadcast %cst_99 : f32 to vector<2x32xf32>
    %419 = arith.addf %418, %417 : vector<2x32xf32>
    %420 = arith.divf %418, %419 : vector<2x32xf32>
    %421 = vector.extract_strided_slice %414 {offsets = [0, 32], sizes = [2, 32], strides = [1, 1]} : vector<2x128xf32> to vector<2x32xf32>
    %422 = arith.negf %421 : vector<2x32xf32>
    %423 = math.exp %422 : vector<2x32xf32>
    %cst_100 = arith.constant 1.000000e+00 : f32
    %424 = vector.broadcast %cst_100 : f32 to vector<2x32xf32>
    %425 = arith.addf %424, %423 : vector<2x32xf32>
    %426 = arith.divf %424, %425 : vector<2x32xf32>
    %427 = vector.extract_strided_slice %414 {offsets = [0, 64], sizes = [2, 32], strides = [1, 1]} : vector<2x128xf32> to vector<2x32xf32>
    %428 = math.tanh %427 : vector<2x32xf32>
    %429 = vector.extract_strided_slice %414 {offsets = [0, 96], sizes = [2, 32], strides = [1, 1]} : vector<2x128xf32> to vector<2x32xf32>
    %430 = arith.negf %429 : vector<2x32xf32>
    %431 = math.exp %430 : vector<2x32xf32>
    %cst_101 = arith.constant 1.000000e+00 : f32
    %432 = vector.broadcast %cst_101 : f32 to vector<2x32xf32>
    %433 = arith.addf %432, %431 : vector<2x32xf32>
    %434 = arith.divf %432, %433 : vector<2x32xf32>
    %435 = arith.mulf %426, %408 : vector<2x32xf32>
    %436 = arith.mulf %420, %428 : vector<2x32xf32>
    %437 = arith.addf %435, %436 : vector<2x32xf32>
    %438 = math.tanh %437 : vector<2x32xf32>
    %439 = arith.mulf %434, %438 : vector<2x32xf32>
    %440 = vector.extract_strided_slice %263 {offsets = [12, 0], sizes = [2, 128], strides = [1, 1]} : vector<16x128xf32> to vector<2x128xf32>
    %441 = arith.truncf %439 : vector<2x32xf32> to vector<2x32xbf16>
    %cst_102 = arith.constant dense<0.000000e+00> : vector<2x128xf32>
    %442 = tpu.matmul %441, %4, %cst_102 {dimension_numbers = #tpu.dot_dimension_numbers<[1], [0], [0], [1], [0, 0, 1, 1], [], []>} : vector<2x32xbf16>, vector<32x128xbf16>, vector<2x128xf32> -> vector<2x128xf32>
    %443 = arith.addf %440, %442 : vector<2x128xf32>
    %444 = vector.extract_strided_slice %443 {offsets = [0, 0], sizes = [2, 32], strides = [1, 1]} : vector<2x128xf32> to vector<2x32xf32>
    %445 = arith.negf %444 : vector<2x32xf32>
    %446 = math.exp %445 : vector<2x32xf32>
    %cst_103 = arith.constant 1.000000e+00 : f32
    %447 = vector.broadcast %cst_103 : f32 to vector<2x32xf32>
    %448 = arith.addf %447, %446 : vector<2x32xf32>
    %449 = arith.divf %447, %448 : vector<2x32xf32>
    %450 = vector.extract_strided_slice %443 {offsets = [0, 32], sizes = [2, 32], strides = [1, 1]} : vector<2x128xf32> to vector<2x32xf32>
    %451 = arith.negf %450 : vector<2x32xf32>
    %452 = math.exp %451 : vector<2x32xf32>
    %cst_104 = arith.constant 1.000000e+00 : f32
    %453 = vector.broadcast %cst_104 : f32 to vector<2x32xf32>
    %454 = arith.addf %453, %452 : vector<2x32xf32>
    %455 = arith.divf %453, %454 : vector<2x32xf32>
    %456 = vector.extract_strided_slice %443 {offsets = [0, 64], sizes = [2, 32], strides = [1, 1]} : vector<2x128xf32> to vector<2x32xf32>
    %457 = math.tanh %456 : vector<2x32xf32>
    %458 = vector.extract_strided_slice %443 {offsets = [0, 96], sizes = [2, 32], strides = [1, 1]} : vector<2x128xf32> to vector<2x32xf32>
    %459 = arith.negf %458 : vector<2x32xf32>
    %460 = math.exp %459 : vector<2x32xf32>
    %cst_105 = arith.constant 1.000000e+00 : f32
    %461 = vector.broadcast %cst_105 : f32 to vector<2x32xf32>
    %462 = arith.addf %461, %460 : vector<2x32xf32>
    %463 = arith.divf %461, %462 : vector<2x32xf32>
    %464 = arith.mulf %455, %437 : vector<2x32xf32>
    %465 = arith.mulf %449, %457 : vector<2x32xf32>
    %466 = arith.addf %464, %465 : vector<2x32xf32>
    %467 = math.tanh %466 : vector<2x32xf32>
    %468 = arith.mulf %463, %467 : vector<2x32xf32>
    %469 = vector.extract_strided_slice %263 {offsets = [14, 0], sizes = [2, 128], strides = [1, 1]} : vector<16x128xf32> to vector<2x128xf32>
    %470 = arith.truncf %468 : vector<2x32xf32> to vector<2x32xbf16>
    %cst_106 = arith.constant dense<0.000000e+00> : vector<2x128xf32>
    %471 = tpu.matmul %470, %4, %cst_106 {dimension_numbers = #tpu.dot_dimension_numbers<[1], [0], [0], [1], [0, 0, 1, 1], [], []>} : vector<2x32xbf16>, vector<32x128xbf16>, vector<2x128xf32> -> vector<2x128xf32>
    %472 = arith.addf %469, %471 : vector<2x128xf32>
    %473 = vector.extract_strided_slice %472 {offsets = [0, 0], sizes = [2, 32], strides = [1, 1]} : vector<2x128xf32> to vector<2x32xf32>
    %474 = arith.negf %473 : vector<2x32xf32>
    %475 = math.exp %474 : vector<2x32xf32>
    %cst_107 = arith.constant 1.000000e+00 : f32
    %476 = vector.broadcast %cst_107 : f32 to vector<2x32xf32>
    %477 = arith.addf %476, %475 : vector<2x32xf32>
    %478 = arith.divf %476, %477 : vector<2x32xf32>
    %479 = vector.extract_strided_slice %472 {offsets = [0, 32], sizes = [2, 32], strides = [1, 1]} : vector<2x128xf32> to vector<2x32xf32>
    %480 = arith.negf %479 : vector<2x32xf32>
    %481 = math.exp %480 : vector<2x32xf32>
    %cst_108 = arith.constant 1.000000e+00 : f32
    %482 = vector.broadcast %cst_108 : f32 to vector<2x32xf32>
    %483 = arith.addf %482, %481 : vector<2x32xf32>
    %484 = arith.divf %482, %483 : vector<2x32xf32>
    %485 = vector.extract_strided_slice %472 {offsets = [0, 64], sizes = [2, 32], strides = [1, 1]} : vector<2x128xf32> to vector<2x32xf32>
    %486 = math.tanh %485 : vector<2x32xf32>
    %487 = vector.extract_strided_slice %472 {offsets = [0, 96], sizes = [2, 32], strides = [1, 1]} : vector<2x128xf32> to vector<2x32xf32>
    %488 = arith.negf %487 : vector<2x32xf32>
    %489 = math.exp %488 : vector<2x32xf32>
    %cst_109 = arith.constant 1.000000e+00 : f32
    %490 = vector.broadcast %cst_109 : f32 to vector<2x32xf32>
    %491 = arith.addf %490, %489 : vector<2x32xf32>
    %492 = arith.divf %490, %491 : vector<2x32xf32>
    %493 = arith.mulf %484, %466 : vector<2x32xf32>
    %494 = arith.mulf %478, %486 : vector<2x32xf32>
    %495 = arith.addf %493, %494 : vector<2x32xf32>
    %496 = math.tanh %495 : vector<2x32xf32>
    %497 = arith.mulf %492, %496 : vector<2x32xf32>
    %498 = arith.truncf %497 : vector<2x32xf32> to vector<2x32xbf16>
    %cst_110 = arith.constant dense<0.000000e+00> : vector<2x32xf32>
    %499 = tpu.matmul %498, %6, %cst_110 {dimension_numbers = #tpu.dot_dimension_numbers<[1], [0], [0], [1], [0, 0, 1, 1], [], []>} : vector<2x32xbf16>, vector<32x32xbf16>, vector<2x32xf32> -> vector<2x32xf32>
    %500 = vector.broadcast %7 : vector<1x32xf32> to vector<2x32xf32>
    %501 = arith.addf %499, %500 : vector<2x32xf32>
    %cst_111 = arith.constant 0.353553385 : f32
    %502 = vector.broadcast %cst_111 : f32 to vector<2x32xf32>
    %503 = arith.mulf %501, %502 : vector<2x32xf32>
    %504 = vector.extract_strided_slice %294 {offsets = [0, 0], sizes = [1, 32], strides = [1, 1]} : vector<2x32xf32> to vector<1x32xf32>
    %505 = vector.extract_strided_slice %323 {offsets = [0, 0], sizes = [1, 32], strides = [1, 1]} : vector<2x32xf32> to vector<1x32xf32>
    %506 = vector.extract_strided_slice %352 {offsets = [0, 0], sizes = [1, 32], strides = [1, 1]} : vector<2x32xf32> to vector<1x32xf32>
    %507 = vector.extract_strided_slice %381 {offsets = [0, 0], sizes = [1, 32], strides = [1, 1]} : vector<2x32xf32> to vector<1x32xf32>
    %508 = vector.extract_strided_slice %410 {offsets = [0, 0], sizes = [1, 32], strides = [1, 1]} : vector<2x32xf32> to vector<1x32xf32>
    %509 = vector.extract_strided_slice %439 {offsets = [0, 0], sizes = [1, 32], strides = [1, 1]} : vector<2x32xf32> to vector<1x32xf32>
    %510 = vector.extract_strided_slice %468 {offsets = [0, 0], sizes = [1, 32], strides = [1, 1]} : vector<2x32xf32> to vector<1x32xf32>
    %511 = vector.extract_strided_slice %497 {offsets = [0, 0], sizes = [1, 32], strides = [1, 1]} : vector<2x32xf32> to vector<1x32xf32>
    %512 = tpu.concatenate %504, %505, %506, %507, %508, %509, %510, %511 in 0 : vector<1x32xf32>, vector<1x32xf32>, vector<1x32xf32>, vector<1x32xf32>, vector<1x32xf32>, vector<1x32xf32>, vector<1x32xf32>, vector<1x32xf32> -> vector<8x32xf32>
    %513 = arith.truncf %512 : vector<8x32xf32> to vector<8x32xbf16>
    %cst_112 = arith.constant dense<0.000000e+00> : vector<8x32xf32>
    %514 = tpu.matmul %513, %8, %cst_112 {dimension_numbers = #tpu.dot_dimension_numbers<[1], [0], [0], [1], [0, 0, 1, 1], [], []>} : vector<8x32xbf16>, vector<32x32xbf16>, vector<8x32xf32> -> vector<8x32xf32>
    %515 = vector.broadcast %9 : vector<1x32xf32> to vector<8x32xf32>
    %516 = arith.addf %514, %515 : vector<8x32xf32>
    %517 = arith.truncf %512 : vector<8x32xf32> to vector<8x32xbf16>
    %cst_113 = arith.constant dense<0.000000e+00> : vector<8x32xf32>
    %518 = tpu.matmul %517, %10, %cst_113 {dimension_numbers = #tpu.dot_dimension_numbers<[1], [0], [0], [1], [0, 0, 1, 1], [], []>} : vector<8x32xbf16>, vector<32x32xbf16>, vector<8x32xf32> -> vector<8x32xf32>
    %519 = vector.broadcast %11 : vector<1x32xf32> to vector<8x32xf32>
    %520 = arith.addf %518, %519 : vector<8x32xf32>
    %521 = vector.extract_strided_slice %503 {offsets = [0, 0], sizes = [1, 32], strides = [1, 1]} : vector<2x32xf32> to vector<1x32xf32>
    %522 = vector.extract_strided_slice %521 {offsets = [0, 0], sizes = [1, 8], strides = [1, 1]} : vector<1x32xf32> to vector<1x8xf32>
    %523 = vector.extract_strided_slice %516 {offsets = [0, 0], sizes = [8, 8], strides = [1, 1]} : vector<8x32xf32> to vector<8x8xf32>
    %524 = arith.truncf %522 : vector<1x8xf32> to vector<1x8xbf16>
    %525 = arith.truncf %523 : vector<8x8xf32> to vector<8x8xbf16>
    %cst_114 = arith.constant dense<0.000000e+00> : vector<1x8xf32>
    %526 = tpu.matmul %524, %525, %cst_114 {dimension_numbers = #tpu.dot_dimension_numbers<[1], [1], [0], [0], [0, 0, 1, 0], [], []>} : vector<1x8xbf16>, vector<8x8xbf16>, vector<1x8xf32> -> vector<1x8xf32>
    %cst_115 = arith.constant dense<0xFF800000> : vector<1xf32>
    %527 = vector.multi_reduction <maximumf>, %526, %cst_115 [1] : vector<1x8xf32> to vector<1xf32>
    %528 = vector.shape_cast %527 : vector<1xf32> to vector<1x1xf32>
    %529 = vector.broadcast %528 : vector<1x1xf32> to vector<1x8xf32>
    %530 = arith.subf %526, %529 : vector<1x8xf32>
    %531 = math.exp %530 : vector<1x8xf32>
    %cst_116 = arith.constant dense<0.000000e+00> : vector<1xf32>
    %532 = vector.multi_reduction <add>, %531, %cst_116 [1] : vector<1x8xf32> to vector<1xf32>
    %533 = vector.shape_cast %532 : vector<1xf32> to vector<1x1xf32>
    %534 = vector.broadcast %533 : vector<1x1xf32> to vector<1x8xf32>
    %535 = arith.divf %531, %534 : vector<1x8xf32>
    %536 = vector.extract_strided_slice %520 {offsets = [0, 0], sizes = [8, 8], strides = [1, 1]} : vector<8x32xf32> to vector<8x8xf32>
    %537 = arith.truncf %535 : vector<1x8xf32> to vector<1x8xbf16>
    %538 = arith.truncf %536 : vector<8x8xf32> to vector<8x8xbf16>
    %cst_117 = arith.constant dense<0.000000e+00> : vector<1x8xf32>
    %539 = tpu.matmul %537, %538, %cst_117 {dimension_numbers = #tpu.dot_dimension_numbers<[1], [0], [0], [1], [0, 0, 1, 1], [], []>} : vector<1x8xbf16>, vector<8x8xbf16>, vector<1x8xf32> -> vector<1x8xf32>
    %540 = vector.extract_strided_slice %521 {offsets = [0, 8], sizes = [1, 8], strides = [1, 1]} : vector<1x32xf32> to vector<1x8xf32>
    %541 = vector.extract_strided_slice %516 {offsets = [0, 8], sizes = [8, 8], strides = [1, 1]} : vector<8x32xf32> to vector<8x8xf32>
    %542 = arith.truncf %540 : vector<1x8xf32> to vector<1x8xbf16>
    %543 = arith.truncf %541 : vector<8x8xf32> to vector<8x8xbf16>
    %cst_118 = arith.constant dense<0.000000e+00> : vector<1x8xf32>
    %544 = tpu.matmul %542, %543, %cst_118 {dimension_numbers = #tpu.dot_dimension_numbers<[1], [1], [0], [0], [0, 0, 1, 0], [], []>} : vector<1x8xbf16>, vector<8x8xbf16>, vector<1x8xf32> -> vector<1x8xf32>
    %cst_119 = arith.constant dense<0xFF800000> : vector<1xf32>
    %545 = vector.multi_reduction <maximumf>, %544, %cst_119 [1] : vector<1x8xf32> to vector<1xf32>
    %546 = vector.shape_cast %545 : vector<1xf32> to vector<1x1xf32>
    %547 = vector.broadcast %546 : vector<1x1xf32> to vector<1x8xf32>
    %548 = arith.subf %544, %547 : vector<1x8xf32>
    %549 = math.exp %548 : vector<1x8xf32>
    %cst_120 = arith.constant dense<0.000000e+00> : vector<1xf32>
    %550 = vector.multi_reduction <add>, %549, %cst_120 [1] : vector<1x8xf32> to vector<1xf32>
    %551 = vector.shape_cast %550 : vector<1xf32> to vector<1x1xf32>
    %552 = vector.broadcast %551 : vector<1x1xf32> to vector<1x8xf32>
    %553 = arith.divf %549, %552 : vector<1x8xf32>
    %554 = vector.extract_strided_slice %520 {offsets = [0, 8], sizes = [8, 8], strides = [1, 1]} : vector<8x32xf32> to vector<8x8xf32>
    %555 = arith.truncf %553 : vector<1x8xf32> to vector<1x8xbf16>
    %556 = arith.truncf %554 : vector<8x8xf32> to vector<8x8xbf16>
    %cst_121 = arith.constant dense<0.000000e+00> : vector<1x8xf32>
    %557 = tpu.matmul %555, %556, %cst_121 {dimension_numbers = #tpu.dot_dimension_numbers<[1], [0], [0], [1], [0, 0, 1, 1], [], []>} : vector<1x8xbf16>, vector<8x8xbf16>, vector<1x8xf32> -> vector<1x8xf32>
    %558 = vector.extract_strided_slice %521 {offsets = [0, 16], sizes = [1, 8], strides = [1, 1]} : vector<1x32xf32> to vector<1x8xf32>
    %559 = vector.extract_strided_slice %516 {offsets = [0, 16], sizes = [8, 8], strides = [1, 1]} : vector<8x32xf32> to vector<8x8xf32>
    %560 = arith.truncf %558 : vector<1x8xf32> to vector<1x8xbf16>
    %561 = arith.truncf %559 : vector<8x8xf32> to vector<8x8xbf16>
    %cst_122 = arith.constant dense<0.000000e+00> : vector<1x8xf32>
    %562 = tpu.matmul %560, %561, %cst_122 {dimension_numbers = #tpu.dot_dimension_numbers<[1], [1], [0], [0], [0, 0, 1, 0], [], []>} : vector<1x8xbf16>, vector<8x8xbf16>, vector<1x8xf32> -> vector<1x8xf32>
    %cst_123 = arith.constant dense<0xFF800000> : vector<1xf32>
    %563 = vector.multi_reduction <maximumf>, %562, %cst_123 [1] : vector<1x8xf32> to vector<1xf32>
    %564 = vector.shape_cast %563 : vector<1xf32> to vector<1x1xf32>
    %565 = vector.broadcast %564 : vector<1x1xf32> to vector<1x8xf32>
    %566 = arith.subf %562, %565 : vector<1x8xf32>
    %567 = math.exp %566 : vector<1x8xf32>
    %cst_124 = arith.constant dense<0.000000e+00> : vector<1xf32>
    %568 = vector.multi_reduction <add>, %567, %cst_124 [1] : vector<1x8xf32> to vector<1xf32>
    %569 = vector.shape_cast %568 : vector<1xf32> to vector<1x1xf32>
    %570 = vector.broadcast %569 : vector<1x1xf32> to vector<1x8xf32>
    %571 = arith.divf %567, %570 : vector<1x8xf32>
    %572 = vector.extract_strided_slice %520 {offsets = [0, 16], sizes = [8, 8], strides = [1, 1]} : vector<8x32xf32> to vector<8x8xf32>
    %573 = arith.truncf %571 : vector<1x8xf32> to vector<1x8xbf16>
    %574 = arith.truncf %572 : vector<8x8xf32> to vector<8x8xbf16>
    %cst_125 = arith.constant dense<0.000000e+00> : vector<1x8xf32>
    %575 = tpu.matmul %573, %574, %cst_125 {dimension_numbers = #tpu.dot_dimension_numbers<[1], [0], [0], [1], [0, 0, 1, 1], [], []>} : vector<1x8xbf16>, vector<8x8xbf16>, vector<1x8xf32> -> vector<1x8xf32>
    %576 = vector.extract_strided_slice %521 {offsets = [0, 24], sizes = [1, 8], strides = [1, 1]} : vector<1x32xf32> to vector<1x8xf32>
    %577 = vector.extract_strided_slice %516 {offsets = [0, 24], sizes = [8, 8], strides = [1, 1]} : vector<8x32xf32> to vector<8x8xf32>
    %578 = arith.truncf %576 : vector<1x8xf32> to vector<1x8xbf16>
    %579 = arith.truncf %577 : vector<8x8xf32> to vector<8x8xbf16>
    %cst_126 = arith.constant dense<0.000000e+00> : vector<1x8xf32>
    %580 = tpu.matmul %578, %579, %cst_126 {dimension_numbers = #tpu.dot_dimension_numbers<[1], [1], [0], [0], [0, 0, 1, 0], [], []>} : vector<1x8xbf16>, vector<8x8xbf16>, vector<1x8xf32> -> vector<1x8xf32>
    %cst_127 = arith.constant dense<0xFF800000> : vector<1xf32>
    %581 = vector.multi_reduction <maximumf>, %580, %cst_127 [1] : vector<1x8xf32> to vector<1xf32>
    %582 = vector.shape_cast %581 : vector<1xf32> to vector<1x1xf32>
    %583 = vector.broadcast %582 : vector<1x1xf32> to vector<1x8xf32>
    %584 = arith.subf %580, %583 : vector<1x8xf32>
    %585 = math.exp %584 : vector<1x8xf32>
    %cst_128 = arith.constant dense<0.000000e+00> : vector<1xf32>
    %586 = vector.multi_reduction <add>, %585, %cst_128 [1] : vector<1x8xf32> to vector<1xf32>
    %587 = vector.shape_cast %586 : vector<1xf32> to vector<1x1xf32>
    %588 = vector.broadcast %587 : vector<1x1xf32> to vector<1x8xf32>
    %589 = arith.divf %585, %588 : vector<1x8xf32>
    %590 = vector.extract_strided_slice %520 {offsets = [0, 24], sizes = [8, 8], strides = [1, 1]} : vector<8x32xf32> to vector<8x8xf32>
    %591 = arith.truncf %589 : vector<1x8xf32> to vector<1x8xbf16>
    %592 = arith.truncf %590 : vector<8x8xf32> to vector<8x8xbf16>
    %cst_129 = arith.constant dense<0.000000e+00> : vector<1x8xf32>
    %593 = tpu.matmul %591, %592, %cst_129 {dimension_numbers = #tpu.dot_dimension_numbers<[1], [0], [0], [1], [0, 0, 1, 1], [], []>} : vector<1x8xbf16>, vector<8x8xbf16>, vector<1x8xf32> -> vector<1x8xf32>
    %594 = tpu.concatenate %539, %557, %575, %593 in 1 : vector<1x8xf32>, vector<1x8xf32>, vector<1x8xf32>, vector<1x8xf32> -> vector<1x32xf32>
    %595 = vector.extract_strided_slice %294 {offsets = [1, 0], sizes = [1, 32], strides = [1, 1]} : vector<2x32xf32> to vector<1x32xf32>
    %596 = vector.extract_strided_slice %323 {offsets = [1, 0], sizes = [1, 32], strides = [1, 1]} : vector<2x32xf32> to vector<1x32xf32>
    %597 = vector.extract_strided_slice %352 {offsets = [1, 0], sizes = [1, 32], strides = [1, 1]} : vector<2x32xf32> to vector<1x32xf32>
    %598 = vector.extract_strided_slice %381 {offsets = [1, 0], sizes = [1, 32], strides = [1, 1]} : vector<2x32xf32> to vector<1x32xf32>
    %599 = vector.extract_strided_slice %410 {offsets = [1, 0], sizes = [1, 32], strides = [1, 1]} : vector<2x32xf32> to vector<1x32xf32>
    %600 = vector.extract_strided_slice %439 {offsets = [1, 0], sizes = [1, 32], strides = [1, 1]} : vector<2x32xf32> to vector<1x32xf32>
    %601 = vector.extract_strided_slice %468 {offsets = [1, 0], sizes = [1, 32], strides = [1, 1]} : vector<2x32xf32> to vector<1x32xf32>
    %602 = vector.extract_strided_slice %497 {offsets = [1, 0], sizes = [1, 32], strides = [1, 1]} : vector<2x32xf32> to vector<1x32xf32>
    %603 = tpu.concatenate %595, %596, %597, %598, %599, %600, %601, %602 in 0 : vector<1x32xf32>, vector<1x32xf32>, vector<1x32xf32>, vector<1x32xf32>, vector<1x32xf32>, vector<1x32xf32>, vector<1x32xf32>, vector<1x32xf32> -> vector<8x32xf32>
    %604 = arith.truncf %603 : vector<8x32xf32> to vector<8x32xbf16>
    %cst_130 = arith.constant dense<0.000000e+00> : vector<8x32xf32>
    %605 = tpu.matmul %604, %8, %cst_130 {dimension_numbers = #tpu.dot_dimension_numbers<[1], [0], [0], [1], [0, 0, 1, 1], [], []>} : vector<8x32xbf16>, vector<32x32xbf16>, vector<8x32xf32> -> vector<8x32xf32>
    %606 = vector.broadcast %9 : vector<1x32xf32> to vector<8x32xf32>
    %607 = arith.addf %605, %606 : vector<8x32xf32>
    %608 = arith.truncf %603 : vector<8x32xf32> to vector<8x32xbf16>
    %cst_131 = arith.constant dense<0.000000e+00> : vector<8x32xf32>
    %609 = tpu.matmul %608, %10, %cst_131 {dimension_numbers = #tpu.dot_dimension_numbers<[1], [0], [0], [1], [0, 0, 1, 1], [], []>} : vector<8x32xbf16>, vector<32x32xbf16>, vector<8x32xf32> -> vector<8x32xf32>
    %610 = vector.broadcast %11 : vector<1x32xf32> to vector<8x32xf32>
    %611 = arith.addf %609, %610 : vector<8x32xf32>
    %612 = vector.extract_strided_slice %503 {offsets = [1, 0], sizes = [1, 32], strides = [1, 1]} : vector<2x32xf32> to vector<1x32xf32>
    %613 = vector.extract_strided_slice %612 {offsets = [0, 0], sizes = [1, 8], strides = [1, 1]} : vector<1x32xf32> to vector<1x8xf32>
    %614 = vector.extract_strided_slice %607 {offsets = [0, 0], sizes = [8, 8], strides = [1, 1]} : vector<8x32xf32> to vector<8x8xf32>
    %615 = arith.truncf %613 : vector<1x8xf32> to vector<1x8xbf16>
    %616 = arith.truncf %614 : vector<8x8xf32> to vector<8x8xbf16>
    %cst_132 = arith.constant dense<0.000000e+00> : vector<1x8xf32>
    %617 = tpu.matmul %615, %616, %cst_132 {dimension_numbers = #tpu.dot_dimension_numbers<[1], [1], [0], [0], [0, 0, 1, 0], [], []>} : vector<1x8xbf16>, vector<8x8xbf16>, vector<1x8xf32> -> vector<1x8xf32>
    %cst_133 = arith.constant dense<0xFF800000> : vector<1xf32>
    %618 = vector.multi_reduction <maximumf>, %617, %cst_133 [1] : vector<1x8xf32> to vector<1xf32>
    %619 = vector.shape_cast %618 : vector<1xf32> to vector<1x1xf32>
    %620 = vector.broadcast %619 : vector<1x1xf32> to vector<1x8xf32>
    %621 = arith.subf %617, %620 : vector<1x8xf32>
    %622 = math.exp %621 : vector<1x8xf32>
    %cst_134 = arith.constant dense<0.000000e+00> : vector<1xf32>
    %623 = vector.multi_reduction <add>, %622, %cst_134 [1] : vector<1x8xf32> to vector<1xf32>
    %624 = vector.shape_cast %623 : vector<1xf32> to vector<1x1xf32>
    %625 = vector.broadcast %624 : vector<1x1xf32> to vector<1x8xf32>
    %626 = arith.divf %622, %625 : vector<1x8xf32>
    %627 = vector.extract_strided_slice %611 {offsets = [0, 0], sizes = [8, 8], strides = [1, 1]} : vector<8x32xf32> to vector<8x8xf32>
    %628 = arith.truncf %626 : vector<1x8xf32> to vector<1x8xbf16>
    %629 = arith.truncf %627 : vector<8x8xf32> to vector<8x8xbf16>
    %cst_135 = arith.constant dense<0.000000e+00> : vector<1x8xf32>
    %630 = tpu.matmul %628, %629, %cst_135 {dimension_numbers = #tpu.dot_dimension_numbers<[1], [0], [0], [1], [0, 0, 1, 1], [], []>} : vector<1x8xbf16>, vector<8x8xbf16>, vector<1x8xf32> -> vector<1x8xf32>
    %631 = vector.extract_strided_slice %612 {offsets = [0, 8], sizes = [1, 8], strides = [1, 1]} : vector<1x32xf32> to vector<1x8xf32>
    %632 = vector.extract_strided_slice %607 {offsets = [0, 8], sizes = [8, 8], strides = [1, 1]} : vector<8x32xf32> to vector<8x8xf32>
    %633 = arith.truncf %631 : vector<1x8xf32> to vector<1x8xbf16>
    %634 = arith.truncf %632 : vector<8x8xf32> to vector<8x8xbf16>
    %cst_136 = arith.constant dense<0.000000e+00> : vector<1x8xf32>
    %635 = tpu.matmul %633, %634, %cst_136 {dimension_numbers = #tpu.dot_dimension_numbers<[1], [1], [0], [0], [0, 0, 1, 0], [], []>} : vector<1x8xbf16>, vector<8x8xbf16>, vector<1x8xf32> -> vector<1x8xf32>
    %cst_137 = arith.constant dense<0xFF800000> : vector<1xf32>
    %636 = vector.multi_reduction <maximumf>, %635, %cst_137 [1] : vector<1x8xf32> to vector<1xf32>
    %637 = vector.shape_cast %636 : vector<1xf32> to vector<1x1xf32>
    %638 = vector.broadcast %637 : vector<1x1xf32> to vector<1x8xf32>
    %639 = arith.subf %635, %638 : vector<1x8xf32>
    %640 = math.exp %639 : vector<1x8xf32>
    %cst_138 = arith.constant dense<0.000000e+00> : vector<1xf32>
    %641 = vector.multi_reduction <add>, %640, %cst_138 [1] : vector<1x8xf32> to vector<1xf32>
    %642 = vector.shape_cast %641 : vector<1xf32> to vector<1x1xf32>
    %643 = vector.broadcast %642 : vector<1x1xf32> to vector<1x8xf32>
    %644 = arith.divf %640, %643 : vector<1x8xf32>
    %645 = vector.extract_strided_slice %611 {offsets = [0, 8], sizes = [8, 8], strides = [1, 1]} : vector<8x32xf32> to vector<8x8xf32>
    %646 = arith.truncf %644 : vector<1x8xf32> to vector<1x8xbf16>
    %647 = arith.truncf %645 : vector<8x8xf32> to vector<8x8xbf16>
    %cst_139 = arith.constant dense<0.000000e+00> : vector<1x8xf32>
    %648 = tpu.matmul %646, %647, %cst_139 {dimension_numbers = #tpu.dot_dimension_numbers<[1], [0], [0], [1], [0, 0, 1, 1], [], []>} : vector<1x8xbf16>, vector<8x8xbf16>, vector<1x8xf32> -> vector<1x8xf32>
    %649 = vector.extract_strided_slice %612 {offsets = [0, 16], sizes = [1, 8], strides = [1, 1]} : vector<1x32xf32> to vector<1x8xf32>
    %650 = vector.extract_strided_slice %607 {offsets = [0, 16], sizes = [8, 8], strides = [1, 1]} : vector<8x32xf32> to vector<8x8xf32>
    %651 = arith.truncf %649 : vector<1x8xf32> to vector<1x8xbf16>
    %652 = arith.truncf %650 : vector<8x8xf32> to vector<8x8xbf16>
    %cst_140 = arith.constant dense<0.000000e+00> : vector<1x8xf32>
    %653 = tpu.matmul %651, %652, %cst_140 {dimension_numbers = #tpu.dot_dimension_numbers<[1], [1], [0], [0], [0, 0, 1, 0], [], []>} : vector<1x8xbf16>, vector<8x8xbf16>, vector<1x8xf32> -> vector<1x8xf32>
    %cst_141 = arith.constant dense<0xFF800000> : vector<1xf32>
    %654 = vector.multi_reduction <maximumf>, %653, %cst_141 [1] : vector<1x8xf32> to vector<1xf32>
    %655 = vector.shape_cast %654 : vector<1xf32> to vector<1x1xf32>
    %656 = vector.broadcast %655 : vector<1x1xf32> to vector<1x8xf32>
    %657 = arith.subf %653, %656 : vector<1x8xf32>
    %658 = math.exp %657 : vector<1x8xf32>
    %cst_142 = arith.constant dense<0.000000e+00> : vector<1xf32>
    %659 = vector.multi_reduction <add>, %658, %cst_142 [1] : vector<1x8xf32> to vector<1xf32>
    %660 = vector.shape_cast %659 : vector<1xf32> to vector<1x1xf32>
    %661 = vector.broadcast %660 : vector<1x1xf32> to vector<1x8xf32>
    %662 = arith.divf %658, %661 : vector<1x8xf32>
    %663 = vector.extract_strided_slice %611 {offsets = [0, 16], sizes = [8, 8], strides = [1, 1]} : vector<8x32xf32> to vector<8x8xf32>
    %664 = arith.truncf %662 : vector<1x8xf32> to vector<1x8xbf16>
    %665 = arith.truncf %663 : vector<8x8xf32> to vector<8x8xbf16>
    %cst_143 = arith.constant dense<0.000000e+00> : vector<1x8xf32>
    %666 = tpu.matmul %664, %665, %cst_143 {dimension_numbers = #tpu.dot_dimension_numbers<[1], [0], [0], [1], [0, 0, 1, 1], [], []>} : vector<1x8xbf16>, vector<8x8xbf16>, vector<1x8xf32> -> vector<1x8xf32>
    %667 = vector.extract_strided_slice %612 {offsets = [0, 24], sizes = [1, 8], strides = [1, 1]} : vector<1x32xf32> to vector<1x8xf32>
    %668 = vector.extract_strided_slice %607 {offsets = [0, 24], sizes = [8, 8], strides = [1, 1]} : vector<8x32xf32> to vector<8x8xf32>
    %669 = arith.truncf %667 : vector<1x8xf32> to vector<1x8xbf16>
    %670 = arith.truncf %668 : vector<8x8xf32> to vector<8x8xbf16>
    %cst_144 = arith.constant dense<0.000000e+00> : vector<1x8xf32>
    %671 = tpu.matmul %669, %670, %cst_144 {dimension_numbers = #tpu.dot_dimension_numbers<[1], [1], [0], [0], [0, 0, 1, 0], [], []>} : vector<1x8xbf16>, vector<8x8xbf16>, vector<1x8xf32> -> vector<1x8xf32>
    %cst_145 = arith.constant dense<0xFF800000> : vector<1xf32>
    %672 = vector.multi_reduction <maximumf>, %671, %cst_145 [1] : vector<1x8xf32> to vector<1xf32>
    %673 = vector.shape_cast %672 : vector<1xf32> to vector<1x1xf32>
    %674 = vector.broadcast %673 : vector<1x1xf32> to vector<1x8xf32>
    %675 = arith.subf %671, %674 : vector<1x8xf32>
    %676 = math.exp %675 : vector<1x8xf32>
    %cst_146 = arith.constant dense<0.000000e+00> : vector<1xf32>
    %677 = vector.multi_reduction <add>, %676, %cst_146 [1] : vector<1x8xf32> to vector<1xf32>
    %678 = vector.shape_cast %677 : vector<1xf32> to vector<1x1xf32>
    %679 = vector.broadcast %678 : vector<1x1xf32> to vector<1x8xf32>
    %680 = arith.divf %676, %679 : vector<1x8xf32>
    %681 = vector.extract_strided_slice %611 {offsets = [0, 24], sizes = [8, 8], strides = [1, 1]} : vector<8x32xf32> to vector<8x8xf32>
    %682 = arith.truncf %680 : vector<1x8xf32> to vector<1x8xbf16>
    %683 = arith.truncf %681 : vector<8x8xf32> to vector<8x8xbf16>
    %cst_147 = arith.constant dense<0.000000e+00> : vector<1x8xf32>
    %684 = tpu.matmul %682, %683, %cst_147 {dimension_numbers = #tpu.dot_dimension_numbers<[1], [0], [0], [1], [0, 0, 1, 1], [], []>} : vector<1x8xbf16>, vector<8x8xbf16>, vector<1x8xf32> -> vector<1x8xf32>
    %685 = tpu.concatenate %630, %648, %666, %684 in 1 : vector<1x8xf32>, vector<1x8xf32>, vector<1x8xf32>, vector<1x8xf32> -> vector<1x32xf32>
    %686 = tpu.concatenate %594, %685 in 0 : vector<1x32xf32>, vector<1x32xf32> -> vector<2x32xf32>
    %687 = arith.truncf %686 : vector<2x32xf32> to vector<2x32xbf16>
    %cst_148 = arith.constant dense<0.000000e+00> : vector<2x32xf32>
    %688 = tpu.matmul %687, %12, %cst_148 {dimension_numbers = #tpu.dot_dimension_numbers<[1], [0], [0], [1], [0, 0, 1, 1], [], []>} : vector<2x32xbf16>, vector<32x32xbf16>, vector<2x32xf32> -> vector<2x32xf32>
    %689 = vector.broadcast %13 : vector<1x32xf32> to vector<2x32xf32>
    %690 = arith.addf %688, %689 : vector<2x32xf32>
    %691 = arith.truncf %690 : vector<2x32xf32> to vector<2x32xbf16>
    %cst_149 = arith.constant dense<0.000000e+00> : vector<2x16xf32>
    %692 = tpu.matmul %691, %14, %cst_149 {dimension_numbers = #tpu.dot_dimension_numbers<[1], [0], [0], [1], [0, 0, 1, 1], [], []>} : vector<2x32xbf16>, vector<32x16xbf16>, vector<2x16xf32> -> vector<2x16xf32>
    %693 = vector.broadcast %15 : vector<1x16xf32> to vector<2x16xf32>
    %694 = arith.addf %692, %693 : vector<2x16xf32>
    %cst_150 = arith.constant 0.000000e+00 : f32
    %695 = vector.broadcast %cst_150 : f32 to vector<2x16xf32>
    %696 = arith.maximumf %694, %695 : vector<2x16xf32>
    %697 = arith.truncf %696 : vector<2x16xf32> to vector<2x16xbf16>
    %cst_151 = arith.constant dense<0.000000e+00> : vector<2x128xf32>
    %698 = tpu.matmul %697, %16, %cst_151 {dimension_numbers = #tpu.dot_dimension_numbers<[1], [0], [0], [1], [0, 0, 1, 1], [], []>} : vector<2x16xbf16>, vector<16x128xbf16>, vector<2x128xf32> -> vector<2x128xf32>
    %699 = vector.broadcast %17 : vector<1x128xf32> to vector<2x128xf32>
    %700 = arith.addf %698, %699 : vector<2x128xf32>
    %701 = arith.negf %700 : vector<2x128xf32>
    %702 = math.exp %701 : vector<2x128xf32>
    %cst_152 = arith.constant 1.000000e+00 : f32
    %703 = vector.broadcast %cst_152 : f32 to vector<2x128xf32>
    %704 = arith.addf %703, %702 : vector<2x128xf32>
    %705 = arith.divf %703, %704 : vector<2x128xf32>
    %706 = arith.truncf %705 : vector<2x128xf32> to vector<2x128xbf16>
    %cst_153 = arith.constant dense<0.000000e+00> : vector<2x128xf32>
    %707 = tpu.matmul %706, %18, %cst_153 {dimension_numbers = #tpu.dot_dimension_numbers<[1], [0], [0], [1], [0, 0, 1, 1], [], []>} : vector<2x128xbf16>, vector<128x128xbf16>, vector<2x128xf32> -> vector<2x128xf32>
    %708 = vector.broadcast %19 : vector<1x128xf32> to vector<2x128xf32>
    %709 = arith.addf %707, %708 : vector<2x128xf32>
    %c0_154 = arith.constant 0 : index
    %c0_155 = arith.constant 0 : index
    %710 = vector.load %arg21[%c0_154, %c0_155] : memref<2x128xf32, #tpu.memory_space<vmem>>, vector<2x128xf32>
    tpu.vector_store %arg21[%c0_154, %c0_155], %709 {strides = array<i32>} : memref<2x128xf32, #tpu.memory_space<vmem>>, vector<2x128xf32>,
    return
  }
}

</mosaic_0001>

<bundles_post_ra>
// kernel: tpu_custom_call.1
= control target key start
LH: loop header
LB: loop body
LE: loop exit
PB: predicated region body
PF: predicated region fallthrough
CT: control target
= control target key end

     0   :  { %s5017_s0 = inlined_call_operand.vmem [shape: f32[16,16], index: 0, kind: input, shape index: {}]   ;;  %s5018_s1 = inlined_call_operand.vmem [shape: bf16[16,128], index: 1, kind: input, shape index: {}]   ;;  %s5019_s2 = inlined_call_operand.hbm [shape: bf16[32,128], index: 2, kind: input, shape index: {}]   ;;  %s5020_s3 = inlined_call_operand.vmem [shape: f32[1,128], index: 3, kind: input, shape index: {}]   ;;  %s5021_s4 = inlined_call_operand.hbm [shape: bf16[32,128], index: 4, kind: input, shape index: {}]   ;;  %s5022_s5 = inlined_call_operand.hbm [shape: bf16[32,128], index: 5, kind: input, shape index: {}]   ;;  %s5023_s6 = inlined_call_operand.vmem [shape: f32[1,128], index: 6, kind: input, shape index: {}]   ;;  %s5024_s7 = inlined_call_operand.hbm [shape: bf16[32,32], index: 7, kind: input, shape index: {}]   ;;  %s5025_s8 = inlined_call_operand.vmem [shape: f32[1,32], index: 8, kind: input, shape index: {}]   ;;  %s5026_s9 = inlined_call_operand.hbm [shape: bf16[32,32], index: 9, kind: input, shape index: {}]   ;;  %s5027_s10 = inlined_call_operand.vmem [shape: f32[1,32], index: 10, kind: input, shape index: {}]   ;;  %s5028_s11 = inlined_call_operand.hbm [shape: bf16[32,32], index: 11, kind: input, shape index: {}]   ;;  %s5029_s12 = inlined_call_operand.vmem [shape: f32[1,32], index: 12, kind: input, shape index: {}]   ;;  %s5030_s13 = inlined_call_operand.hbm [shape: bf16[32,32], index: 13, kind: input, shape index: {}]   ;;  %s5031_s14 = inlined_call_operand.vmem [shape: f32[1,32], index: 14, kind: input, shape index: {}]   ;;  %s5032_s15 = inlined_call_operand.vmem [shape: bf16[32,16], index: 15, kind: input, shape index: {}]   ;;  %s5033_s16 = inlined_call_operand.vmem [shape: f32[1,16], index: 16, kind: input, shape index: {}]   ;;  %s5034_s17 = inlined_call_operand.hbm [shape: bf16[16,128], index: 17, kind: input, shape index: {}]   ;;  %s5035_s18 = inlined_call_operand.hbm [shape: f32[1,128], index: 18, kind: input, shape index: {}]   ;;  %s5036_s19 = inlined_call_operand.vmem [shape: bf16[128,128], index: 19, kind: input, shape index: {}]   ;;  %s5037_s20 = inlined_call_operand.vmem [shape: f32[1,128], index: 20, kind: input, shape index: {}]   ;;  %s5038_s21 = inlined_call_operand.hbm [shape: f32[2,128], index: 21, kind: output, shape index: {}]  }
   0x1   :  { %5044 = sst [smem:[#allocation24_spill]] %s5017_s0 }
   0x2   :  { %5045 = sst [smem:[#allocation25_spill]] %s5018_s1 }
   0x3   :  { %5046 = sst [smem:[#allocation26_spill]] %s5019_s2 }
   0x4   :  { %5047 = sst [smem:[#allocation27_spill]] %s5020_s3 }
   0x5   :  { %5048 = sst [smem:[#allocation28_spill]] %s5021_s4 }
   0x6   :  { %5049 = sst [smem:[#allocation29_spill]] %s5022_s5 }
   0x7   :  { %5050 = sst [smem:[#allocation30_spill]] %s5038_s21 }
   0x8   :  { %26 = vsyncpa [#allocation3], 0 }
   0x9   :  { %27 = vsyncpa [#allocation6], 0 }
   0xa   :  { %28 = vsyncpa [#allocation9], 0 }
   0xb   :  { %29 = vsyncpa [#allocation12], 0 }
   0xc   :  { %30 = vsyncpa [#allocation15], 0 }
   0xd   :  { %31 = vsyncpa [#allocation4], 0  ;;  %s4173_s2 = smov [#allocation5]   ;;  %s4174_s26 = smov [#allocation8]  }
   0xe   :  { %s55_s25 = sshll.u32 %s4173_s2, 4  ;;  %s81_s27 = sshll.u32 %s4174_s26, 4  ;;  %s56_s25 = int_to_ptr.vmem [resolvable:$true] %s55_s25  ;;  %s4305_s27 = int_to_ptr.vmem [resolvable:$true] %s81_s27 }
   0xf   :  { %s5051_s29 = sld [smem:[#allocation28_spill]] }
  0x15   :  { %s3941_s0 = scalar_lea.hbm %s5051_s29, 256 }
  0x16   :  { %p3942_p0 = scmp.ne.s32.totalorder %s5051_s29, %s3941_s0  ;;  %p3945_p1 = scmp.lt.u32.totalorder %s3941_s0, %s5051_s29 }
  0x18   :  { %p3947_p2 = pnand %p3945_p1, %p3942_p0 }
  0x1a   :  { %3950 = shalt.err (!%p3947_p2)
}
  0x1b   :  { %s3951_s23 = scalar_lea.vmem %s56_s25, 256  ;;  %p3956_p4 = scmp.lt.s32.totalorder %s56_s25, %s56_s25 }
  0x1c   :  { %p3952_p3 = scmp.ne.s32.totalorder %s56_s25, %s3951_s23  ;;  %p3957_p5 = scmp.lt.s32.totalorder %s3951_s23, %s3951_s23 }
  0x1e   :  { %p3958_p6 = por %p3957_p5, %p3956_p4 }
  0x20   :  { %p3959_p7 = pnand %p3958_p6, %p3952_p3 }
  0x22   :  { %3962 = shalt.err (!%p3959_p7)
}
  0x23   :  { %s4175_s1 = smov 64   ;;  %s4176_s24 = smov 4  }
  0x24   :  { %61 = dma.hbm_to_vmem [thread:$0]  %s5051_s29, 256, %s56_s25, [#allocation6], %s4175_s1, %s4175_s1, %s4176_s24  }
  0x25   :  { %s3963_s0 = scalar_lea.hbm %s5024_s7, 256 }
  0x26   :  { %p3964_p8 = scmp.ne.s32.totalorder %s5024_s7, %s3963_s0  ;;  %p3967_p9 = scmp.lt.u32.totalorder %s3963_s0, %s5024_s7 }
  0x28   :  { %p3969_p10 = pnand %p3967_p9, %p3964_p8 }
  0x2a   :  { %3972 = shalt.err (!%p3969_p10)
}
  0x2b   :  { %s3973_s23 = scalar_lea.vmem %s4305_s27, 256  ;;  %p3978_p12 = scmp.lt.s32.totalorder %s4305_s27, %s4305_s27 }
  0x2c   :  { %p3974_p11 = scmp.ne.s32.totalorder %s4305_s27, %s3973_s23  ;;  %p3979_p13 = scmp.lt.s32.totalorder %s3973_s23, %s3973_s23 }
  0x2e   :  { %p3980_p0 = por %p3979_p13, %p3978_p12 }
  0x30   :  { %p3981_p1 = pnand %p3980_p0, %p3974_p11 }
  0x32   :  { %3984 = shalt.err (!%p3981_p1)
}
  0x33   :  { %87 = dma.hbm_to_vmem [thread:$0]  %s5024_s7, 256, %s4305_s27, [#allocation9], %s4175_s1, %s4175_s1, %s4176_s24  }
  0x34   :  { %s4177_s2 = smov [#allocation11]   ;;  %s4178_s3 = smov [#allocation14]  }
  0x35   :  { %s109_s26 = sshll.u32 %s4177_s2, 4  ;;  %s141_s28 = sshll.u32 %s4178_s3, 4  ;;  %s110_s26 = int_to_ptr.vmem [resolvable:$true] %s109_s26  ;;  %s4342_s28 = int_to_ptr.vmem [resolvable:$true] %s141_s28 }
  0x36   :  { %s3985_s30 = scalar_lea.hbm %s5028_s11, 256 }
  0x37   :  { %p3986_p2 = scmp.ne.s32.totalorder %s5028_s11, %s3985_s30  ;;  %p3989_p3 = scmp.lt.u32.totalorder %s3985_s30, %s5028_s11 }
  0x39   :  { %p3991_p4 = pnand %p3989_p3, %p3986_p2 }
  0x3b   :  { %3994 = shalt.err (!%p3991_p4)
}
  0x3c   :  { %s3995_s7 = scalar_lea.vmem %s110_s26, 256  ;;  %p4000_p6 = scmp.lt.s32.totalorder %s110_s26, %s110_s26 }
  0x3d   :  { %p3996_p5 = scmp.ne.s32.totalorder %s110_s26, %s3995_s7  ;;  %p4001_p7 = scmp.lt.s32.totalorder %s3995_s7, %s3995_s7 }
  0x3f   :  { %p4002_p8 = por %p4001_p7, %p4000_p6 }
  0x41   :  { %p4003_p9 = pnand %p4002_p8, %p3996_p5 }
  0x43   :  { %4006 = shalt.err (!%p4003_p9)
}
  0x44   :  { %115 = dma.hbm_to_vmem [thread:$0]  %s5028_s11, 256, %s110_s26, [#allocation12], %s4175_s1, %s4175_s1, %s4176_s24  }
  0x45   :  { %s4007_s21 = scalar_lea.hbm %s5034_s17, 128 }
  0x46   :  { %p4008_p10 = scmp.ne.s32.totalorder %s5034_s17, %s4007_s21  ;;  %p4011_p11 = scmp.lt.u32.totalorder %s4007_s21, %s5034_s17 }
  0x48   :  { %p4013_p12 = pnand %p4011_p11, %p4008_p10 }
  0x4a   :  { %4016 = shalt.err (!%p4013_p12)
}
  0x4b   :  { %s4017_s5 = scalar_lea.vmem %s4342_s28, 128  ;;  %p4022_p0 = scmp.lt.s32.totalorder %s4342_s28, %s4342_s28 }
  0x4c   :  { %p4018_p13 = scmp.ne.s32.totalorder %s4342_s28, %s4017_s5  ;;  %p4023_p1 = scmp.lt.s32.totalorder %s4017_s5, %s4017_s5 }
  0x4e   :  { %p4024_p2 = por %p4023_p1, %p4022_p0 }
  0x50   :  { %p4025_p3 = pnand %p4024_p2, %p4018_p13 }
  0x52   :  { %4028 = shalt.err (!%p4025_p3)
}
  0x53   :  { %147 = dma.hbm_to_vmem [thread:$0]  %s5034_s17, 128, %s4342_s28, [#allocation15], %s4175_s1, %s4175_s1, %s4176_s24  }
  0x54   :  { %s4179_s22 = smov [#allocation2]   ;;  %s4180_s7 = smov [#allocation7]  }
  0x55   :  { %s41_s23 = sshll.u32 %s4179_s22, 4  ;;  %s67_s27 = sshll.u32 %s4180_s7, 4  ;;  %s42_s23 = int_to_ptr.vmem [resolvable:$true] %s41_s23  ;;  %s4379_s27 = int_to_ptr.vmem [resolvable:$true] %s67_s27 }
  0x56   :  { %s5052_s2 = sld [smem:[#allocation26_spill]] }
  0x5c   :  { %s4029_s21 = scalar_lea.hbm %s5052_s2, 256 }
  0x5d   :  { %p4030_p4 = scmp.ne.s32.totalorder %s5052_s2, %s4029_s21  ;;  %p4033_p5 = scmp.lt.u32.totalorder %s4029_s21, %s5052_s2 }
  0x5f   :  { %p4035_p6 = pnand %p4033_p5, %p4030_p4 }
  0x61   :  { %4038 = shalt.err (!%p4035_p6)
}
  0x62   :  { %s4039_s17 = scalar_lea.vmem %s42_s23, 256  ;;  %p4044_p8 = scmp.lt.s32.totalorder %s42_s23, %s42_s23 }
  0x63   :  { %p4040_p7 = scmp.ne.s32.totalorder %s42_s23, %s4039_s17  ;;  %p4045_p9 = scmp.lt.s32.totalorder %s4039_s17, %s4039_s17 }
  0x65   :  { %p4046_p10 = por %p4045_p9, %p4044_p8 }
  0x67   :  { %p4047_p11 = pnand %p4046_p10, %p4040_p7 }
  0x69   :  { %4050 = shalt.err (!%p4047_p11)
}
  0x6a   :  { %47 = dma.hbm_to_vmem [thread:$0]  %s5052_s2, 256, %s42_s23, [#allocation3], %s4175_s1, %s4175_s1, %s4176_s24  }
  0x6b   :  { %s5053_s22 = sld [smem:[#allocation29_spill]] }
  0x71   :  { %s4051_s7 = scalar_lea.hbm %s5053_s22, 256 }
  0x72   :  { %p4052_p12 = scmp.ne.s32.totalorder %s5053_s22, %s4051_s7  ;;  %p4055_p13 = scmp.lt.u32.totalorder %s4051_s7, %s5053_s22 }
  0x74   :  { %p4057_p0 = pnand %p4055_p13, %p4052_p12 }
  0x76   :  { %4060 = shalt.err (!%p4057_p0)
}
  0x77   :  { %s4061_s0 = scalar_lea.vmem %s4379_s27, 256  ;;  %p4066_p2 = scmp.lt.s32.totalorder %s4379_s27, %s4379_s27 }
  0x78   :  { %p4062_p1 = scmp.ne.s32.totalorder %s4379_s27, %s4061_s0  ;;  %p4067_p3 = scmp.lt.s32.totalorder %s4061_s0, %s4061_s0 }
  0x7a   :  { %p4068_p4 = por %p4067_p3, %p4066_p2 }
  0x7c   :  { %p4069_p5 = pnand %p4068_p4, %p4062_p1 }
  0x7e   :  { %4072 = shalt.err (!%p4069_p5)
}
  0x7f   :  { %73 = dma.hbm_to_vmem [thread:$0]  %s5053_s22, 256, %s4379_s27, [#allocation6], %s4175_s1, %s4175_s1, %s4176_s24  }
  0x80   :  { %s4181_s4 = smov [#allocation10]   ;;  %s4182_s17 = smov [#allocation13]  }
  0x81   :  { %s95_s30 = sshll.u32 %s4181_s4, 4  ;;  %s123_s28 = sshll.u32 %s4182_s17, 4  ;;  %s96_s30 = int_to_ptr.vmem [resolvable:$true] %s95_s30  ;;  %s4416_s28 = int_to_ptr.vmem [resolvable:$true] %s123_s28 }
  0x82   :  { %s4073_s26 = scalar_lea.hbm %s5026_s9, 256 }
  0x83   :  { %p4074_p6 = scmp.ne.s32.totalorder %s5026_s9, %s4073_s26  ;;  %p4077_p7 = scmp.lt.u32.totalorder %s4073_s26, %s5026_s9 }
  0x85   :  { %p4079_p8 = pnand %p4077_p7, %p4074_p6 }
  0x87   :  { %4082 = shalt.err (!%p4079_p8)
}
  0x88   :  { %s4083_s27 = scalar_lea.vmem %s96_s30, 256  ;;  %p4088_p10 = scmp.lt.s32.totalorder %s96_s30, %s96_s30 }
  0x89   :  { %p4084_p9 = scmp.ne.s32.totalorder %s96_s30, %s4083_s27  ;;  %p4089_p11 = scmp.lt.s32.totalorder %s4083_s27, %s4083_s27 }
  0x8b   :  { %p4090_p12 = por %p4089_p11, %p4088_p10 }
  0x8d   :  { %p4091_p13 = pnand %p4090_p12, %p4084_p9 }
  0x8f   :  { %4094 = shalt.err (!%p4091_p13)
}
  0x90   :  { %101 = dma.hbm_to_vmem [thread:$0]  %s5026_s9, 256, %s96_s30, [#allocation9], %s4175_s1, %s4175_s1, %s4176_s24  }
  0x91   :  { %s4095_s2 = scalar_lea.hbm %s5030_s13, 256 }
  0x92   :  { %p4096_p0 = scmp.ne.s32.totalorder %s5030_s13, %s4095_s2  ;;  %p4099_p1 = scmp.lt.u32.totalorder %s4095_s2, %s5030_s13 }
  0x94   :  { %p4101_p2 = pnand %p4099_p1, %p4096_p0 }
  0x96   :  { %4104 = shalt.err (!%p4101_p2)
}
  0x97   :  { %s4105_s26 = scalar_lea.vmem %s4416_s28, 256  ;;  %p4110_p4 = scmp.lt.s32.totalorder %s4416_s28, %s4416_s28 }
  0x98   :  { %p4106_p3 = scmp.ne.s32.totalorder %s4416_s28, %s4105_s26  ;;  %p4111_p5 = scmp.lt.s32.totalorder %s4105_s26, %s4105_s26 }
  0x9a   :  { %p4112_p6 = por %p4111_p5, %p4110_p4 }
  0x9c   :  { %p4113_p7 = pnand %p4112_p6, %p4106_p3 }
  0x9e   :  { %4116 = shalt.err (!%p4113_p7)
}
  0x9f   :  { %129 = dma.hbm_to_vmem [thread:$0]  %s5030_s13, 256, %s4416_s28, [#allocation12], %s4175_s1, %s4175_s1, %s4176_s24  }
  0xa0   :  { %s4183_s7 = smov [#allocation16]   ;;  %s4117_s27 = scalar_lea.hbm %s5035_s18, 16 }
  0xa1   :  { %s154_s25 = sshll.u32 %s4183_s7, 4  ;;  %p4118_p8 = scmp.ne.s32.totalorder %s5035_s18, %s4117_s27  ;;  %s155_s25 = int_to_ptr.vmem [resolvable:$true] %s154_s25 }
  0xa2   :  { %p4121_p9 = scmp.lt.u32.totalorder %s4117_s27, %s5035_s18 }
  0xa4   :  { %p4123_p10 = pnand %p4121_p9, %p4118_p8 }
  0xa6   :  { %4126 = shalt.err (!%p4123_p10)
}
  0xa7   :  { %s4127_s2 = scalar_lea.vmem %s155_s25, 16  ;;  %s4131_s13 = scalar_lea.vmem %s155_s25, 32 }
  0xa8   :  { %p4128_p11 = scmp.ne.s32.totalorder %s155_s25, %s4127_s2  ;;  %p4132_p12 = scmp.lt.s32.totalorder %s155_s25, %s155_s25 }
  0xa9   :  { %p4133_p13 = scmp.lt.s32.totalorder %s4131_s13, %s4127_s2 }
  0xab   :  { %p4134_p0 = por %p4133_p13, %p4132_p12 }
  0xad   :  { %p4135_p1 = pnand %p4134_p0, %p4128_p11 }
  0xaf   :  { %4138 = shalt.err (!%p4135_p1)
}
  0xb0   :  { %157 = dma.hbm_to_vmem [thread:$0]  %s5035_s18, 16, %s155_s25, [#allocation15]  }
  0xb1   :  { %4161 = dma.done.wait [#allocation3], 256  }
  0xb2   :  { %4162 = vsyncadd [#allocation3], 4294967040 }
  0xb3   :  { %4163 = dma.done.wait [#allocation6], 512  }
  0xb4   :  { %4164 = vsyncadd [#allocation6], 4294966784 }
  0xb5   :  { %4165 = dma.done.wait [#allocation9], 512  }
  0xb6   :  { %4166 = vsyncadd [#allocation9], 4294966784 }
  0xb7   :  { %4167 = dma.done.wait [#allocation12], 512  }
  0xb8   :  { %4168 = vsyncadd [#allocation12], 4294966784 }
  0xb9   :  { %4169 = dma.done.wait [#allocation15], 144  }
  0xba   :  { %4170 = vsyncadd [#allocation15], 4294967152  ;;  %v4184_v0 = vmov 0.0   ;;  %vm4185_vm0 = vmmov 0   ;;  %s5054_s17 = sld [smem:[#allocation25_spill]]  ;;  %s5055_s26 = sld [smem:[#allocation24_spill]] }
  0xbb   :  { %3399 = vmatprep.subr.bf16.mxu1 %v4184_v0  ;;  %3401 = vmatprep.mubr.msk.bf16.mxu1 %vm4185_vm0, %v4184_v0  ;;  %vm266_vm1 = vcmask 130048   ;;  %v4480_v5 = vld [vmem:[#allocation2] sm:$0xff]   ;;  %v4483_v6 = vld [vmem:[#allocation2 + $0x8] sm:$0xff]   ;;  %v4186_v7 = vmov 0   ;;  %s5056_s29 = sld [smem:[#allocation27_spill]]  ;;  %s4187_s21 = smov 32  }
  0xbc   :  { %3429 = vmatprep.subr.bf16.mxu0 %v4184_v0  ;;  %3433 = vmatprep.mubr.msk.bf16.mxu0 %vm4185_vm0, %v4184_v0  ;;  %vm323_vm2 = vcmask 261120   ;;  %vm940_vm3 = vcmask 1041408   ;;  %vm942_vm4 = vcmask 1043456   ;;  %vm944_vm5 = vcmask 1045504   ;;  %s4189_s2 = smov 112   ;;  %s4191_s13 = smov 8  }
  0xbd   :  { %3430 = vmatpush3.bf16.msra.mxu0 %v4480_v5  ;;  %vm1728_vm6 = vcmask 1040384   ;;  %vm1731_vm7 = vcmask 1042432   ;;  %vm1734_vm8 = vcmask 1044480   ;;  %vm1737_vm9 = vcmask 1046528   ;;  %s4192_s18 = smov 16   ;;  %s4193_s4 = smov 24  }
  0xbe   :  { %3431 = vmatprep.subr.bf16.mxu0 %v4184_v0  ;;  %vm1864_vm10 = vcmask 64512   ;;  %vm1911_vm11 = vcmask 57344   ;;  %vm2318_vm12 = vcmask 195584  }
  0xc0   :  { %v3751_v1 = vld [vmem:[%s5054_s17] sm:$0xff]   ;;  %v252_v3 = vld [vmem:[%s5055_s26 + $0x8] sm:$0xff] }
  0xc1   :  { %v251_v2 = vld [vmem:[%s5055_s26] sm:$0xff]  ;;  %3400 = vmatpush3.bf16.msra.mxu1 %v3751_v1  ;;  %3432 = vmatpush3.bf16.msra.mxu0 %v4483_v6 }
  0xc2   :  { %v253_v4 = vpack.c.bf16 %v252_v3, %v251_v2  ;;  %3405 = vmatprep.subr.bf16.mxu1 %v4184_v0  ;;  %3445 = vmatprep.subr.bf16.mxu0 %v4184_v0  ;;  %v3190_v10 = vld [vmem:[%s5056_s29] ss:$0 sm:$0xff] }
  0xc4   :  { %3402 = vmatmul.mubr.msk.bf16.vlgmr.msra.gmra.mrb[0].mxu1 %vm266_vm1, %v253_v4 }
  0xc5   :  { %3406 = vmatpush3.bf16.msra.mxu1 %v4480_v5  ;;  %3409 = vmatprep.mubr.msk.bf16.mxu1 %vm4185_vm0, %v4184_v0 }
  0xc6   :  { %3407 = vmatprep.subr.bf16.mxu1 %v4184_v0 }
  0xc9   :  { %3408 = vmatpush3.bf16.msra.mxu1 %v4483_v6 }
  0xca   :  { %3413 = vmatprep.subr.bf16.mxu1 %v4184_v0 }
  0xcc   :  { %3410 = vmatmul.mubr.bf16.vlgmr.msra.gmra.mrb[4].mxu1 %v4186_v7 }
  0xcd   :  { %3414 = vmatpush3.bf16.msra.mxu1 %v4480_v5  ;;  %3417 = vmatprep.mubr.msk.bf16.mxu1 %vm4185_vm0, %v4184_v0 }
  0xce   :  { %3415 = vmatprep.subr.bf16.mxu1 %v4184_v0 }
  0xd1   :  { %3416 = vmatpush3.bf16.msra.mxu1 %v4483_v6 }
  0xd2   :  { %3421 = vmatprep.subr.bf16.mxu1 %v4184_v0 }
 0x197   :  { %v304_v8 = vpop.f32.mrb[0].mxu1 }
 0x198   :  { %v3403_v9 = vpop.f32.mrb[1].mxu1  ;;  %v4508_v14 = vadd.f32 %v3190_v10, %v304_v8 }
 0x199   :  { %v307_v11 = vpop.f32.mrb[2].mxu1 }
 0x19a   :  { %v4506_v12 = vadd.f32 %v3190_v10, %v307_v11  ;;  %v3404_v13 = vpop.f32.mrb[3].mxu1 }
 0x19f   :  { %v361_v15 = vpop.f32.mrb[4].mxu1 }
 0x1a0   :  { %v367_v16 = vadd.f32 %v361_v15, %v4508_v14  ;;  %v3411_v17 = vpop.f32.mrb[5].mxu1 }
 0x1a1   :  { %v364_v18 = vpop.f32.mrb[6].mxu1 }
 0x1a2   :  { %v3412_v19 = vpop.f32.mrb[7].mxu1  ;;  %3777 = vtanh.f32 %v367_v16  ;;  %v3195_v21 = vmul.f32 -1.442695, %v367_v16 }
 0x1a4   :  { %3779 = vpow2.f32 %v3195_v21 }
 0x1ac   :  { %v3778_v20 = vpop.eup %3777 }
 0x1ad   :  { %377 = vrot.lane.b32.xlu0 %v3778_v20, %s4175_s1 }
 0x1ae   :  { %v3780_v22 = vpop.eup %3779 }
 0x1af   :  { %v371_v23 = vadd.f32 1.0, %v3780_v22 }
 0x1b1   :  { %3781 = vrcp.f32 %v371_v23 }
 0x1bb   :  { %v3782_v24 = vpop.eup %3781 }
 0x1bc   :  { %v375_v27 = vmul.f32 0.0, %v3782_v24 }
 0x21f   :  { %v378_v25 = vpop.permute.xlu0 %377 }
 0x220   :  { %v380_v26 = vmul.f32 %v3782_v24, %v378_v25 }
 0x222   :  { %382 = vrot.lane.b32.xlu0 %v380_v26, %s4187_s21 }
 0x294   :  { %v383_v28 = vpop.permute.xlu0 %382 }
 0x295   :  { %v385_v29 = vadd.f32 %v383_v28, %v375_v27 }
 0x297   :  { %3783 = vtanh.f32 %v385_v29  ;;  %v451_v48 = vrot.slane %v385_v29, 6 }
 0x2a1   :  { %v3784_v30 = vpop.eup %3783 }
 0x2a2   :  { %388 = vrot.lane.b32.xlu1 %v3784_v30, %s4175_s1 }
 0x314   :  { %v389_v31 = vpop.permute.xlu1 %388 }
 0x315   :  { %v4514_v32 = vmul.f32 %v3782_v24, %v389_v31 }
 0x317   :  { %v392_v33 = vpack.c.bf16 %v4514_v32, %v4514_v32 }
 0x319   :  { %394 = vrot.lane.b32.xlu1 %v392_v33, %s4187_s21 }
 0x38b   :  { %v395_v34 = vpop.permute.xlu1 %394 }
 0x38c   :  { %3418 = vmatmul.mubr.msk.bf16.vlgmr.msra.gmra.mrb[8].mxu1 %vm323_vm2, %v395_v34 }
 0x38d   :  { %3422 = vmatpush3.bf16.msra.mxu1 %v4480_v5  ;;  %3425 = vmatprep.mubr.msk.bf16.mxu1 %vm4185_vm0, %v4184_v0 }
 0x38e   :  { %3423 = vmatprep.subr.bf16.mxu1 %v4184_v0 }
 0x391   :  { %3424 = vmatpush3.bf16.msra.mxu1 %v4483_v6 }
 0x392   :  { %3437 = vmatprep.subr.bf16.mxu1 %v4184_v0 }
 0x45f   :  { %v433_v35 = vpop.f32.mrb[8].mxu1 }
 0x460   :  { %v440_v36 = vrot.slane %v433_v35, 6  ;;  %v3419_v37 = vpop.f32.mrb[9].mxu1 }
 0x461   :  { %v436_v38 = vpop.f32.mrb[10].mxu1 }
 0x462   :  { %v442_v39 = vadd.f32 %v440_v36, %v4508_v14  ;;  %v3420_v40 = vpop.f32.mrb[11].mxu1 }
 0x464   :  { %3785 = vtanh.f32 %v442_v39  ;;  %v3197_v42 = vmul.f32 -1.442695, %v442_v39 }
 0x466   :  { %3787 = vpow2.f32 %v3197_v42 }
 0x46e   :  { %v3786_v41 = vpop.eup %3785 }
 0x46f   :  { %455 = vrot.lane.b32.xlu0 %v3786_v41, %s4175_s1 }
 0x470   :  { %v3788_v43 = vpop.eup %3787 }
 0x471   :  { %v446_v44 = vadd.f32 1.0, %v3788_v43 }
 0x473   :  { %3789 = vrcp.f32 %v446_v44 }
 0x47d   :  { %v3790_v45 = vpop.eup %3789 }
 0x47e   :  { %v453_v49 = vmul.f32 %v3790_v45, %v451_v48 }
 0x4e1   :  { %v456_v46 = vpop.permute.xlu0 %455 }
 0x4e2   :  { %v458_v47 = vmul.f32 %v3790_v45, %v456_v46 }
 0x4e4   :  { %460 = vrot.lane.b32.xlu1 %v458_v47, %s4187_s21 }
 0x556   :  { %v461_v50 = vpop.permute.xlu1 %460 }
 0x557   :  { %v463_v51 = vadd.f32 %v461_v50, %v453_v49 }
 0x559   :  { %3791 = vtanh.f32 %v463_v51  ;;  %v530_v11 = vrot.slane %v463_v51, 6 }
 0x563   :  { %v3792_v52 = vpop.eup %3791 }
 0x564   :  { %466 = vrot.lane.b32.xlu0 %v3792_v52, %s4175_s1 }
 0x5d6   :  { %v467_v53 = vpop.permute.xlu0 %466 }
 0x5d7   :  { %v469_v54 = vmul.f32 %v3790_v45, %v467_v53 }
 0x5d9   :  { %v470_v55 = vpack.c.bf16 %v469_v54, %v469_v54  ;;  %v941_v20 = vsel %vm940_vm3, %v4514_v32, %v469_v54 }
 0x5db   :  { %v472_v56 = vrot.slane %v470_v55, 1 }
 0x5dd   :  { %473 = vrot.lane.b32.xlu1 %v472_v56, %s4187_s21 }
 0x64f   :  { %v474_v57 = vpop.permute.xlu1 %473 }
 0x650   :  { %3426 = vmatmul.mubr.msk.bf16.vlgmr.msra.gmra.mrb[12].mxu1 %vm323_vm2, %v474_v57 }
 0x651   :  { %3438 = vmatpush3.bf16.msra.mxu1 %v4480_v5  ;;  %3441 = vmatprep.mubr.msk.bf16.mxu1 %vm4185_vm0, %v4184_v0 }
 0x652   :  { %3439 = vmatprep.subr.bf16.mxu1 %v4184_v0 }
 0x655   :  { %3440 = vmatpush3.bf16.msra.mxu1 %v4483_v6 }
 0x656   :  { %3453 = vmatprep.subr.bf16.mxu1 %v4184_v0 }
 0x723   :  { %v512_v58 = vpop.f32.mrb[12].mxu1 }
 0x724   :  { %v519_v59 = vrot.slane %v512_v58, 4  ;;  %v3427_v60 = vpop.f32.mrb[13].mxu1 }
 0x725   :  { %v515_v61 = vpop.f32.mrb[14].mxu1 }
 0x726   :  { %v521_v62 = vadd.f32 %v519_v59, %v4508_v14  ;;  %v3428_v63 = vpop.f32.mrb[15].mxu1 }
 0x728   :  { %3793 = vtanh.f32 %v521_v62  ;;  %v3199_v2 = vmul.f32 -1.442695, %v521_v62 }
 0x72a   :  { %3795 = vpow2.f32 %v3199_v2 }
 0x732   :  { %v3794_v1 = vpop.eup %3793 }
 0x733   :  { %534 = vrot.lane.b32.xlu0 %v3794_v1, %s4175_s1 }
 0x734   :  { %v3796_v3 = vpop.eup %3795 }
 0x735   :  { %v525_v4 = vadd.f32 1.0, %v3796_v3 }
 0x737   :  { %3797 = vrcp.f32 %v525_v4 }
 0x741   :  { %v3798_v8 = vpop.eup %3797 }
 0x742   :  { %v532_v13 = vmul.f32 %v3798_v8, %v530_v11 }
 0x7a5   :  { %v535_v9 = vpop.permute.xlu0 %534 }
 0x7a6   :  { %v537_v10 = vmul.f32 %v3798_v8, %v535_v9 }
 0x7a8   :  { %539 = vrot.lane.b32.xlu1 %v537_v10, %s4187_s21 }
 0x81a   :  { %v540_v15 = vpop.permute.xlu1 %539 }
 0x81b   :  { %v542_v16 = vadd.f32 %v540_v15, %v532_v13 }
 0x81d   :  { %3799 = vtanh.f32 %v542_v16  ;;  %v609_v38 = vrot.slane %v542_v16, 6 }
 0x827   :  { %v3800_v17 = vpop.eup %3799 }
 0x828   :  { %545 = vrot.lane.b32.xlu0 %v3800_v17, %s4175_s1 }
 0x89a   :  { %v546_v18 = vpop.permute.xlu0 %545 }
 0x89b   :  { %v548_v19 = vmul.f32 %v3798_v8, %v546_v18 }
 0x89d   :  { %v549_v21 = vpack.c.bf16 %v548_v19, %v548_v19  ;;  %v943_v22 = vsel %vm942_vm4, %v941_v20, %v548_v19 }
 0x89f   :  { %v551_v23 = vrot.slane %v549_v21, 2 }
 0x8a1   :  { %552 = vrot.lane.b32.xlu1 %v551_v23, %s4187_s21 }
 0x913   :  { %v553_v24 = vpop.permute.xlu1 %552 }
 0x914   :  { %3434 = vmatmul.mubr.msk.bf16.vlgmr.msra.gmra.mrb[0].mxu0 %vm323_vm2, %v553_v24 }
 0x915   :  { %3446 = vmatpush3.bf16.msra.mxu0 %v4480_v5  ;;  %3449 = vmatprep.mubr.msk.bf16.mxu0 %vm4185_vm0, %v4184_v0 }
 0x916   :  { %3447 = vmatprep.subr.bf16.mxu0 %v4184_v0 }
 0x919   :  { %3448 = vmatpush3.bf16.msra.mxu0 %v4483_v6 }
 0x91a   :  { %3461 = vmatprep.subr.bf16.mxu0 %v4184_v0 }
 0x9e7   :  { %v591_v25 = vpop.f32.mrb[0].mxu0 }
 0x9e8   :  { %v598_v26 = vrot.slane %v591_v25, 2  ;;  %v3435_v27 = vpop.f32.mrb[1].mxu0 }
 0x9e9   :  { %v594_v28 = vpop.f32.mrb[2].mxu0 }
 0x9ea   :  { %v600_v29 = vadd.f32 %v598_v26, %v4508_v14  ;;  %v3436_v30 = vpop.f32.mrb[3].mxu0 }
 0x9ec   :  { %3801 = vtanh.f32 %v600_v29  ;;  %v3201_v32 = vmul.f32 -1.442695, %v600_v29 }
 0x9ee   :  { %3803 = vpow2.f32 %v3201_v32 }
 0x9f6   :  { %v3802_v31 = vpop.eup %3801 }
 0x9f7   :  { %613 = vrot.lane.b32.xlu0 %v3802_v31, %s4175_s1 }
 0x9f8   :  { %v3804_v33 = vpop.eup %3803 }
 0x9f9   :  { %v604_v34 = vadd.f32 1.0, %v3804_v33 }
 0x9fb   :  { %3805 = vrcp.f32 %v604_v34 }
 0xa05   :  { %v3806_v35 = vpop.eup %3805 }
 0xa06   :  { %v611_v39 = vmul.f32 %v3806_v35, %v609_v38 }
 0xa69   :  { %v614_v36 = vpop.permute.xlu0 %613 }
 0xa6a   :  { %v616_v37 = vmul.f32 %v3806_v35, %v614_v36 }
 0xa6c   :  { %618 = vrot.lane.b32.xlu1 %v616_v37, %s4187_s21 }
 0xade   :  { %v619_v40 = vpop.permute.xlu1 %618 }
 0xadf   :  { %v621_v41 = vadd.f32 %v619_v40, %v611_v39 }
 0xae1   :  { %3807 = vtanh.f32 %v621_v41  ;;  %v685_v60 = vrot.slane %v621_v41, 6 }
 0xaeb   :  { %v3808_v14 = vpop.eup %3807 }
 0xaec   :  { %624 = vrot.lane.b32.xlu0 %v3808_v14, %s4175_s1 }
 0xb5e   :  { %v625_v42 = vpop.permute.xlu0 %624 }
 0xb5f   :  { %v627_v43 = vmul.f32 %v3806_v35, %v625_v42 }
 0xb61   :  { %v628_v44 = vpack.c.bf16 %v627_v43, %v627_v43  ;;  %v4558_v45 = vsel %vm944_vm5, %v943_v22, %v627_v43 }
 0xb63   :  { %v630_v46 = vrot.slane %v628_v44, 3 }
 0xb65   :  { %631 = vrot.lane.b32.xlu1 %v630_v46, %s4187_s21 }
 0xbd7   :  { %v632_v47 = vpop.permute.xlu1 %631 }
 0xbd8   :  { %3442 = vmatmul.mubr.msk.bf16.vlgmr.msra.gmra.mrb[16].mxu1 %vm323_vm2, %v632_v47 }
 0xbd9   :  { %3454 = vmatpush3.bf16.msra.mxu1 %v4480_v5  ;;  %3457 = vmatprep.mubr.msk.bf16.mxu1 %vm4185_vm0, %v4184_v0 }
 0xbda   :  { %3455 = vmatprep.subr.bf16.mxu1 %v4184_v0 }
 0xbdd   :  { %3456 = vmatpush3.bf16.msra.mxu1 %v4483_v6 }
 0xbde   :  { %3469 = vmatprep.subr.bf16.mxu1 %v4184_v0 }
 0xcab   :  { %v670_v48 = vpop.f32.mrb[16].mxu1 }
 0xcac   :  { %v676_v49 = vadd.f32 %v670_v48, %v4506_v12  ;;  %v3443_v50 = vpop.f32.mrb[17].mxu1 }
 0xcad   :  { %v673_v51 = vpop.f32.mrb[18].mxu1 }
 0xcae   :  { %3809 = vtanh.f32 %v676_v49  ;;  %v3444_v52 = vpop.f32.mrb[19].mxu1  ;;  %v3203_v54 = vmul.f32 -1.442695, %v676_v49 }
 0xcb0   :  { %3811 = vpow2.f32 %v3203_v54 }
 0xcb8   :  { %v3810_v53 = vpop.eup %3809 }
 0xcb9   :  { %689 = vrot.lane.b32.xlu0 %v3810_v53, %s4175_s1 }
 0xcba   :  { %v3812_v55 = vpop.eup %3811 }
 0xcbb   :  { %v680_v56 = vadd.f32 1.0, %v3812_v55 }
 0xcbd   :  { %3813 = vrcp.f32 %v680_v56 }
 0xcc7   :  { %v3814_v57 = vpop.eup %3813 }
 0xcc8   :  { %v687_v61 = vmul.f32 %v3814_v57, %v685_v60 }
 0xd2b   :  { %v690_v58 = vpop.permute.xlu0 %689 }
 0xd2c   :  { %v692_v59 = vmul.f32 %v3814_v57, %v690_v58 }
 0xd2e   :  { %694 = vrot.lane.b32.xlu1 %v692_v59, %s4187_s21 }
 0xda0   :  { %v695_v62 = vpop.permute.xlu1 %694 }
 0xda1   :  { %v697_v63 = vadd.f32 %v695_v62, %v687_v61 }
 0xda3   :  { %3815 = vtanh.f32 %v697_v63  ;;  %v763_v22 = vrot.slane %v697_v63, 6 }
 0xdad   :  { %v3816_v1 = vpop.eup %3815 }
 0xdae   :  { %700 = vrot.lane.b32.xlu0 %v3816_v1, %s4175_s1 }
 0xe20   :  { %v701_v2 = vpop.permute.xlu0 %700 }
 0xe21   :  { %v4572_v3 = vmul.f32 %v3814_v57, %v701_v2 }
 0xe23   :  { %v704_v4 = vpack.c.bf16 %v4572_v3, %v4572_v3 }
 0xe25   :  { %706 = vrot.lane.b32.xlu1 %v704_v4, %s4187_s21 }
 0xe97   :  { %v707_v8 = vpop.permute.xlu1 %706 }
 0xe98   :  { %3450 = vmatmul.mubr.msk.bf16.vlgmr.msra.gmra.mrb[4].mxu0 %vm323_vm2, %v707_v8 }
 0xe99   :  { %3462 = vmatpush3.bf16.msra.mxu0 %v4480_v5  ;;  %3465 = vmatprep.mubr.msk.bf16.mxu0 %vm4185_vm0, %v4184_v0 }
 0xe9a   :  { %3463 = vmatprep.subr.bf16.mxu0 %v4184_v0 }
 0xe9d   :  { %3464 = vmatpush3.bf16.msra.mxu0 %v4483_v6 }
 0xe9e   :  { %3477 = vmatprep.subr.bf16.mxu0 %v4184_v0 }
 0xf6b   :  { %v745_v9 = vpop.f32.mrb[4].mxu0 }
 0xf6c   :  { %v752_v10 = vrot.slane %v745_v9, 6  ;;  %v3451_v11 = vpop.f32.mrb[5].mxu0 }
 0xf6d   :  { %v748_v13 = vpop.f32.mrb[6].mxu0 }
 0xf6e   :  { %v754_v15 = vadd.f32 %v752_v10, %v4506_v12  ;;  %v3452_v16 = vpop.f32.mrb[7].mxu0 }
 0xf6f   :  { %v3755_v16 = vld [vmem:[#allocation5] sm:$0xff]  }
 0xf70   :  { %3817 = vtanh.f32 %v754_v15  ;;  %v3205_v5 = vmul.f32 -1.442695, %v754_v15 }
 0xf72   :  { %3819 = vpow2.f32 %v3205_v5  ;;  %v3757_v5 = vld [vmem:[#allocation5 + $0x8] sm:$0xff]  }
 0xf7a   :  { %v3818_v17 = vpop.eup %3817 }
 0xf7b   :  { %767 = vrot.lane.b32.xlu0 %v3818_v17, %s4175_s1  ;;  %v4609_v17 = vld [vmem:[#allocation7 + $0x8] sm:$0xff]  }
 0xf7c   :  { %v3820_v18 = vpop.eup %3819 }
 0xf7d   :  { %v758_v19 = vadd.f32 1.0, %v3820_v18 }
 0xf7f   :  { %3821 = vrcp.f32 %v758_v19 }
 0xf89   :  { %v3822_v20 = vpop.eup %3821 }
 0xf8a   :  { %v765_v23 = vmul.f32 %v3822_v20, %v763_v22 }
 0xfed   :  { %v768_v6 = vpop.permute.xlu0 %767 }
 0xfee   :  { %v770_v21 = vmul.f32 %v3822_v20, %v768_v6 }
 0xff0   :  { %772 = vrot.lane.b32.xlu1 %v770_v21, %s4187_s21 }
0x1062   :  { %v773_v24 = vpop.permute.xlu1 %772 }
0x1063   :  { %v775_v25 = vadd.f32 %v773_v24, %v765_v23 }
0x1065   :  { %3823 = vtanh.f32 %v775_v25  ;;  %v842_v44 = vrot.slane %v775_v25, 6 }
0x106f   :  { %v3824_v26 = vpop.eup %3823 }
0x1070   :  { %778 = vrot.lane.b32.xlu0 %v3824_v26, %s4175_s1 }
0x10e2   :  { %v779_v27 = vpop.permute.xlu0 %778 }
0x10e3   :  { %v781_v28 = vmul.f32 %v3822_v20, %v779_v27 }
0x10e5   :  { %v782_v29 = vpack.c.bf16 %v781_v28, %v781_v28  ;;  %v946_v52 = vsel %vm940_vm3, %v4572_v3, %v781_v28 }
0x10e7   :  { %v784_v30 = vrot.slane %v782_v29, 1 }
0x10e9   :  { %785 = vrot.lane.b32.xlu1 %v784_v30, %s4187_s21 }
0x115b   :  { %v786_v31 = vpop.permute.xlu1 %785 }
0x115c   :  { %3458 = vmatmul.mubr.msk.bf16.vlgmr.msra.gmra.mrb[20].mxu1 %vm323_vm2, %v786_v31 }
0x115d   :  { %3473 = vmatprep.mubr.msk.bf16.mxu1 %vm4185_vm0, %v4184_v0  ;;  %3470 = vmatpush3.bf16.msra.mxu1 %v3755_v16 }
0x115e   :  { %3471 = vmatprep.subr.bf16.mxu1 %v4184_v0 }
0x1161   :  { %3472 = vmatpush3.bf16.msra.mxu1 %v3757_v5 }
0x1162   :  { %3485 = vmatprep.subr.bf16.mxu1 %v4184_v0 }
0x122f   :  { %v824_v32 = vpop.f32.mrb[20].mxu1 }
0x1230   :  { %v831_v33 = vrot.slane %v824_v32, 4  ;;  %v3459_v34 = vpop.f32.mrb[21].mxu1 }
0x1231   :  { %v827_v35 = vpop.f32.mrb[22].mxu1 }
0x1232   :  { %v833_v36 = vadd.f32 %v831_v33, %v4506_v12  ;;  %v3460_v37 = vpop.f32.mrb[23].mxu1 }
0x1234   :  { %3825 = vtanh.f32 %v833_v36  ;;  %v3207_v39 = vmul.f32 -1.442695, %v833_v36 }
0x1236   :  { %3827 = vpow2.f32 %v3207_v39 }
0x123e   :  { %v3826_v38 = vpop.eup %3825 }
0x123f   :  { %846 = vrot.lane.b32.xlu0 %v3826_v38, %s4175_s1 }
0x1240   :  { %v3828_v40 = vpop.eup %3827 }
0x1241   :  { %v837_v41 = vadd.f32 1.0, %v3828_v40 }
0x1243   :  { %3829 = vrcp.f32 %v837_v41 }
0x124d   :  { %v3830_v14 = vpop.eup %3829 }
0x124e   :  { %v844_v46 = vmul.f32 %v3830_v14, %v842_v44 }
0x12b1   :  { %v847_v42 = vpop.permute.xlu0 %846 }
0x12b2   :  { %v849_v43 = vmul.f32 %v3830_v14, %v847_v42 }
0x12b4   :  { %851 = vrot.lane.b32.xlu1 %v849_v43, %s4187_s21 }
0x1326   :  { %v852_v47 = vpop.permute.xlu1 %851 }
0x1327   :  { %v854_v48 = vadd.f32 %v852_v47, %v844_v46 }
0x1329   :  { %3831 = vtanh.f32 %v854_v48  ;;  %v921_v10 = vrot.slane %v854_v48, 6 }
0x1333   :  { %v3832_v49 = vpop.eup %3831 }
0x1334   :  { %857 = vrot.lane.b32.xlu0 %v3832_v49, %s4175_s1 }
0x13a6   :  { %v858_v50 = vpop.permute.xlu0 %857 }
0x13a7   :  { %v860_v51 = vmul.f32 %v3830_v14, %v858_v50 }
0x13a9   :  { %v861_v53 = vpack.c.bf16 %v860_v51, %v860_v51  ;;  %v947_v54 = vsel %vm942_vm4, %v946_v52, %v860_v51 }
0x13ab   :  { %v863_v55 = vrot.slane %v861_v53, 2 }
0x13ad   :  { %864 = vrot.lane.b32.xlu1 %v863_v55, %s4187_s21 }
0x141f   :  { %v865_v56 = vpop.permute.xlu1 %864 }
0x1420   :  { %3466 = vmatmul.mubr.msk.bf16.vlgmr.msra.gmra.mrb[8].mxu0 %vm323_vm2, %v865_v56 }
0x1421   :  { %3481 = vmatprep.mubr.msk.bf16.mxu0 %vm4185_vm0, %v4184_v0 }
0x14f3   :  { %v903_v57 = vpop.f32.mrb[8].mxu0 }
0x14f4   :  { %v910_v58 = vrot.slane %v903_v57, 2  ;;  %v3467_v59 = vpop.f32.mrb[9].mxu0 }
0x14f5   :  { %v906_v60 = vpop.f32.mrb[10].mxu0 }
0x14f6   :  { %v912_v61 = vadd.f32 %v910_v58, %v4506_v12  ;;  %v3468_v62 = vpop.f32.mrb[11].mxu0  ;;  %v4606_v12 = vld [vmem:[#allocation7] sm:$0xff]  }
0x14f7   :  { %3478 = vmatpush3.bf16.msra.mxu0 %v4606_v12 }
0x14f8   :  { %3833 = vtanh.f32 %v912_v61  ;;  %v3209_v1 = vmul.f32 -1.442695, %v912_v61  ;;  %3479 = vmatprep.subr.bf16.mxu0 %v4184_v0 }
0x14fa   :  { %3835 = vpow2.f32 %v3209_v1 }
0x14fb   :  { %3480 = vmatpush3.bf16.msra.mxu0 %v4609_v17 }
0x14fc   :  { %3493 = vmatprep.subr.bf16.mxu0 %v4184_v0 }
0x14fe   :  { %3482 = vmatmul.mubr.bf16.vlgmr.msra.gmra.mrb[12].mxu0 %v4186_v7 }
0x14ff   :  { %3494 = vmatpush3.bf16.msra.mxu0 %v4606_v12  ;;  %3497 = vmatprep.mubr.msk.bf16.mxu0 %vm4185_vm0, %v4184_v0 }
0x1500   :  { %3495 = vmatprep.subr.bf16.mxu0 %v4184_v0 }
0x1502   :  { %v3834_v63 = vpop.eup %3833 }
0x1503   :  { %925 = vrot.lane.b32.xlu0 %v3834_v63, %s4175_s1  ;;  %3496 = vmatpush3.bf16.msra.mxu0 %v4609_v17 }
0x1504   :  { %v3836_v2 = vpop.eup %3835  ;;  %3509 = vmatprep.subr.bf16.mxu0 %v4184_v0 }
0x1505   :  { %v916_v3 = vadd.f32 1.0, %v3836_v2 }
0x1507   :  { %3837 = vrcp.f32 %v916_v3 }
0x1511   :  { %v3838_v4 = vpop.eup %3837 }
0x1512   :  { %v923_v11 = vmul.f32 %v3838_v4, %v921_v10 }
0x1575   :  { %v926_v8 = vpop.permute.xlu0 %925 }
0x1576   :  { %v928_v9 = vmul.f32 %v3838_v4, %v926_v8 }
0x1578   :  { %930 = vrot.lane.b32.xlu1 %v928_v9, %s4187_s21 }
0x15d1   :  { %v1061_v7 = vpop.f32.mrb[12].mxu0 }
0x15d2   :  { %v3483_v22 = vpop.f32.mrb[13].mxu0 }
0x15d3   :  { %v1064_v23 = vpop.f32.mrb[14].mxu0 }
0x15d4   :  { %v3484_v24 = vpop.f32.mrb[15].mxu0 }
0x15ea   :  { %v931_v13 = vpop.permute.xlu1 %930 }
0x15eb   :  { %v933_v15 = vadd.f32 %v931_v13, %v923_v11 }
0x15ed   :  { %3839 = vtanh.f32 %v933_v15 }
0x15f7   :  { %v3840_v18 = vpop.eup %3839 }
0x15f8   :  { %936 = vrot.lane.b32.xlu0 %v3840_v18, %s4175_s1 }
0x166a   :  { %v937_v19 = vpop.permute.xlu0 %936 }
0x166b   :  { %v939_v20 = vmul.f32 %v3838_v4, %v937_v19 }
0x166d   :  { %v948_v6 = vsel %vm944_vm5, %v947_v54, %v939_v20 }
0x166e   :  { %v949_v21 = vpack.c.bf16 %v948_v6, %v4558_v45  ;;  %v3210_v45 = vld [vmem:[%s5023_s6] ss:$0 sm:$0xff] }
0x1670   :  { %957 = vrot.lane.b32.xlu1 %v949_v21, %s4187_s21 }
0x16e2   :  { %v958_v25 = vpop.permute.xlu1 %957 }
0x16e3   :  { %3474 = vmatmul.mubr.msk.bf16.vlgmr.msra.gmra.mrb[24].mxu1 %vm323_vm2, %v958_v25 }
0x16e4   :  { %3486 = vmatpush3.bf16.msra.mxu1 %v4606_v12  ;;  %3489 = vmatprep.mubr.msk.bf16.mxu1 %vm4185_vm0, %v4184_v0 }
0x16e5   :  { %3487 = vmatprep.subr.bf16.mxu1 %v4184_v0 }
0x16e8   :  { %3488 = vmatpush3.bf16.msra.mxu1 %v4609_v17 }
0x16e9   :  { %3501 = vmatprep.subr.bf16.mxu1 %v4184_v0 }
0x17b6   :  { %v1008_v26 = vpop.f32.mrb[24].mxu1 }
0x17b7   :  { %v4637_v27 = vadd.f32 %v3210_v45, %v1008_v26  ;;  %v3475_v28 = vpop.f32.mrb[25].mxu1 }
0x17b8   :  { %v1011_v29 = vpop.f32.mrb[26].mxu1 }
0x17b9   :  { %v1067_v30 = vadd.f32 %v1061_v7, %v4637_v27  ;;  %v4640_v31 = vadd.f32 %v3210_v45, %v1011_v29  ;;  %v3476_v32 = vpop.f32.mrb[27].mxu1 }
0x17bb   :  { %3841 = vtanh.f32 %v1067_v30  ;;  %v3216_v34 = vmul.f32 -1.442695, %v1067_v30 }
0x17bd   :  { %3843 = vpow2.f32 %v3216_v34 }
0x17c5   :  { %v3842_v33 = vpop.eup %3841 }
0x17c6   :  { %1077 = vrot.lane.b32.xlu0 %v3842_v33, %s4175_s1 }
0x17c7   :  { %v3844_v35 = vpop.eup %3843 }
0x17c8   :  { %v1071_v36 = vadd.f32 1.0, %v3844_v35 }
0x17ca   :  { %3845 = vrcp.f32 %v1071_v36 }
0x17d4   :  { %v3846_v37 = vpop.eup %3845 }
0x17d5   :  { %v1075_v40 = vmul.f32 0.0, %v3846_v37 }
0x1838   :  { %v1078_v38 = vpop.permute.xlu0 %1077 }
0x1839   :  { %v1080_v39 = vmul.f32 %v3846_v37, %v1078_v38 }
0x183b   :  { %1082 = vrot.lane.b32.xlu1 %v1080_v39, %s4187_s21 }
0x18ad   :  { %v1083_v41 = vpop.permute.xlu1 %1082 }
0x18ae   :  { %v1085_v14 = vadd.f32 %v1083_v41, %v1075_v40 }
0x18b0   :  { %3847 = vtanh.f32 %v1085_v14  ;;  %v1151_v61 = vrot.slane %v1085_v14, 6 }
0x18ba   :  { %v3848_v42 = vpop.eup %3847 }
0x18bb   :  { %1088 = vrot.lane.b32.xlu0 %v3848_v42, %s4175_s1 }
0x192d   :  { %v1089_v43 = vpop.permute.xlu0 %1088 }
0x192e   :  { %v4645_v44 = vmul.f32 %v3846_v37, %v1089_v43 }
0x1930   :  { %v1092_v46 = vpack.c.bf16 %v4645_v44, %v4645_v44  ;;  %v2321_v34 = vrot.slane %v4645_v44, 1 }
0x1932   :  { %1094 = vrot.lane.b32.xlu1 %v1092_v46, %s4187_s21 }
0x19a4   :  { %v1095_v47 = vpop.permute.xlu1 %1094 }
0x19a5   :  { %3490 = vmatmul.mubr.msk.bf16.vlgmr.msra.gmra.mrb[28].mxu1 %vm323_vm2, %v1095_v47 }
0x19a6   :  { %3502 = vmatpush3.bf16.msra.mxu1 %v4606_v12  ;;  %3505 = vmatprep.mubr.msk.bf16.mxu1 %vm4185_vm0, %v4184_v0 }
0x19a7   :  { %3503 = vmatprep.subr.bf16.mxu1 %v4184_v0 }
0x19aa   :  { %3504 = vmatpush3.bf16.msra.mxu1 %v4609_v17 }
0x19ab   :  { %3517 = vmatprep.subr.bf16.mxu1 %v4184_v0 }
0x1a78   :  { %v1133_v48 = vpop.f32.mrb[28].mxu1 }
0x1a79   :  { %v1140_v49 = vrot.slane %v1133_v48, 6  ;;  %v3491_v50 = vpop.f32.mrb[29].mxu1 }
0x1a7a   :  { %v1136_v51 = vpop.f32.mrb[30].mxu1 }
0x1a7b   :  { %v1142_v52 = vadd.f32 %v1140_v49, %v4637_v27  ;;  %v3492_v53 = vpop.f32.mrb[31].mxu1 }
0x1a7d   :  { %3849 = vtanh.f32 %v1142_v52  ;;  %v3218_v55 = vmul.f32 -1.442695, %v1142_v52 }
0x1a7f   :  { %3851 = vpow2.f32 %v3218_v55 }
0x1a87   :  { %v3850_v54 = vpop.eup %3849 }
0x1a88   :  { %1155 = vrot.lane.b32.xlu0 %v3850_v54, %s4175_s1 }
0x1a89   :  { %v3852_v56 = vpop.eup %3851 }
0x1a8a   :  { %v1146_v57 = vadd.f32 1.0, %v3852_v56 }
0x1a8c   :  { %3853 = vrcp.f32 %v1146_v57 }
0x1a96   :  { %v3854_v58 = vpop.eup %3853 }
0x1a97   :  { %v1153_v62 = vmul.f32 %v3854_v58, %v1151_v61 }
0x1afa   :  { %v1156_v59 = vpop.permute.xlu0 %1155 }
0x1afb   :  { %v1158_v60 = vmul.f32 %v3854_v58, %v1156_v59 }
0x1afd   :  { %1160 = vrot.lane.b32.xlu1 %v1158_v60, %s4187_s21 }
0x1b6f   :  { %v1161_v63 = vpop.permute.xlu1 %1160 }
0x1b70   :  { %v1163_v1 = vadd.f32 %v1161_v63, %v1153_v62 }
0x1b72   :  { %3855 = vtanh.f32 %v1163_v1  ;;  %v1230_v24 = vrot.slane %v1163_v1, 6 }
0x1b7c   :  { %v3856_v2 = vpop.eup %3855 }
0x1b7d   :  { %1166 = vrot.lane.b32.xlu0 %v3856_v2, %s4175_s1 }
0x1bef   :  { %v1167_v3 = vpop.permute.xlu0 %1166 }
0x1bf0   :  { %v1169_v4 = vmul.f32 %v3854_v58, %v1167_v3 }
0x1bf2   :  { %v1170_v8 = vpack.c.bf16 %v1169_v4, %v1169_v4  ;;  %v1708_v29 = vrot.slane %v1169_v4, 1  ;;  %v2323_v30 = vrot.slane %v1169_v4, 2 }
0x1bf4   :  { %v1172_v9 = vrot.slane %v1170_v8, 1  ;;  %v1729_v38 = vsel %vm1728_vm6, %v4645_v44, %v1708_v29  ;;  %v2335_v39 = vsel %vm1728_vm6, %v2321_v34, %v2323_v30 }
0x1bf6   :  { %1173 = vrot.lane.b32.xlu1 %v1172_v9, %s4187_s21 }
0x1c68   :  { %v1174_v10 = vpop.permute.xlu1 %1173 }
0x1c69   :  { %3498 = vmatmul.mubr.msk.bf16.vlgmr.msra.gmra.mrb[16].mxu0 %vm323_vm2, %v1174_v10 }
0x1c6a   :  { %3510 = vmatpush3.bf16.msra.mxu0 %v4606_v12  ;;  %3513 = vmatprep.mubr.msk.bf16.mxu0 %vm4185_vm0, %v4184_v0 }
0x1c6b   :  { %3511 = vmatprep.subr.bf16.mxu0 %v4184_v0 }
0x1c6e   :  { %3512 = vmatpush3.bf16.msra.mxu0 %v4609_v17 }
0x1c6f   :  { %3525 = vmatprep.subr.bf16.mxu0 %v4184_v0 }
0x1d3c   :  { %v1212_v11 = vpop.f32.mrb[16].mxu0 }
0x1d3d   :  { %v1219_v13 = vrot.slane %v1212_v11, 4  ;;  %v3499_v15 = vpop.f32.mrb[17].mxu0 }
0x1d3e   :  { %v1215_v16 = vpop.f32.mrb[18].mxu0 }
0x1d3f   :  { %v1221_v5 = vadd.f32 %v1219_v13, %v4637_v27  ;;  %v3500_v18 = vpop.f32.mrb[19].mxu0 }
0x1d41   :  { %3857 = vtanh.f32 %v1221_v5  ;;  %v3220_v20 = vmul.f32 -1.442695, %v1221_v5 }
0x1d43   :  { %3859 = vpow2.f32 %v3220_v20 }
0x1d4b   :  { %v3858_v19 = vpop.eup %3857 }
0x1d4c   :  { %1234 = vrot.lane.b32.xlu0 %v3858_v19, %s4175_s1 }
0x1d4d   :  { %v3860_v6 = vpop.eup %3859 }
0x1d4e   :  { %v1225_v21 = vadd.f32 1.0, %v3860_v6 }
0x1d50   :  { %3861 = vrcp.f32 %v1225_v21 }
0x1d5a   :  { %v3862_v7 = vpop.eup %3861 }
0x1d5b   :  { %v1232_v25 = vmul.f32 %v3862_v7, %v1230_v24 }
0x1dbe   :  { %v1235_v22 = vpop.permute.xlu0 %1234 }
0x1dbf   :  { %v1237_v23 = vmul.f32 %v3862_v7, %v1235_v22 }
0x1dc1   :  { %1239 = vrot.lane.b32.xlu1 %v1237_v23, %s4187_s21 }
0x1e33   :  { %v1240_v45 = vpop.permute.xlu1 %1239 }
0x1e34   :  { %v1242_v26 = vadd.f32 %v1240_v45, %v1232_v25 }
0x1e36   :  { %3863 = vtanh.f32 %v1242_v26  ;;  %v1309_v57 = vrot.slane %v1242_v26, 6 }
0x1e40   :  { %v3864_v28 = vpop.eup %3863 }
0x1e41   :  { %1245 = vrot.lane.b32.xlu0 %v3864_v28, %s4175_s1 }
0x1eb3   :  { %v1246_v32 = vpop.permute.xlu0 %1245 }
0x1eb4   :  { %v1248_v33 = vmul.f32 %v3862_v7, %v1246_v32 }
0x1eb6   :  { %v1711_v35 = vrot.slane %v1248_v33, 2  ;;  %v2325_v36 = vrot.slane %v1248_v33, 3  ;;  %v1249_v37 = vpack.c.bf16 %v1248_v33, %v1248_v33 }
0x1eb8   :  { %v1730_v40 = vsel %vm940_vm3, %v1729_v38, %v1711_v35  ;;  %v2336_v41 = vsel %vm940_vm3, %v2335_v39, %v2325_v36  ;;  %v1251_v14 = vrot.slane %v1249_v37, 2 }
0x1eba   :  { %1252 = vrot.lane.b32.xlu1 %v1251_v14, %s4187_s21 }
0x1f2c   :  { %v1253_v42 = vpop.permute.xlu1 %1252 }
0x1f2d   :  { %3506 = vmatmul.mubr.msk.bf16.vlgmr.msra.gmra.mrb[32].mxu1 %vm323_vm2, %v1253_v42 }
0x1f2e   :  { %3518 = vmatpush3.bf16.msra.mxu1 %v4606_v12  ;;  %3521 = vmatprep.mubr.msk.bf16.mxu1 %vm4185_vm0, %v4184_v0 }
0x1f2f   :  { %3519 = vmatprep.subr.bf16.mxu1 %v4184_v0 }
0x1f32   :  { %3520 = vmatpush3.bf16.msra.mxu1 %v4609_v17 }
0x1f33   :  { %3533 = vmatprep.subr.bf16.mxu1 %v4184_v0 }
0x2000   :  { %v1291_v43 = vpop.f32.mrb[32].mxu1 }
0x2001   :  { %v1298_v44 = vrot.slane %v1291_v43, 2  ;;  %v3507_v46 = vpop.f32.mrb[33].mxu1 }
0x2002   :  { %v1294_v47 = vpop.f32.mrb[34].mxu1 }
0x2003   :  { %v1300_v48 = vadd.f32 %v1298_v44, %v4637_v27  ;;  %v3508_v49 = vpop.f32.mrb[35].mxu1 }
0x2005   :  { %3865 = vtanh.f32 %v1300_v48  ;;  %v3222_v51 = vmul.f32 -1.442695, %v1300_v48 }
0x2007   :  { %3867 = vpow2.f32 %v3222_v51 }
0x200f   :  { %v3866_v50 = vpop.eup %3865 }
0x2010   :  { %1313 = vrot.lane.b32.xlu0 %v3866_v50, %s4175_s1 }
0x2011   :  { %v3868_v52 = vpop.eup %3867 }
0x2012   :  { %v1304_v53 = vadd.f32 1.0, %v3868_v52 }
0x2014   :  { %3869 = vrcp.f32 %v1304_v53 }
0x201e   :  { %v3870_v54 = vpop.eup %3869 }
0x201f   :  { %v1311_v58 = vmul.f32 %v3870_v54, %v1309_v57 }
0x2082   :  { %v1314_v55 = vpop.permute.xlu0 %1313 }
0x2083   :  { %v1316_v56 = vmul.f32 %v3870_v54, %v1314_v55 }
0x2085   :  { %1318 = vrot.lane.b32.xlu1 %v1316_v56, %s4187_s21 }
0x20f7   :  { %v1319_v59 = vpop.permute.xlu1 %1318 }
0x20f8   :  { %v1321_v60 = vadd.f32 %v1319_v59, %v1311_v58 }
0x20fa   :  { %3871 = vtanh.f32 %v1321_v60  ;;  %v1385_v22 = vrot.slane %v1321_v60, 6 }
0x2104   :  { %v3872_v27 = vpop.eup %3871 }
0x2105   :  { %1324 = vrot.lane.b32.xlu0 %v3872_v27, %s4175_s1 }
0x2177   :  { %v1325_v61 = vpop.permute.xlu0 %1324 }
0x2178   :  { %v1327_v62 = vmul.f32 %v3870_v54, %v1325_v61 }
0x217a   :  { %v1714_v63 = vrot.slane %v1327_v62, 3  ;;  %v2327_v1 = vrot.slane %v1327_v62, 4  ;;  %v1328_v2 = vpack.c.bf16 %v1327_v62, %v1327_v62 }
0x217c   :  { %v1732_v3 = vsel %vm1731_vm7, %v1730_v40, %v1714_v63  ;;  %v2337_v4 = vsel %vm1731_vm7, %v2336_v41, %v2327_v1  ;;  %v1330_v8 = vrot.slane %v1328_v2, 3 }
0x217e   :  { %1331 = vrot.lane.b32.xlu1 %v1330_v8, %s4187_s21 }
0x21f0   :  { %v1332_v9 = vpop.permute.xlu1 %1331 }
0x21f1   :  { %3514 = vmatmul.mubr.msk.bf16.vlgmr.msra.gmra.mrb[20].mxu0 %vm323_vm2, %v1332_v9 }
0x21f2   :  { %3526 = vmatpush3.bf16.msra.mxu0 %v4606_v12  ;;  %3529 = vmatprep.mubr.msk.bf16.mxu0 %vm4185_vm0, %v4184_v0 }
0x21f3   :  { %3527 = vmatprep.subr.bf16.mxu0 %v4184_v0 }
0x21f6   :  { %3528 = vmatpush3.bf16.msra.mxu0 %v4609_v17 }
0x21f7   :  { %3541 = vmatprep.subr.bf16.mxu0 %v4184_v0 }
0x22c4   :  { %v1370_v10 = vpop.f32.mrb[20].mxu0 }
0x22c5   :  { %v1376_v11 = vadd.f32 %v1370_v10, %v4640_v31  ;;  %v3515_v13 = vpop.f32.mrb[21].mxu0 }
0x22c6   :  { %v1373_v15 = vpop.f32.mrb[22].mxu0 }
0x22c7   :  { %3873 = vtanh.f32 %v1376_v11  ;;  %v3516_v16 = vpop.f32.mrb[23].mxu0  ;;  %v3224_v18 = vmul.f32 -1.442695, %v1376_v11 }
0x22c9   :  { %3875 = vpow2.f32 %v3224_v18 }
0x22d1   :  { %v3874_v5 = vpop.eup %3873 }
0x22d2   :  { %1389 = vrot.lane.b32.xlu0 %v3874_v5, %s4175_s1 }
0x22d3   :  { %v3876_v19 = vpop.eup %3875 }
0x22d4   :  { %v1380_v20 = vadd.f32 1.0, %v3876_v19 }
0x22d6   :  { %3877 = vrcp.f32 %v1380_v20 }
0x22e0   :  { %v3878_v6 = vpop.eup %3877 }
0x22e1   :  { %v1387_v23 = vmul.f32 %v3878_v6, %v1385_v22 }
0x2344   :  { %v1390_v21 = vpop.permute.xlu0 %1389 }
0x2345   :  { %v1392_v7 = vmul.f32 %v3878_v6, %v1390_v21 }
0x2347   :  { %1394 = vrot.lane.b32.xlu1 %v1392_v7, %s4187_s21 }
0x23b9   :  { %v1395_v24 = vpop.permute.xlu1 %1394 }
0x23ba   :  { %v1397_v25 = vadd.f32 %v1395_v24, %v1387_v23 }
0x23bc   :  { %3879 = vtanh.f32 %v1397_v25  ;;  %v1463_v47 = vrot.slane %v1397_v25, 6 }
0x23c6   :  { %v3880_v45 = vpop.eup %3879 }
0x23c7   :  { %1400 = vrot.lane.b32.xlu0 %v3880_v45, %s4175_s1 }
0x2439   :  { %v1401_v26 = vpop.permute.xlu0 %1400 }
0x243a   :  { %v1403_v28 = vmul.f32 %v3878_v6, %v1401_v26 }
0x243c   :  { %v1717_v29 = vrot.slane %v1403_v28, 4  ;;  %v2329_v30 = vrot.slane %v1403_v28, 5  ;;  %v1404_v32 = vpack.c.bf16 %v1403_v28, %v1403_v28 }
0x243e   :  { %v1733_v33 = vsel %vm942_vm4, %v1732_v3, %v1717_v29  ;;  %v2338_v34 = vsel %vm942_vm4, %v2337_v4, %v2329_v30  ;;  %1406 = vrot.lane.b32.xlu1 %v1404_v32, %s4187_s21 }
0x24b0   :  { %v1407_v35 = vpop.permute.xlu1 %1406 }
0x24b1   :  { %3522 = vmatmul.mubr.msk.bf16.vlgmr.msra.gmra.mrb[36].mxu1 %vm323_vm2, %v1407_v35 }
0x24b2   :  { %3534 = vmatpush3.bf16.msra.mxu1 %v4606_v12  ;;  %3537 = vmatprep.mubr.msk.bf16.mxu1 %vm4185_vm0, %v4184_v0 }
0x24b3   :  { %3535 = vmatprep.subr.bf16.mxu1 %v4184_v0 }
0x24b6   :  { %3536 = vmatpush3.bf16.msra.mxu1 %v4609_v17 }
0x24b7   :  { %3549 = vmatprep.subr.bf16.mxu1 %v4184_v0 }
0x2584   :  { %v1445_v36 = vpop.f32.mrb[36].mxu1 }
0x2585   :  { %v1452_v37 = vrot.slane %v1445_v36, 6  ;;  %v3523_v38 = vpop.f32.mrb[37].mxu1 }
0x2586   :  { %v1448_v39 = vpop.f32.mrb[38].mxu1 }
0x2587   :  { %v1454_v40 = vadd.f32 %v1452_v37, %v4640_v31  ;;  %v3524_v41 = vpop.f32.mrb[39].mxu1 }
0x2589   :  { %3881 = vtanh.f32 %v1454_v40  ;;  %v3226_v12 = vmul.f32 -1.442695, %v1454_v40 }
0x258b   :  { %3883 = vpow2.f32 %v3226_v12 }
0x2593   :  { %v3882_v14 = vpop.eup %3881 }
0x2594   :  { %1467 = vrot.lane.b32.xlu0 %v3882_v14, %s4175_s1 }
0x2595   :  { %v3884_v42 = vpop.eup %3883 }
0x2596   :  { %v1458_v43 = vadd.f32 1.0, %v3884_v42 }
0x2598   :  { %3885 = vrcp.f32 %v1458_v43  ;;  %v4734_v43 = vld [vmem:[#allocation10] sm:$0xff]  }
0x25a2   :  { %v3886_v44 = vpop.eup %3885 }
0x25a3   :  { %v1465_v48 = vmul.f32 %v3886_v44, %v1463_v47 }
0x2606   :  { %v1468_v17 = vpop.permute.xlu0 %1467 }
0x2607   :  { %v1470_v46 = vmul.f32 %v3886_v44, %v1468_v17  ;;  %v4739_v17 = vld [vmem:[#allocation10 + $0x8] sm:$0xff]  }
0x2609   :  { %1472 = vrot.lane.b32.xlu1 %v1470_v46, %s4187_s21 }
0x267b   :  { %v1473_v49 = vpop.permute.xlu1 %1472 }
0x267c   :  { %v1475_v50 = vadd.f32 %v1473_v49, %v1465_v48 }
0x267e   :  { %3887 = vtanh.f32 %v1475_v50  ;;  %v1542_v15 = vrot.slane %v1475_v50, 6 }
0x2688   :  { %v3888_v51 = vpop.eup %3887 }
0x2689   :  { %1478 = vrot.lane.b32.xlu0 %v3888_v51, %s4175_s1 }
0x26fb   :  { %v1479_v52 = vpop.permute.xlu0 %1478 }
0x26fc   :  { %v1481_v53 = vmul.f32 %v3886_v44, %v1479_v52  ;;  %v3760_v44 = vld [vmem:[#allocation8 + $0x8] sm:$0xff]  }
0x26fe   :  { %v1720_v54 = vrot.slane %v1481_v53, 5  ;;  %v2331_v55 = vrot.slane %v1481_v53, 6  ;;  %v1482_v56 = vpack.c.bf16 %v1481_v53, %v1481_v53 }
0x2700   :  { %v1484_v57 = vrot.slane %v1482_v56, 1  ;;  %v1735_v58 = vsel %vm1734_vm8, %v1733_v33, %v1720_v54  ;;  %v2339_v59 = vsel %vm1734_vm8, %v2338_v34, %v2331_v55  ;;  %v4747_v55 = vld [vmem:[#allocation11] sm:$0xff]  }
0x2702   :  { %1485 = vrot.lane.b32.xlu1 %v1484_v57, %s4187_s21 }
0x2774   :  { %v1486_v60 = vpop.permute.xlu1 %1485 }
0x2775   :  { %3530 = vmatmul.mubr.msk.bf16.vlgmr.msra.gmra.mrb[24].mxu0 %vm323_vm2, %v1486_v60  ;;  %v4770_v60 = vld [vmem:[%s5027_s10] ss:$0 sm:$0xff] }
0x2776   :  { %3545 = vmatprep.mubr.msk.bf16.mxu0 %vm4185_vm0, %v4184_v0 }
0x2848   :  { %v1524_v27 = vpop.f32.mrb[24].mxu0 }
0x2849   :  { %v1531_v61 = vrot.slane %v1524_v27, 4  ;;  %v3531_v62 = vpop.f32.mrb[25].mxu0 }
0x284a   :  { %v1527_v63 = vpop.f32.mrb[26].mxu0 }
0x284b   :  { %v1533_v1 = vadd.f32 %v1531_v61, %v4640_v31  ;;  %v3532_v2 = vpop.f32.mrb[27].mxu0 }
0x284d   :  { %3889 = vtanh.f32 %v1533_v1  ;;  %v3228_v4 = vmul.f32 -1.442695, %v1533_v1 }
0x284f   :  { %3891 = vpow2.f32 %v3228_v4 }
0x2857   :  { %v3890_v3 = vpop.eup %3889 }
0x2858   :  { %1546 = vrot.lane.b32.xlu0 %v3890_v3, %s4175_s1 }
0x2859   :  { %v3892_v8 = vpop.eup %3891 }
0x285a   :  { %v1537_v9 = vadd.f32 1.0, %v3892_v8 }
0x285c   :  { %3893 = vrcp.f32 %v1537_v9 }
0x2866   :  { %v3894_v10 = vpop.eup %3893 }
0x2867   :  { %v1544_v16 = vmul.f32 %v3894_v10, %v1542_v15 }
0x28ca   :  { %v1547_v11 = vpop.permute.xlu0 %1546 }
0x28cb   :  { %v1549_v13 = vmul.f32 %v3894_v10, %v1547_v11 }
0x28cd   :  { %1551 = vrot.lane.b32.xlu1 %v1549_v13, %s4187_s21 }
0x293f   :  { %v1552_v5 = vpop.permute.xlu1 %1551 }
0x2940   :  { %v1554_v18 = vadd.f32 %v1552_v5, %v1544_v16  ;;  %v4780_v16 = vld [vmem:[%s5029_s12] ss:$0 sm:$0xff]  ;;  %s4190_s12 = smov 104  }
0x2942   :  { %3895 = vtanh.f32 %v1554_v18  ;;  %v1621_v41 = vrot.slane %v1554_v18, 6 }
0x294c   :  { %v3896_v19 = vpop.eup %3895 }
0x294d   :  { %1557 = vrot.lane.b32.xlu0 %v3896_v19, %s4175_s1 }
0x29bf   :  { %v1558_v20 = vpop.permute.xlu0 %1557 }
0x29c0   :  { %v1560_v6 = vmul.f32 %v3894_v10, %v1558_v20 }
0x29c2   :  { %v1723_v21 = vrot.slane %v1560_v6, 6  ;;  %v2333_v7 = vrot.slane %v1560_v6, 7  ;;  %v1561_v22 = vpack.c.bf16 %v1560_v6, %v1560_v6 }
0x29c4   :  { %v1563_v23 = vrot.slane %v1561_v22, 2  ;;  %v1736_v24 = vsel %vm944_vm5, %v1735_v58, %v1723_v21  ;;  %v2340_v25 = vsel %vm944_vm5, %v2339_v59, %v2333_v7  ;;  %v4752_v58 = vld [vmem:[#allocation11 + $0x8] sm:$0xff]   ;;  %v3231_v59 = vld [vmem:[%s5025_s8] ss:$0 sm:$0xff]  ;;  %s4188_s8 = smov 120  }
0x29c6   :  { %1564 = vrot.lane.b32.xlu1 %v1563_v23, %s4187_s21 }
0x2a38   :  { %v1565_v45 = vpop.permute.xlu1 %1564 }
0x2a39   :  { %3538 = vmatmul.mubr.msk.bf16.vlgmr.msra.gmra.mrb[40].mxu1 %vm323_vm2, %v1565_v45 }
0x2a3a   :  { %3553 = vmatprep.mubr.msk.bf16.mxu1 %vm4185_vm0, %v4184_v0  ;;  %3550 = vmatpush3.bf16.msra.mxu1 %v4734_v43 }
0x2a3b   :  { %3551 = vmatprep.subr.bf16.mxu1 %v4184_v0 }
0x2a3e   :  { %3552 = vmatpush3.bf16.msra.mxu1 %v4739_v17 }
0x2a3f   :  { %3565 = vmatprep.subr.bf16.mxu1 %v4184_v0 }
0x2b0c   :  { %v1603_v26 = vpop.f32.mrb[40].mxu1 }
0x2b0d   :  { %v1610_v28 = vrot.slane %v1603_v26, 2  ;;  %v3539_v29 = vpop.f32.mrb[41].mxu1 }
0x2b0e   :  { %v1606_v30 = vpop.f32.mrb[42].mxu1 }
0x2b0f   :  { %v1612_v32 = vadd.f32 %v1610_v28, %v4640_v31  ;;  %v3540_v33 = vpop.f32.mrb[43].mxu1  ;;  %v3758_v31 = vld [vmem:[#allocation8] sm:$0xff]  }
0x2b10   :  { %3542 = vmatpush3.bf16.msra.mxu0 %v3758_v31 }
0x2b11   :  { %3897 = vtanh.f32 %v1612_v32  ;;  %v3230_v35 = vmul.f32 -1.442695, %v1612_v32  ;;  %3543 = vmatprep.subr.bf16.mxu0 %v4184_v0 }
0x2b13   :  { %3899 = vpow2.f32 %v3230_v35 }
0x2b14   :  { %3544 = vmatpush3.bf16.msra.mxu0 %v3760_v44 }
0x2b15   :  { %3557 = vmatprep.subr.bf16.mxu0 %v4184_v0 }
0x2b1b   :  { %v3898_v34 = vpop.eup %3897 }
0x2b1c   :  { %1625 = vrot.lane.b32.xlu0 %v3898_v34, %s4175_s1 }
0x2b1d   :  { %v3900_v36 = vpop.eup %3899 }
0x2b1e   :  { %v1616_v37 = vadd.f32 1.0, %v3900_v36 }
0x2b20   :  { %3901 = vrcp.f32 %v1616_v37 }
0x2b2a   :  { %v3902_v38 = vpop.eup %3901 }
0x2b2b   :  { %v1623_v14 = vmul.f32 %v3902_v38, %v1621_v41 }
0x2b8e   :  { %v1626_v39 = vpop.permute.xlu0 %1625 }
0x2b8f   :  { %v1628_v40 = vmul.f32 %v3902_v38, %v1626_v39 }
0x2b91   :  { %1630 = vrot.lane.b32.xlu1 %v1628_v40, %s4187_s21 }
0x2c03   :  { %v1631_v12 = vpop.permute.xlu1 %1630 }
0x2c04   :  { %v1633_v42 = vadd.f32 %v1631_v12, %v1623_v14 }
0x2c06   :  { %3903 = vtanh.f32 %v1633_v42 }
0x2c10   :  { %v3904_v46 = vpop.eup %3903 }
0x2c11   :  { %1636 = vrot.lane.b32.xlu0 %v3904_v46, %s4175_s1 }
0x2c83   :  { %v1637_v47 = vpop.permute.xlu0 %1636 }
0x2c84   :  { %v1639_v48 = vmul.f32 %v3902_v38, %v1637_v47 }
0x2c86   :  { %v1726_v49 = vrot.slane %v1639_v48, 7  ;;  %v1640_v50 = vpack.c.bf16 %v1639_v48, %v1639_v48  ;;  %v2341_v51 = vsel %vm1737_vm9, %v2340_v25, %v1639_v48 }
0x2c87   :  { %v2342_v22 = vpack.c.bf16 %v2341_v51, %v2341_v51 }
0x2c88   :  { %v1648_v52 = vrot.slane %v1640_v50, 3  ;;  %v1738_v53 = vsel %vm1737_vm9, %v1736_v24, %v1726_v49 }
0x2c89   :  { %v1739_v54 = vpack.c.bf16 %v1738_v53, %v1738_v53 }
0x2c8a   :  { %1649 = vrot.lane.b32.xlu0 %v1648_v52, %s4187_s21 }
0x2c8b   :  { %1747 = vrot.lane.b32.xlu1 %v1739_v54, %s4187_s21 }
0x2cfc   :  { %v1650_v56 = vpop.permute.xlu0 %1649 }
0x2cfd   :  { %v1748_v57 = vpop.permute.xlu1 %1747  ;;  %3546 = vmatmul.mubr.msk.bf16.vlgmr.msra.gmra.mrb[28].mxu0 %vm323_vm2, %v1650_v56 }
0x2cfe   :  { %3554 = vmatmul.mubr.msk.bf16.vlgmr.msra.gmra.mrb[44].mxu1 %vm323_vm2, %v1748_v57  ;;  %3558 = vmatpush3.bf16.msra.mxu0 %v4747_v55 }
0x2cff   :  { %3559 = vmatprep.subr.bf16.mxu0 %v4184_v0  ;;  %3561 = vmatprep.mubr.msk.bf16.mxu0 %vm4185_vm0, %v4184_v0 }
0x2d00   :  { %3567 = vmatprep.mubr.msk.bf16.mxu1 %vm4185_vm0, %v4184_v0 }
0x2d02   :  { %3560 = vmatpush3.bf16.msra.mxu0 %v4752_v58 }
0x2d03   :  { %3571 = vmatprep.subr.bf16.mxu0 %v4184_v0 }
0x2d05   :  { %3562 = vmatmul.mubr.msk.bf16.vlgmr.msra.gmra.mrb[32].mxu0 %vm323_vm2, %v1748_v57 }
0x2d06   :  { %3573 = vmatprep.mubr.msk.bf16.mxu0 %vm4185_vm0, %v4184_v0 }
0x2dd0   :  { %v1700_v27 = vpop.f32.mrb[28].mxu0 }
0x2dd1   :  { %v1701_v61 = vadd.f32 %v3231_v59, %v1700_v27  ;;  %v3547_v62 = vpop.f32.mrb[29].mxu0  ;;  %v1798_v63 = vpop.f32.mrb[44].mxu1 }
0x2dd2   :  { %v1799_v1 = vadd.f32 %v4770_v60, %v1798_v63  ;;  %v1703_v2 = vpop.f32.mrb[30].mxu0  ;;  %v3555_v3 = vpop.f32.mrb[45].mxu1 }
0x2dd3   :  { %v1706_v4 = vmul.f32 0.35355338, %v1701_v61  ;;  %v3548_v8 = vpop.f32.mrb[31].mxu0  ;;  %v1801_v9 = vpop.f32.mrb[46].mxu1 }
0x2dd4   :  { %v1863_v10 = vpack.c.bf16 %v1799_v1, %v1799_v1  ;;  %v3556_v11 = vpop.f32.mrb[47].mxu1 }
0x2dd5   :  { %v4773_v13 = vpack.c.bf16 %v1706_v4, %v1706_v4 }
0x2dd6   :  { %1975 = vrot.lane.b32.xlu1 %v1863_v10, %s4188_s8  ;;  %v1869_v15 = vsel %vm1864_vm10, %v1863_v10, 0 }
0x2dd7   :  { %1972 = vrot.lane.b32.xlu0 %v4773_v13, %s4188_s8  ;;  %3566 = vmatpush3.bf16.xpose.msra.mxu1 %v1869_v15  ;;  %v2430_v27 = vshrl.u32 %v4773_v13, 16 }
0x2dd8   :  { %v1856_v5 = vpop.f32.mrb[32].mxu0  ;;  %3577 = vmatprep.subr.bf16.mxu1 %v4184_v0 }
0x2dd9   :  { %v1857_v18 = vadd.f32 %v4780_v16, %v1856_v5  ;;  %v3563_v19 = vpop.f32.mrb[33].mxu0 }
0x2dda   :  { %v1859_v20 = vpop.f32.mrb[34].mxu0  ;;  %2086 = vrot.lane.b32.xlu1 %v1863_v10, %s4189_s2 }
0x2ddb   :  { %v4787_v6 = vpack.c.bf16 %v1857_v18, %v1857_v18  ;;  %2084 = vrot.lane.b32.xlu0 %v4773_v13, %s4189_s2  ;;  %v3564_v21 = vpop.f32.mrb[35].mxu0 }
0x2ddd   :  { %v1929_v7 = vsel %vm942_vm4, %v4787_v6, 0 }
0x2dde   :  { %3572 = vmatpush3.bf16.msra.mxu0 %v1929_v7  ;;  %2196 = vrot.lane.b32.xlu1 %v1863_v10, %s4190_s12 }
0x2ddf   :  { %3568 = vmatmul.mubr.msk.bf16.vlgmr.msra.gmra.mrb[48].mxu1 %vm1864_vm10, %v4773_v13  ;;  %2194 = vrot.lane.b32.xlu0 %v4773_v13, %s4190_s12 }
0x2de0   :  { %3579 = vmatprep.mubr.msk.bf16.mxu1 %vm4185_vm0, %v4184_v0  ;;  %3583 = vmatprep.subr.bf16.mxu0 %v4184_v0 }
0x2de2   :  { %2344 = vrot.lane.b32.xlu1 %v2342_v22, %s4187_s21 }
0x2e48   :  { %v1976_v23 = vpop.permute.xlu1 %1975 }
0x2e49   :  { %v1981_v24 = vsel %vm1864_vm10, %v1976_v23, 0  ;;  %v1973_v45 = vpop.permute.xlu0 %1972 }
0x2e4a   :  { %3578 = vmatpush3.bf16.xpose.msra.mxu1 %v1981_v24 }
0x2e4b   :  { %3589 = vmatprep.subr.bf16.mxu1 %v4184_v0 }
0x2e4c   :  { %v2087_v25 = vpop.permute.xlu1 %2086 }
0x2e4d   :  { %v2092_v26 = vsel %vm1864_vm10, %v2087_v25, 0  ;;  %v2085_v29 = vpop.permute.xlu0 %2084 }
0x2e50   :  { %v2197_v28 = vpop.permute.xlu1 %2196 }
0x2e51   :  { %3580 = vmatmul.mubr.msk.bf16.vlgmr.msra.gmra.mrb[52].mxu1 %vm1864_vm10, %v1973_v45  ;;  %v2202_v30 = vsel %vm1864_vm10, %v2197_v28, 0  ;;  %v2195_v32 = vpop.permute.xlu0 %2194 }
0x2e52   :  { %3590 = vmatpush3.bf16.xpose.msra.mxu1 %v2092_v26  ;;  %3591 = vmatprep.mubr.msk.bf16.mxu1 %vm4185_vm0, %v4184_v0 }
0x2e53   :  { %3601 = vmatprep.subr.bf16.mxu1 %v4184_v0 }
0x2e54   :  { %v4821_v33 = vpop.permute.xlu1 %2344 }
0x2e59   :  { %3592 = vmatmul.mubr.msk.bf16.vlgmr.msra.gmra.mrb[56].mxu1 %vm1864_vm10, %v2085_v29 }
0x2e5a   :  { %3602 = vmatpush3.bf16.xpose.msra.mxu1 %v2202_v30  ;;  %3603 = vmatprep.mubr.msk.bf16.mxu1 %vm4185_vm0, %v4184_v0 }
0x2e5b   :  { %3613 = vmatprep.subr.bf16.mxu1 %v4184_v0 }
0x2e61   :  { %3604 = vmatmul.mubr.msk.bf16.vlgmr.msra.gmra.mrb[60].mxu1 %vm1864_vm10, %v2195_v32 }
0x2e62   :  { %3614 = vmatpush3.bf16.msra.mxu1 %v4734_v43  ;;  %3617 = vmatprep.mubr.msk.bf16.mxu1 %vm4185_vm0, %v4184_v0 }
0x2e63   :  { %3615 = vmatprep.subr.bf16.mxu1 %v4184_v0 }
0x2e66   :  { %3616 = vmatpush3.bf16.msra.mxu1 %v4739_v17 }
0x2e67   :  { %3629 = vmatprep.subr.bf16.mxu1 %v4184_v0 }
0x2e69   :  { %3618 = vmatmul.mubr.msk.bf16.vlgmr.msra.gmra.mrb[64].mxu1 %vm323_vm2, %v4821_v33 }
0x2e6a   :  { %3631 = vmatprep.mubr.msk.bf16.mxu1 %vm4185_vm0, %v4184_v0 }
0x2eb2   :  { %v1905_v34 = vpop.f32.mrb[48].mxu1 }
0x2eb3   :  { %v3569_v35 = vpop.f32.mrb[49].mxu1  ;;  %v1912_v36 = vsel %vm1911_vm11, %v1905_v34, -inf }
0x2eb4   :  { %1913 = vmax.xlane.f32.xlu0 %v1912_v36  ;;  %v1908_v37 = vpop.f32.mrb[50].mxu1 }
0x2eb5   :  { %v3570_v38 = vpop.f32.mrb[51].mxu1 }
0x2f24   :  { %v2017_v39 = vpop.f32.mrb[52].mxu1 }
0x2f25   :  { %v3581_v40 = vpop.f32.mrb[53].mxu1  ;;  %v2023_v41 = vsel %vm1911_vm11, %v2017_v39, -inf }
0x2f26   :  { %2024 = vmax.xlane.f32.xlu1 %v2023_v41  ;;  %v2020_v14 = vpop.f32.mrb[54].mxu1 }
0x2f27   :  { %v3582_v12 = vpop.f32.mrb[55].mxu1 }
0x2f2c   :  { %v2128_v42 = vpop.f32.mrb[56].mxu1 }
0x2f2d   :  { %v3593_v31 = vpop.f32.mrb[57].mxu1  ;;  %v2134_v43 = vsel %vm1911_vm11, %v2128_v42, -inf }
0x2f2e   :  { %2135 = vmax.xlane.f32.xlu0 %v2134_v43  ;;  %v2131_v44 = vpop.f32.mrb[58].mxu1 }
0x2f2f   :  { %v3594_v17 = vpop.f32.mrb[59].mxu1 }
0x2f34   :  { %v2238_v46 = vpop.f32.mrb[60].mxu1 }
0x2f35   :  { %v3605_v47 = vpop.f32.mrb[61].mxu1  ;;  %v2244_v48 = vsel %vm1911_vm11, %v2238_v46, -inf }
0x2f36   :  { %2245 = vmax.xlane.f32.xlu0 %v2244_v48  ;;  %v2241_v49 = vpop.f32.mrb[62].mxu1 }
0x2f37   :  { %v3606_v50 = vpop.f32.mrb[63].mxu1 }
0x2f3c   :  { %v2383_v51 = vpop.f32.mrb[64].mxu1 }
0x2f3d   :  { %v2384_v52 = vadd.f32 %v4770_v60, %v2383_v51  ;;  %v3619_v53 = vpop.f32.mrb[65].mxu1 }
0x2f3e   :  { %v2386_v54 = vpop.f32.mrb[66].mxu1 }
0x2f3f   :  { %v2429_v56 = vpack.c.bf16 %v2384_v52, %v2384_v52  ;;  %v3620_v57 = vpop.f32.mrb[67].mxu1 }
0x2f41   :  { %2540 = vrot.lane.b32.xlu1 %v2429_v56, %s4188_s8  ;;  %v2436_v59 = vsel %vm1864_vm10, %v2429_v56, 0  ;;  %v1914_v60 = vpop.xlane.xlu0 %1913 }
0x2f42   :  { %3630 = vmatpush3.bf16.xpose.msra.mxu1 %v2436_v59  ;;  %v1915_v61 = vsub.f32 %v1905_v34, %v1914_v60 }
0x2f43   :  { %3641 = vmatprep.subr.bf16.mxu1 %v4184_v0 }
0x2f44   :  { %v1916_v62 = vmul.f32 1.442695, %v1915_v61 }
0x2f45   :  { %2651 = vrot.lane.b32.xlu1 %v2429_v56, %s4189_s2 }
0x2f46   :  { %3905 = vpow2.f32 %v1916_v62 }
0x2f49   :  { %2649 = vrot.lane.b32.xlu1 %v2430_v27, %s4189_s2  ;;  %3632 = vmatmul.mubr.msk.bf16.vlgmr.msra.gmra.mrb[68].mxu1 %vm1864_vm10, %v2430_v27 }
0x2f4a   :  { %3643 = vmatprep.mubr.msk.bf16.mxu1 %vm4185_vm0, %v4184_v0 }
0x2f4c   :  { %2537 = vrot.lane.b32.xlu0 %v2430_v27, %s4188_s8 }
0x2f4d   :  { %2759 = vrot.lane.b32.xlu1 %v2430_v27, %s4190_s12 }
0x2f50   :  { %2761 = vrot.lane.b32.xlu0 %v2429_v56, %s4190_s12  ;;  %v3906_v63 = vpop.eup %3905 }
0x2f51   :  { %v1918_v1 = vsel %vm1911_vm11, %v3906_v63, 0.0 }
0x2f6f   :  { %1919 = vadd.xlane.f32.xlu0 %v1918_v1 }
0x2fb3   :  { %v2025_v2 = vpop.xlane.xlu1 %2024 }
0x2fb4   :  { %v2026_v3 = vsub.f32 %v2017_v39, %v2025_v2 }
0x2fb6   :  { %v2027_v4 = vmul.f32 1.442695, %v2026_v3 }
0x2fb7   :  { %v2541_v8 = vpop.permute.xlu1 %2540 }
0x2fb8   :  { %3907 = vpow2.f32 %v2027_v4  ;;  %v2546_v9 = vsel %vm1864_vm10, %v2541_v8, 0 }
0x2fb9   :  { %3642 = vmatpush3.bf16.xpose.msra.mxu1 %v2546_v9 }
0x2fba   :  { %3653 = vmatprep.subr.bf16.mxu1 %v4184_v0 }
0x2fbb   :  { %v2136_v10 = vpop.xlane.xlu0 %2135  ;;  %v2652_v20 = vpop.permute.xlu1 %2651 }
0x2fbc   :  { %v2137_v11 = vsub.f32 %v2128_v42, %v2136_v10  ;;  %v2657_v22 = vsel %vm1864_vm10, %v2652_v20, 0 }
0x2fbe   :  { %v2138_v13 = vmul.f32 1.442695, %v2137_v11 }
0x2fbf   :  { %v2650_v45 = vpop.permute.xlu1 %2649 }
0x2fc0   :  { %3909 = vpow2.f32 %v2138_v13 }
0x2fc2   :  { %v3908_v15 = vpop.eup %3907 }
0x2fc3   :  { %v2246_v5 = vpop.xlane.xlu0 %2245  ;;  %v2029_v18 = vsel %vm1911_vm11, %v3908_v15, 0.0  ;;  %v2760_v30 = vpop.permute.xlu1 %2759 }
0x2fc4   :  { %v2247_v19 = vsub.f32 %v2238_v46, %v2246_v5  ;;  %2030 = vadd.xlane.f32.xlu1 %v2029_v18 }
0x2fc6   :  { %v2248_v21 = vmul.f32 1.442695, %v2247_v19 }
0x2fc7   :  { %v2538_v7 = vpop.permute.xlu0 %2537 }
0x2fc8   :  { %3911 = vpow2.f32 %v2248_v21  ;;  %3644 = vmatmul.mubr.msk.bf16.vlgmr.msra.gmra.mrb[72].mxu1 %vm1864_vm10, %v2538_v7 }
0x2fc9   :  { %3654 = vmatpush3.bf16.xpose.msra.mxu1 %v2657_v22  ;;  %3655 = vmatprep.mubr.msk.bf16.mxu1 %vm4185_vm0, %v4184_v0 }
0x2fca   :  { %v3910_v23 = vpop.eup %3909  ;;  %3665 = vmatprep.subr.bf16.mxu1 %v4184_v0 }
0x2fcb   :  { %v2140_v24 = vsel %vm1911_vm11, %v3910_v23, 0.0  ;;  %v2762_v25 = vpop.permute.xlu0 %2761 }
0x2fcc   :  { %2141 = vadd.xlane.f32.xlu0 %v2140_v24  ;;  %v2767_v26 = vsel %vm1864_vm10, %v2762_v25, 0 }
0x2fd0   :  { %3656 = vmatmul.mubr.msk.bf16.vlgmr.msra.gmra.mrb[76].mxu1 %vm1864_vm10, %v2650_v45 }
0x2fd1   :  { %3666 = vmatpush3.bf16.xpose.msra.mxu1 %v2767_v26  ;;  %3667 = vmatprep.mubr.msk.bf16.mxu1 %vm4185_vm0, %v4184_v0 }
0x2fd2   :  { %v3912_v28 = vpop.eup %3911  ;;  %3677 = vmatprep.subr.bf16.mxu1 %v4184_v0 }
0x2fd3   :  { %v2250_v29 = vsel %vm1911_vm11, %v3912_v28, 0.0 }
0x2fd4   :  { %2251 = vadd.xlane.f32.xlu0 %v2250_v29 }
0x2fd5   :  { %2036 = vrot.lane.b32.xlu1 %v4787_v6, %s4188_s8 }
0x2fd8   :  { %3668 = vmatmul.mubr.msk.bf16.vlgmr.msra.gmra.mrb[80].mxu1 %vm1864_vm10, %v2760_v30 }
0x2fd9   :  { %2256 = vrot.lane.b32.xlu1 %v4787_v6, %s4190_s12  ;;  %3681 = vmatprep.mubr.msk.bf16.mxu1 %vm4185_vm0, %v4184_v0 }
0x2fea   :  { %2146 = vrot.lane.b32.xlu0 %v4787_v6, %s4189_s2 }
0x2ffc   :  { %v1920_v32 = vpop.xlane.xlu0 %1919 }
0x2ffd   :  { %3913 = vrcp.f32 %v1920_v32 }
0x3007   :  { %v3914_v34 = vpop.eup %3913 }
0x3008   :  { %v1922_v35 = vmul.f32 %v3914_v34, %v3906_v63 }
0x300a   :  { %v1923_v36 = vpack.c.bf16 %v1922_v35, %v1922_v35 }
0x300c   :  { %3574 = vmatmul.mubr.msk.bf16.vlgmr.msra.gmra.mrb[36].mxu0 %vm1864_vm10, %v1923_v36 }
0x300d   :  { %3585 = vmatprep.mubr.msk.bf16.mxu0 %vm4185_vm0, %v4184_v0 }
0x301c   :  { %v4872_v37 = vpop.f32.mrb[68].mxu1 }
0x301d   :  { %v3633_v38 = vpop.f32.mrb[69].mxu1  ;;  %v2478_v39 = vsel %vm1911_vm11, %v4872_v37, -inf }
0x301e   :  { %2479 = vmax.xlane.f32.xlu1 %v2478_v39  ;;  %v2475_v40 = vpop.f32.mrb[70].mxu1 }
0x301f   :  { %v3634_v41 = vpop.f32.mrb[71].mxu1 }
0x3051   :  { %v2031_v6 = vpop.xlane.xlu1 %2030 }
0x3052   :  { %3915 = vrcp.f32 %v2031_v6 }
0x3055   :  { %v2037_v14 = vpop.permute.xlu1 %2036 }
0x3056   :  { %v2042_v12 = vsel %vm942_vm4, %v2037_v14, 0 }
0x3057   :  { %3584 = vmatpush3.bf16.msra.mxu0 %v2042_v12 }
0x3058   :  { %3595 = vmatprep.subr.bf16.mxu0 %v4184_v0 }
0x3059   :  { %v2142_v42 = vpop.xlane.xlu0 %2141  ;;  %v2257_v50 = vpop.permute.xlu1 %2256 }
0x305a   :  { %3917 = vrcp.f32 %v2142_v42  ;;  %v2262_v52 = vsel %vm942_vm4, %v2257_v50, 0 }
0x305c   :  { %v3916_v31 = vpop.eup %3915 }
0x305d   :  { %v2033_v43 = vmul.f32 %v3916_v31, %v3908_v15 }
0x305f   :  { %v2034_v44 = vpack.c.bf16 %v2033_v43, %v2033_v43 }
0x3061   :  { %v2252_v17 = vpop.xlane.xlu0 %2251  ;;  %3586 = vmatmul.mubr.msk.bf16.vlgmr.msra.gmra.mrb[40].mxu0 %vm1864_vm10, %v2034_v44 }
0x3062   :  { %3919 = vrcp.f32 %v2252_v17  ;;  %3597 = vmatprep.mubr.msk.bf16.mxu0 %vm4185_vm0, %v4184_v0 }
0x3064   :  { %v3918_v46 = vpop.eup %3917 }
0x3065   :  { %v2144_v47 = vmul.f32 %v3918_v46, %v3910_v23  ;;  %v2147_v48 = vpop.permute.xlu0 %2146 }
0x3066   :  { %v2152_v49 = vsel %vm942_vm4, %v2147_v48, 0 }
0x3067   :  { %3596 = vmatpush3.bf16.msra.mxu0 %v2152_v49  ;;  %v2145_v51 = vpack.c.bf16 %v2144_v47, %v2144_v47 }
0x3068   :  { %3607 = vmatprep.subr.bf16.mxu0 %v4184_v0 }
0x306a   :  { %3598 = vmatmul.mubr.msk.bf16.vlgmr.msra.gmra.mrb[44].mxu0 %vm1864_vm10, %v2145_v51 }
0x306b   :  { %3608 = vmatpush3.bf16.msra.mxu0 %v2262_v52  ;;  %3609 = vmatprep.mubr.msk.bf16.mxu0 %vm4185_vm0, %v4184_v0 }
0x306c   :  { %v3920_v53 = vpop.eup %3919  ;;  %3621 = vmatprep.subr.bf16.mxu0 %v4184_v0 }
0x306d   :  { %v2254_v54 = vmul.f32 %v3920_v53, %v3912_v28 }
0x306f   :  { %v2255_v56 = vpack.c.bf16 %v2254_v54, %v2254_v54 }
0x3072   :  { %3610 = vmatmul.mubr.msk.bf16.vlgmr.msra.gmra.mrb[48].mxu0 %vm1864_vm10, %v2255_v56 }
0x3073   :  { %3622 = vmatpush3.bf16.msra.mxu0 %v4747_v55  ;;  %3625 = vmatprep.mubr.msk.bf16.mxu0 %vm4185_vm0, %v4184_v0 }
0x3074   :  { %3623 = vmatprep.subr.bf16.mxu0 %v4184_v0 }
0x3077   :  { %3624 = vmatpush3.bf16.msra.mxu0 %v4752_v58 }
0x3078   :  { %3635 = vmatprep.subr.bf16.mxu0 %v4184_v0 }
0x307a   :  { %3626 = vmatmul.mubr.msk.bf16.vlgmr.msra.gmra.mrb[52].mxu0 %vm323_vm2, %v4821_v33 }
0x307b   :  { %3637 = vmatprep.mubr.msk.bf16.mxu0 %vm4185_vm0, %v4184_v0 }
0x309b   :  { %v2582_v57 = vpop.f32.mrb[72].mxu1 }
0x309c   :  { %v3645_v59 = vpop.f32.mrb[73].mxu1  ;;  %v2588_v27 = vsel %vm1911_vm11, %v2582_v57, -inf }
0x309d   :  { %2589 = vmax.xlane.f32.xlu0 %v2588_v27  ;;  %v2585_v55 = vpop.f32.mrb[74].mxu1 }
0x309e   :  { %v3646_v60 = vpop.f32.mrb[75].mxu1 }
0x30a3   :  { %v2693_v61 = vpop.f32.mrb[76].mxu1 }
0x30a4   :  { %v3657_v62 = vpop.f32.mrb[77].mxu1  ;;  %v2699_v63 = vsel %vm1911_vm11, %v2693_v61, -inf }
0x30a5   :  { %2700 = vmax.xlane.f32.xlu0 %v2699_v63  ;;  %v2696_v58 = vpop.f32.mrb[78].mxu1 }
0x30a6   :  { %v3658_v1 = vpop.f32.mrb[79].mxu1 }
0x30ab   :  { %v2480_v2 = vpop.xlane.xlu1 %2479  ;;  %v2803_v3 = vpop.f32.mrb[80].mxu1 }
0x30ac   :  { %v2481_v33 = vsub.f32 %v4872_v37, %v2480_v2  ;;  %v3669_v4 = vpop.f32.mrb[81].mxu1  ;;  %v2809_v8 = vsel %vm1911_vm11, %v2803_v3, -inf }
0x30ad   :  { %2810 = vmax.xlane.f32.xlu1 %v2809_v8  ;;  %v2806_v9 = vpop.f32.mrb[82].mxu1 }
0x30ae   :  { %v2482_v10 = vmul.f32 1.442695, %v2481_v33  ;;  %v3670_v11 = vpop.f32.mrb[83].mxu1 }
0x30b0   :  { %3921 = vpow2.f32 %v2482_v10 }
0x30ba   :  { %v3922_v13 = vpop.eup %3921 }
0x30bb   :  { %v2484_v15 = vsel %vm1911_vm11, %v3922_v13, 0.0 }
0x30bc   :  { %2485 = vadd.xlane.f32.xlu0 %v2484_v15 }
0x30df   :  { %v4904_v5 = vpop.f32.mrb[36].mxu0 }
0x30e0   :  { %v3575_v18 = vpop.f32.mrb[37].mxu0 }
0x30e1   :  { %v1968_v19 = vpop.f32.mrb[38].mxu0 }
0x30e2   :  { %v3576_v20 = vpop.f32.mrb[39].mxu0 }
0x312a   :  { %v2590_v21 = vpop.xlane.xlu0 %2589 }
0x312b   :  { %v2591_v7 = vsub.f32 %v2582_v57, %v2590_v21 }
0x312d   :  { %v2592_v22 = vmul.f32 1.442695, %v2591_v7 }
0x312f   :  { %3923 = vpow2.f32 %v2592_v22  ;;  %v3764_v22 = vld [vmem:[#allocation13] sm:$0xff]  }
0x3130   :  { %3678 = vmatpush3.bf16.msra.mxu1 %v3764_v22 }
0x3131   :  { %3679 = vmatprep.subr.bf16.mxu1 %v4184_v0 }
0x3132   :  { %v2701_v23 = vpop.xlane.xlu0 %2700 }
0x3133   :  { %v2702_v24 = vsub.f32 %v2693_v61, %v2701_v23 }
0x3134   :  { %v4906_v25 = vpop.f32.mrb[40].mxu0 }
0x3135   :  { %v2703_v45 = vmul.f32 1.442695, %v2702_v24  ;;  %v3587_v26 = vpop.f32.mrb[41].mxu0  ;;  %v3765_v24 = vld [vmem:[#allocation13 + $0x8] sm:$0xff]  }
0x3136   :  { %v2081_v28 = vpop.f32.mrb[42].mxu0  ;;  %3680 = vmatpush3.bf16.msra.mxu1 %v3765_v24 }
0x3137   :  { %3925 = vpow2.f32 %v2703_v45  ;;  %v3588_v29 = vpop.f32.mrb[43].mxu0  ;;  %3693 = vmatprep.subr.bf16.mxu1 %v4184_v0 }
0x3139   :  { %v3924_v30 = vpop.eup %3923 }
0x313a   :  { %v2811_v32 = vpop.xlane.xlu1 %2810  ;;  %v2594_v34 = vsel %vm1911_vm11, %v3924_v30, 0.0 }
0x313b   :  { %v2812_v35 = vsub.f32 %v2803_v3, %v2811_v32  ;;  %2595 = vadd.xlane.f32.xlu1 %v2594_v34 }
0x313d   :  { %v2813_v36 = vmul.f32 1.442695, %v2812_v35  ;;  %v4909_v37 = vpop.f32.mrb[44].mxu0 }
0x313e   :  { %v3599_v38 = vpop.f32.mrb[45].mxu0 }
0x313f   :  { %3927 = vpow2.f32 %v2813_v36  ;;  %v2191_v39 = vpop.f32.mrb[46].mxu0 }
0x3140   :  { %v3600_v40 = vpop.f32.mrb[47].mxu0 }
0x3141   :  { %v3926_v41 = vpop.eup %3925 }
0x3142   :  { %v2705_v6 = vsel %vm1911_vm11, %v3926_v41, 0.0 }
0x3143   :  { %2706 = vadd.xlane.f32.xlu0 %v2705_v6 }
0x3145   :  { %v4912_v14 = vpop.f32.mrb[48].mxu0 }
0x3146   :  { %v3611_v12 = vpop.f32.mrb[49].mxu0 }
0x3147   :  { %v2301_v42 = vpop.f32.mrb[50].mxu0 }
0x3148   :  { %v3612_v31 = vpop.f32.mrb[51].mxu0 }
0x3149   :  { %v3928_v43 = vpop.eup %3927  ;;  %v2486_v44 = vpop.xlane.xlu0 %2485 }
0x314a   :  { %3929 = vrcp.f32 %v2486_v44  ;;  %v2815_v17 = vsel %vm1911_vm11, %v3928_v43, 0.0 }
0x314b   :  { %2816 = vadd.xlane.f32.xlu1 %v2815_v17 }
0x314d   :  { %v2423_v46 = vpop.f32.mrb[52].mxu0 }
0x314e   :  { %v2424_v47 = vadd.f32 %v4780_v16, %v2423_v46  ;;  %v3627_v48 = vpop.f32.mrb[53].mxu0 }
0x314f   :  { %v2426_v49 = vpop.f32.mrb[54].mxu0 }
0x3150   :  { %v2490_v50 = vpack.c.bf16 %v2424_v47, %v2424_v47  ;;  %v3628_v51 = vpop.f32.mrb[55].mxu0 }
0x3152   :  { %v2495_v52 = vsel %vm942_vm4, %v2490_v50, 0 }
0x3153   :  { %3636 = vmatpush3.bf16.msra.mxu0 %v2495_v52 }
0x3154   :  { %v3930_v53 = vpop.eup %3929  ;;  %3647 = vmatprep.subr.bf16.mxu0 %v4184_v0 }
0x3155   :  { %v2488_v54 = vmul.f32 %v3930_v53, %v3922_v13 }
0x3157   :  { %v2489_v56 = vpack.c.bf16 %v2488_v54, %v2488_v54 }
0x3159   :  { %2601 = vrot.lane.b32.xlu0 %v2490_v50, %s4188_s8  ;;  %3638 = vmatmul.mubr.msk.bf16.vlgmr.msra.gmra.mrb[56].mxu0 %vm1864_vm10, %v2489_v56 }
0x315a   :  { %3649 = vmatprep.mubr.msk.bf16.mxu0 %vm4185_vm0, %v4184_v0 }
0x315c   :  { %2711 = vrot.lane.b32.xlu1 %v2490_v50, %s4189_s2 }
0x3160   :  { %2821 = vrot.lane.b32.xlu1 %v2490_v50, %s4190_s12  ;;  %v3261_v50 = vld [vmem:[%s5031_s14] ss:$0 sm:$0xff] }
0x31c8   :  { %v2596_v16 = vpop.xlane.xlu1 %2595 }
0x31c9   :  { %3931 = vrcp.f32 %v2596_v16 }
0x31d0   :  { %v2707_v57 = vpop.xlane.xlu0 %2706 }
0x31d1   :  { %3933 = vrcp.f32 %v2707_v57  ;;  %v3768_v57 = vld [vmem:[#allocation14] sm:$0xff]  }
0x31d3   :  { %v3932_v59 = vpop.eup %3931 }
0x31d4   :  { %v2598_v27 = vmul.f32 %v3932_v59, %v3924_v30  ;;  %v2602_v55 = vpop.permute.xlu0 %2601  ;;  %v3265_v59 = vld [vmem:[%s5033_s16] ss:$0 sm:$0xff] }
0x31d5   :  { %v2607_v60 = vsel %vm942_vm4, %v2602_v55, 0 }
0x31d6   :  { %3648 = vmatpush3.bf16.msra.mxu0 %v2607_v60  ;;  %v2599_v61 = vpack.c.bf16 %v2598_v27, %v2598_v27 }
0x31d7   :  { %3659 = vmatprep.subr.bf16.mxu0 %v4184_v0 }
0x31d8   :  { %v2817_v62 = vpop.xlane.xlu1 %2816 }
0x31d9   :  { %3935 = vrcp.f32 %v2817_v62  ;;  %3650 = vmatmul.mubr.msk.bf16.vlgmr.msra.gmra.mrb[60].mxu0 %vm1864_vm10, %v2599_v61 }
0x31da   :  { %3661 = vmatprep.mubr.msk.bf16.mxu0 %vm4185_vm0, %v4184_v0 }
0x31db   :  { %v3934_v63 = vpop.eup %3933 }
0x31dc   :  { %v2709_v58 = vmul.f32 %v3934_v63, %v3926_v41  ;;  %v2712_v1 = vpop.permute.xlu1 %2711 }
0x31dd   :  { %v2717_v2 = vsel %vm942_vm4, %v2712_v1, 0  ;;  %v3769_v1 = vld [vmem:[%s5036_s19] sm:$0xff]  }
0x31de   :  { %3660 = vmatpush3.bf16.msra.mxu0 %v2717_v2  ;;  %v2710_v3 = vpack.c.bf16 %v2709_v58, %v2709_v58  ;;  %v3770_v2 = vld [vmem:[%s5036_s19 + $0x8] sm:$0xff]  }
0x31df   :  { %3671 = vmatprep.subr.bf16.mxu0 %v4184_v0 }
0x31e0   :  { %v2822_v33 = vpop.permute.xlu1 %2821 }
0x31e1   :  { %v2827_v4 = vsel %vm942_vm4, %v2822_v33, 0  ;;  %3662 = vmatmul.mubr.msk.bf16.vlgmr.msra.gmra.mrb[64].mxu0 %vm1864_vm10, %v2710_v3  ;;  %v3771_v3 = vld [vmem:[%s5036_s19 + $0x10] sm:$0xff]   ;;  %v3772_v33 = vld [vmem:[%s5036_s19 + $0x18] sm:$0xff]  }
0x31e2   :  { %3672 = vmatpush3.bf16.msra.mxu0 %v2827_v4  ;;  %3673 = vmatprep.mubr.msk.bf16.mxu0 %vm4185_vm0, %v4184_v0  ;;  %v3773_v4 = vld [vmem:[%s5036_s19 + $0x20] sm:$0xff]  }
0x31e3   :  { %v3936_v8 = vpop.eup %3935  ;;  %3685 = vmatprep.subr.bf16.mxu0 %v4184_v0 }
0x31e4   :  { %v2819_v9 = vmul.f32 %v3936_v8, %v3928_v43  ;;  %v3774_v8 = vld [vmem:[%s5036_s19 + $0x28] sm:$0xff]  }
0x31e6   :  { %v2820_v10 = vpack.c.bf16 %v2819_v9, %v2819_v9  ;;  %v3775_v9 = vld [vmem:[%s5036_s19 + $0x30] sm:$0xff]  }
0x31e9   :  { %3674 = vmatmul.mubr.msk.bf16.vlgmr.msra.gmra.mrb[68].mxu0 %vm1864_vm10, %v2820_v10  ;;  %v3776_v10 = vld [vmem:[%s5036_s19 + $0x38] sm:$0xff]   ;;  %s4194_s19 = smov [#allocation17]  }
0x31ea   :  { %3689 = vmatprep.mubr.msk.bf16.mxu0 %vm4185_vm0, %v4184_v0 }
0x322c   :  { %v2531_v11 = vpop.f32.mrb[56].mxu0 }
0x322d   :  { %v3639_v13 = vpop.f32.mrb[57].mxu0 }
0x322e   :  { %v2534_v15 = vpop.f32.mrb[58].mxu0 }
0x322f   :  { %v3640_v18 = vpop.f32.mrb[59].mxu0 }
0x32ac   :  { %v2643_v19 = vpop.f32.mrb[60].mxu0 }
0x32ad   :  { %v3741_v20 = vpack.i.bf16 %v4906_v25, %v2643_v19  ;;  %v3651_v21 = vpop.f32.mrb[61].mxu0  ;;  %v3766_v25 = vld [vmem:[%s5032_s15] sm:$0xff]  }
0x32ae   :  { %v2646_v7 = vpop.f32.mrb[62].mxu0  ;;  %3686 = vmatpush3.bf16.msra.mxu0 %v3766_v25 }
0x32af   :  { %3742 = vrot.lane.b32.xlu0 %v3741_v20, %s4191_s13  ;;  %v3652_v23 = vpop.f32.mrb[63].mxu0  ;;  %3687 = vmatprep.subr.bf16.mxu0 %v4184_v0  ;;  %s3177_s13 = sshll.u32 %s4194_s19, 4  ;;  %s3178_s13 = int_to_ptr.vmem [resolvable:$true] %s3177_s13 }
0x32b0   :  { %s4139_s24 = scalar_lea.vmem %s3178_s13, 32  ;;  %p4144_p3 = scmp.lt.s32.totalorder %s3178_s13, %s3178_s13 }
0x32b1   :  { %p4140_p2 = scmp.ne.s32.totalorder %s3178_s13, %s4139_s24  ;;  %p4145_p4 = scmp.lt.s32.totalorder %s4139_s24, %s4139_s24 }
0x32b3   :  { %p4146_p5 = por %p4145_p4, %p4144_p3 }
0x32b4   :  { %v2753_v45 = vpop.f32.mrb[64].mxu0 }
0x32b5   :  { %v3746_v26 = vpack.i.bf16 %v4909_v37, %v2753_v45  ;;  %v3663_v28 = vpop.f32.mrb[65].mxu0  ;;  %v3273_v45 = vld [vmem:[%s5037_s20] ss:$0 sm:$0xff]  ;;  %p4147_p6 = pnand %p4146_p5, %p4140_p2 }
0x32b6   :  { %v2756_v29 = vpop.f32.mrb[66].mxu0 }
0x32b7   :  { %3747 = vrot.lane.b32.xlu1 %v3746_v26, %s4192_s18  ;;  %v3664_v30 = vpop.f32.mrb[67].mxu0 }
0x32bb   :  { %2313 = vrot.lane.b32.xlu1 %v4912_v14, %s4193_s4 }
0x32bc   :  { %v2863_v32 = vpop.f32.mrb[68].mxu0 }
0x32bd   :  { %2878 = vrot.lane.b32.xlu0 %v2863_v32, %s4193_s4  ;;  %v3675_v34 = vpop.f32.mrb[69].mxu0 }
0x32be   :  { %v2866_v35 = vpop.f32.mrb[70].mxu0 }
0x32bf   :  { %v3676_v36 = vpop.f32.mrb[71].mxu0 }
0x3321   :  { %v3743_v37 = vpop.permute.xlu0 %3742 }
0x3322   :  { %v3745_v39 = vunpack.i.h.bf16 %v3743_v37  ;;  %v3744_v40 = vunpack.i.l.bf16 %v3743_v37 }
0x3324   :  { %v2316_v12 = vsel %vm1864_vm10, %v4904_v5, %v3745_v39  ;;  %v2881_v42 = vsel %vm1864_vm10, %v2531_v11, %v3744_v40  ;;  %v3767_v5 = vld [vmem:[%s5032_s15 + $0x8] sm:$0xff]   ;;  %v3269_v11 = vld [vmem:[#allocation16] ss:$0 sm:$0xff] }
0x3325   :  { %3688 = vmatpush3.bf16.msra.mxu0 %v3767_v5 }
0x3326   :  { %3699 = vmatprep.subr.bf16.mxu0 %v4184_v0 }
0x3329   :  { %v3748_v38 = vpop.permute.xlu1 %3747 }
0x332a   :  { %v3750_v41 = vunpack.i.h.bf16 %v3748_v38  ;;  %v3749_v6 = vunpack.i.l.bf16 %v3748_v38 }
0x332c   :  { %v2317_v14 = vsel %vm266_vm1, %v2316_v12, %v3750_v41  ;;  %v2882_v44 = vsel %vm266_vm1, %v2881_v42, %v3749_v6 }
0x332d   :  { %v2314_v31 = vpop.permute.xlu1 %2313 }
0x332e   :  { %v2319_v47 = vsel %vm2318_vm12, %v2317_v14, %v2314_v31 }
0x332f   :  { %v2879_v43 = vpop.permute.xlu0 %2878 }
0x3330   :  { %v2883_v17 = vsel %vm2318_vm12, %v2882_v44, %v2879_v43 }
0x3331   :  { %v2885_v46 = vrot.slane %v2883_v17, 7 }
0x3333   :  { %v2887_v48 = vsel %vm1728_vm6, %v2319_v47, %v2885_v46 }
0x3334   :  { %v2888_v49 = vpack.c.bf16 %v2887_v48, %v2887_v48 }
0x3336   :  { %3682 = vmatmul.mubr.msk.bf16.vlgmr.msra.gmra.mrb[84].mxu1 %vm323_vm2, %v2888_v49 }
0x3337   :  { %3695 = vmatprep.mubr.msk.bf16.mxu1 %vm4185_vm0, %v4184_v0  ;;  %3694 = vmatpush3.bf16.msra.mxu1 %v3768_v57 }
0x3409   :  { %v2944_v51 = vpop.f32.mrb[84].mxu1 }
0x340a   :  { %v2945_v52 = vadd.f32 %v3261_v50, %v2944_v51  ;;  %v3683_v53 = vpop.f32.mrb[85].mxu1 }
0x340b   :  { %v2947_v54 = vpop.f32.mrb[86].mxu1 }
0x340c   :  { %v2950_v56 = vpack.c.bf16 %v2945_v52, %v2945_v52  ;;  %v3684_v16 = vpop.f32.mrb[87].mxu1 }
0x340e   :  { %3690 = vmatmul.mubr.msk.bf16.vlgmr.msra.gmra.mrb[72].mxu0 %vm323_vm2, %v2950_v56 }
0x340f   :  { %3715 = vmatprep.mubr.msk.bf16.mxu0 %vm4185_vm0, %v4184_v0  ;;  %3700 = vmatpush3.bf16.msra.mxu0 %v3769_v1 }
0x3410   :  { %3701 = vmatprep.subr.bf16.mxu0 %v4184_v0 }
0x3413   :  { %3702 = vmatpush3.bf16.msra.mxu0 %v3770_v2 }
0x3414   :  { %3703 = vmatprep.subr.bf16.mxu0 %v4184_v0 }
0x3417   :  { %3704 = vmatpush3.bf16.msra.mxu0 %v3771_v3 }
0x3418   :  { %3705 = vmatprep.subr.bf16.mxu0 %v4184_v0 }
0x341b   :  { %3706 = vmatpush3.bf16.msra.mxu0 %v3772_v33 }
0x341c   :  { %3707 = vmatprep.subr.bf16.mxu0 %v4184_v0 }
0x341f   :  { %3708 = vmatpush3.bf16.msra.mxu0 %v3773_v4 }
0x3420   :  { %3709 = vmatprep.subr.bf16.mxu0 %v4184_v0 }
0x3423   :  { %3710 = vmatpush3.bf16.msra.mxu0 %v3774_v8 }
0x3424   :  { %3711 = vmatprep.subr.bf16.mxu0 %v4184_v0 }
0x3427   :  { %3712 = vmatpush3.bf16.msra.mxu0 %v3775_v9 }
0x3428   :  { %3713 = vmatprep.subr.bf16.mxu0 %v4184_v0 }
0x342b   :  { %3714 = vmatpush3.bf16.msra.mxu0 %v3776_v10 }
0x34e1   :  { %v3006_v27 = vpop.f32.mrb[72].mxu0 }
0x34e2   :  { %v3007_v55 = vadd.f32 %v3265_v59, %v3006_v27  ;;  %v3691_v60 = vpop.f32.mrb[73].mxu0 }
0x34e3   :  { %v3009_v61 = vpop.f32.mrb[74].mxu0 }
0x34e4   :  { %v3012_v62 = vmax.f32 %v3007_v55, 0.0  ;;  %v3692_v63 = vpop.f32.mrb[75].mxu0 }
0x34e6   :  { %v3013_v58 = vpack.c.bf16 %v3012_v62, %v3012_v62 }
0x34e8   :  { %3696 = vmatmul.mubr.msk.bf16.vlgmr.msra.gmra.mrb[88].mxu1 %vm266_vm1, %v3013_v58 }
0x35bb   :  { %v3063_v13 = vpop.f32.mrb[88].mxu1 }
0x35bc   :  { %v3064_v15 = vadd.f32 %v3269_v11, %v3063_v13  ;;  %v3697_v18 = vpop.f32.mrb[89].mxu1 }
0x35bd   :  { %v3066_v19 = vpop.f32.mrb[90].mxu1 }
0x35be   :  { %v3272_v20 = vmul.f32 -1.442695, %v3064_v15  ;;  %v3698_v21 = vpop.f32.mrb[91].mxu1 }
0x35c0   :  { %3937 = vpow2.f32 %v3272_v20 }
0x35ca   :  { %v3938_v7 = vpop.eup %3937 }
0x35cb   :  { %v3072_v22 = vadd.f32 1.0, %v3938_v7 }
0x35cd   :  { %3939 = vrcp.f32 %v3072_v22 }
0x35d7   :  { %v3940_v23 = vpop.eup %3939 }
0x35d8   :  { %v3075_v24 = vpack.c.bf16 %v3940_v23, %v3940_v23 }
0x35da   :  { %3716 = vmatmul.mubr.bf16.vlgmr.msra.gmra.mrb[76].mxu0 %v3075_v24 }
0x36ad   :  { %v3164_v0 = vpop.f32.mrb[76].mxu0 }
0x36ae   :  { %v3165_v26 = vadd.f32 %v3273_v45, %v3164_v0  ;;  %v3717_v28 = vpop.f32.mrb[77].mxu0 }
0x36af   :  { %v3167_v29 = vpop.f32.mrb[78].mxu0 }
0x36b0   :  { %3170 = vst [vmem:[#allocation17] sm:$0x3] %v3165_v26  ;;  %v3718_v25 = vpop.f32.mrb[79].mxu0 }
0x36b1   :  { %4150 = shalt.err (!%p4147_p6)
}
0x36b2   :  { %s5057_s4 = sld [smem:[#allocation30_spill]] }
0x36b8   :  { %s4151_s20 = scalar_lea.hbm %s5057_s4, 32 }
0x36b9   :  { %p4152_p7 = scmp.ne.s32.totalorder %s5057_s4, %s4151_s20  ;;  %p4155_p8 = scmp.lt.u32.totalorder %s4151_s20, %s5057_s4 }
0x36bb   :  { %p4157_p9 = pnand %p4155_p8, %p4152_p7 }
0x36bd   :  { %4160 = shalt.err (!%p4157_p9)
}
0x36be   :  { %3180 = dma.vmem_to_hbm [thread:$0]  %s3178_s13, 32, %s5057_s4, [#allocation4]  }
0x36bf   :  { %4171 = dma.done.wait [#allocation4], 32  }
0x36c0   :  { %4172 = vsyncadd [#allocation4], 4294967264 }
0x36c1   :  { %3184 = vsyncpa [#allocation3], 1 }
0x36c2   :  { %3185 = vsyncpa [#allocation6], 1 }
0x36c3   :  { %3186 = vsyncpa [#allocation9], 1 }
0x36c4   :  { %3187 = vsyncpa [#allocation12], 1 }
0x36c5   :  { %3188 = vsyncpa [#allocation15], 1 }
0x36c6   :  { %3189 = vsyncpa [#allocation4], 1 }

</bundles_post_ra>
